<compile_context>
chip_gen: v7x
topology: tpu7x:2x2x1
jax: 0.10.0
libtpu: 0.0.40
codegen_flags: <defaults>
</compile_context>

<pallas_src>
import jax
import jax.numpy as jnp
from jax import lax
from jax.experimental import pallas as pl
from jax.experimental.pallas import tpu as pltpu


# --------------------------- VMEM budgeting ----------------------------------

def _vmem_capacity_bytes():
    try:
        cap = getattr(pltpu.get_tpu_info(), "vmem_capacity_bytes", None)
        if cap:
            return int(cap)
    except Exception:
        pass
    return 64 << 20                      # conservative default (v7x per-core VMEM)


_VMEM_CAP = _vmem_capacity_bytes()
_KERNEL_BUDGET = (_VMEM_CAP * 5) // 8    # budget for double-buffered blocks
_VMEM_LIMIT = min(_VMEM_CAP, _KERNEL_BUDGET + (16 << 20))

_CPARAMS = pltpu.CompilerParams(
    dimension_semantics=("parallel", "parallel"),
    vmem_limit_bytes=_VMEM_LIMIT,
)

_SMEM_SPEC = pl.BlockSpec(memory_space=pltpu.MemorySpace.SMEM)

_SENS_DTYPE = jnp.bfloat16   # sens maps are smooth & normalized; bf16 halves their traffic
_EPS = 1e-12                 # tiny eps in rsqrt (vs exact fastMRI divide) for safety


def _row_bytes(w, refs):
    """Approx. VMEM bytes per H-row for one grid step over all refs, including
    double buffering and lane padding.  refs: list of (channels, itemsize)."""
    wpad = max(1, -(-w // 128)) * 128
    return 2 * sum(ch * wpad * isz for ch, isz in refs)


def _pick_th(h_extent, row_bytes, *, h_offset=0, n_batch=1, budget=None):
    """Largest H-tile (multiple of 8, divides h_extent, crop-offset aligned) whose
    double-buffered blocks fit the per-generation VMEM budget; keeps >=2 grid
    blocks when possible so megacore has something to shard.  None => no legal
    tile (caller uses a pure-jnp fallback, never a full-extent block)."""
    budget = _KERNEL_BUDGET if budget is None else budget
    cands = [t for t in range(8, h_extent + 1, 8)
             if h_extent % t == 0 and h_offset % t == 0 and t * row_bytes <= budget]
    if not cands:
        return None
    cands.sort(reverse=True)
    th = cands[0]
    if n_batch * (h_extent // th) < 2:
        for t in cands[1:]:
            if n_batch * (h_extent // t) >= 2:
                th = t
                break
    return th


def _coil_spec(nc, th, w, hb0=0):
    return pl.BlockSpec((1, nc, th, w), lambda b, h: (b, 0, h + hb0, 0))


def _img_spec(th, w):
    return pl.BlockSpec((1, th, w), lambda b, h: (b, h, 0))


def _coil_sdt(b, nc, h, w, dtype):
    return jax.ShapeDtypeStruct((b, nc, h, w), dtype)


# ----------------------- shift-free centered FFT glue ------------------------
# For even H, W:
#   fft2c(z)  = s * P .* fft2 (P .* z),   ifft2c(z) = s * P .* ifft2(P .* z)
# with P[h,w] = (-1)^(h+w), s = (-1)^((H+W)/2).  Working in the modulated
# domain k~ = P*k (sens maps S~ = normalized ifft2(k~0)) makes every P / s
# cancel across reduce / regularizer / expand / soft-DC, and |ifft2c(k)| ==
# |ifft2(k~)|, so no shift or checkerboard pass touches HBM inside the loop.

def _fft2(zr, zi):
    z = jnp.fft.fft2(lax.complex(zr, zi), axes=(-2, -1), norm="ortho")
    return jnp.real(z), jnp.imag(z)


def _ifft2(zr, zi):
    z = jnp.fft.ifft2(lax.complex(zr, zi), axes=(-2, -1), norm="ortho")
    return jnp.real(z), jnp.imag(z)


def _checkerboard(h, w, dtype=jnp.float32):
    idx = jnp.arange(h)[:, None] + jnp.arange(w)[None, :]
    return 1.0 - 2.0 * (idx % 2).astype(dtype)


# ------------------------------ Pallas kernels --------------------------------

def _sens0_kernel(reg_ref, cr_ref, ci_ref, sr_ref, si_ref, er_ref, ei_ref):
    """Cascade 0, fused: sens-map RSS-normalization + sens_reduce + regularizer
    stand-in + sens_expand.  Explicit coil loops keep only one (TH, W) slab live
    at a time (no (Nc, TH, W) temporaries)."""
    nc = cr_ref.shape[1]
    cr, ci = cr_ref[0, 0], ci_ref[0, 0]
    ss = cr * cr + ci * ci
    for c in range(1, nc):
        cr, ci = cr_ref[0, c], ci_ref[0, c]
        ss = ss + cr * cr + ci * ci
    inv = lax.rsqrt(ss + _EPS)                      # EUP slot
    rr = jnp.zeros_like(ss)
    ri = jnp.zeros_like(ss)
    for c in range(nc):
        cr, ci = cr_ref[0, c], ci_ref[0, c]
        s_r, s_i = cr * inv, ci * inv
        sr_ref[0, c] = s_r.astype(sr_ref.dtype)
        si_ref[0, c] = s_i.astype(si_ref.dtype)
        # sens_reduce: x * conj(S); at cascade 0 the coil images ARE cr/ci
        rr = rr + (cr * s_r + ci * s_i)
        ri = ri + (ci * s_r - cr * s_i)
    # TODO(synk): MambaUnrolled (Mamba-SSM U-Net) regularizer not provided;
    # deterministic stand-in = per-pixel 2x2 linear map + bias on (re, im).
    gr = reg_ref[0] * rr + reg_ref[1] * ri + reg_ref[4]
    gi = reg_ref[2] * rr + reg_ref[3] * ri + reg_ref[5]
    for c in range(nc):
        s_r = sr_ref[0, c].astype(gr.dtype)
        s_i = si_ref[0, c].astype(gr.dtype)
        er_ref[0, c] = gr * s_r - gi * s_i
        ei_ref[0, c] = gr * s_i + gi * s_r


def _reduce_reg_expand_kernel(reg_ref, xr_ref, xi_ref, sr_ref, si_ref, er_ref, ei_ref):
    """Cascades >= 1, fused: sens_reduce + regularizer stand-in + sens_expand.
    The reduced image never leaves VMEM."""
    nc = xr_ref.shape[1]
    rr = None
    ri = None
    for c in range(nc):
        xr, xi = xr_ref[0, c], xi_ref[0, c]
        s_r = sr_ref[0, c].astype(xr.dtype)
        s_i = si_ref[0, c].astype(xr.dtype)
        prr = xr * s_r + xi * s_i
        pri = xi * s_r - xr * s_i
        rr = prr if rr is None else rr + prr
        ri = pri if ri is None else ri + pri
    gr = reg_ref[0] * rr + reg_ref[1] * ri + reg_ref[4]
    gi = reg_ref[2] * rr + reg_ref[3] * ri + reg_ref[5]
    for c in range(nc):
        s_r = sr_ref[0, c].astype(gr.dtype)
        s_i = si_ref[0, c].astype(gr.dtype)
        er_ref[0, c] = gr * s_r - gi * s_i
        ei_ref[0, c] = gr * s_i + gi * s_r


def _dc_first_kernel(kr_ref, ki_ref, mr_ref, mi_ref, or_ref, oi_ref):
    """Cascade 0: cur_k == ref_k so soft-DC is exactly zero; ref/mask not streamed."""
    or_ref[...] = kr_ref[...] - mr_ref[...]
    oi_ref[...] = ki_ref[...] - mi_ref[...]


def _dc_kernel(dcw_ref, mask_ref, kr_ref, ki_ref, rkr_ref, rki_ref, mr_ref, mi_ref,
               or_ref, oi_ref):
    """out = cur_k - where(mask, cur_k - ref_k, 0) * dc_weight - model_term."""
    dcw = dcw_ref[0]
    msk = mask_ref[0] > 0.0                         # (1, W) -> broadcasts over (Nc, TH, W)
    kr, ki = kr_ref[0], ki_ref[0]
    dcr = jnp.where(msk[None], (kr - rkr_ref[0]) * dcw, 0.0)
    dci = jnp.where(msk[None], (ki - rki_ref[0]) * dcw, 0.0)
    or_ref[0] = kr - dcr - mr_ref[0]
    oi_ref[0] = ki - dci - mi_ref[0]


def _rss_kernel(xr_ref, xi_ref, o_ref):
    """rss(complex_abs(x), dim=coils) = sqrt(sum_c re^2 + im^2)."""
    nc = xr_ref.shape[1]
    xr, xi = xr_ref[0, 0], xi_ref[0, 0]
    ss = xr * xr + xi * xi
    for c in range(1, nc):
        xr, xi = xr_ref[0, c], xi_ref[0, c]
        ss = ss + xr * xr + xi * xi
    o_ref[0] = jnp.sqrt(ss)


# ------------------------------ kernel wrappers --------------------------------

def _sens0_ref(cr, ci, reg, sens_dtype):
    ss = jnp.sum(cr * cr + ci * ci, axis=1, keepdims=True)
    inv = lax.rsqrt(ss + _EPS)
    s_r, s_i = cr * inv, ci * inv
    rr = jnp.sum(cr * s_r + ci * s_i, axis=1, keepdims=True)
    ri = jnp.sum(ci * s_r - cr * s_i, axis=1, keepdims=True)
    gr = reg[0] * rr + reg[1] * ri + reg[4]
    gi = reg[2] * rr + reg[3] * ri + reg[5]
    sr, si = s_r.astype(sens_dtype), s_i.astype(sens_dtype)
    srf, sif = sr.astype(cr.dtype), si.astype(cr.dtype)
    return sr, si, gr * srf - gi * sif, gr * sif + gi * srf


def sens0_reduce_reg_expand(cr, ci, reg_params, sens_dtype=_SENS_DTYPE):
    B, Nc, H, W = cr.shape
    sz = jnp.dtype(sens_dtype).itemsize
    row = _row_bytes(W, [(Nc, 4), (Nc, 4), (Nc, sz), (Nc, sz), (Nc, 4), (Nc, 4)])
    th = _pick_th(H, row, n_batch=B)
    if th is None:
        # TODO(synk): H not a multiple of 8 -> pure-jnp fallback (no VMEM cliff).
        return _sens0_ref(cr, ci, reg_params, sens_dtype)
    cspec = _coil_spec(Nc, th, W)
    return pl.pallas_call(
        _sens0_kernel,
        grid=(B, H // th),
        in_specs=[_SMEM_SPEC, cspec, cspec],
        out_specs=(cspec, cspec, cspec, cspec),
        out_shape=(_coil_sdt(B, Nc, H, W, sens_dtype),
                   _coil_sdt(B, Nc, H, W, sens_dtype),
                   _coil_sdt(B, Nc, H, W, cr.dtype),
                   _coil_sdt(B, Nc, H, W, cr.dtype)),
        compiler_params=_CPARAMS,
    )(reg_params, cr, ci)


def _reduce_reg_expand_ref(xr, xi, sr, si, reg):
    s_r, s_i = sr.astype(xr.dtype), si.astype(xr.dtype)
    rr = jnp.sum(xr * s_r + xi * s_i, axis=1, keepdims=True)
    ri = jnp.sum(xi * s_r - xr * s_i, axis=1, keepdims=True)
    gr = reg[0] * rr + reg[1] * ri + reg[4]
    gi = reg[2] * rr + reg[3] * ri + reg[5]
    return gr * s_r - gi * s_i, gr * s_i + gi * s_r


def reduce_reg_expand(xr, xi, sr, si, reg_params):
    B, Nc, H, W = xr.shape
    sz = jnp.dtype(sr.dtype).itemsize
    row = _row_bytes(W, [(Nc, 4), (Nc, 4), (Nc, sz), (Nc, sz), (Nc, 4), (Nc, 4)])
    th = _pick_th(H, row, n_batch=B)
    if th is None:
        return _reduce_reg_expand_ref(xr, xi, sr, si, reg_params)
    cspec = _coil_spec(Nc, th, W)
    return pl.pallas_call(
        _reduce_reg_expand_kernel,
        grid=(B, H // th),
        in_specs=[_SMEM_SPEC, cspec, cspec, cspec, cspec],
        out_specs=(cspec, cspec),
        out_shape=(_coil_sdt(B, Nc, H, W, xr.dtype),) * 2,
        compiler_params=_CPARAMS,
    )(reg_params, xr, xi, sr, si)


def dc_combine_first(kr, ki, mr, mi):
    B, Nc, H, W = kr.shape
    row = _row_bytes(W, [(Nc, 4)] * 6)
    th = _pick_th(H, row, n_batch=B)
    if th is None:
        return kr - mr, ki - mi
    cspec = _coil_spec(Nc, th, W)
    return pl.pallas_call(
        _dc_first_kernel,
        grid=(B, H // th),
        in_specs=[cspec] * 4,
        out_specs=(cspec, cspec),
        out_shape=(_coil_sdt(B, Nc, H, W, kr.dtype),) * 2,
        compiler_params=_CPARAMS,
    )(kr, ki, mr, mi)


def dc_combine(kr, ki, rkr, rki, mr, mi, mask_w, dc_weight):
    B, Nc, H, W = kr.shape
    row = _row_bytes(W, [(Nc, 4)] * 8 + [(1, 4)])
    th = _pick_th(H, row, n_batch=B)
    if th is None:
        msk = mask_w[:, None] > 0.0                   # (B,1,1,W)
        dcr = jnp.where(msk, (kr - rkr) * dc_weight[0], 0.0)
        dci = jnp.where(msk, (ki - rki) * dc_weight[0], 0.0)
        return kr - dcr - mr, ki - dci - mi
    cspec = _coil_spec(Nc, th, W)
    mspec = pl.BlockSpec((1, 1, W), lambda b, h: (b, 0, 0))
    return pl.pallas_call(
        _dc_kernel,
        grid=(B, H // th),
        in_specs=[_SMEM_SPEC, mspec] + [cspec] * 6,
        out_specs=(cspec, cspec),
        out_shape=(_coil_sdt(B, Nc, H, W, kr.dtype),) * 2,
        compiler_params=_CPARAMS,
    )(dc_weight, mask_w, kr, ki, rkr, rki, mr, mi)


def rss_abs(xr, xi, h_start=0, out_h=None):
    """RSS over coils of |x|; crop-aware in H when the crop offset is tile-aligned."""
    B, Nc, H, W = xr.shape
    out_h = H if out_h is None else out_h
    row = _row_bytes(W, [(Nc, 4), (Nc, 4), (1, 4)])
    th = _pick_th(out_h, row, h_offset=h_start, n_batch=B)
    if th is None and (h_start != 0 or out_h != H):
        # crop offset not tile-aligned: tiled full-H RSS (light kernel), then slice.
        return rss_abs(xr, xi)[:, h_start:h_start + out_h]
    if th is None:
        return jnp.sqrt(jnp.sum(xr * xr + xi * xi, axis=1))   # H not a multiple of 8
    hb0 = h_start // th
    cspec = _coil_spec(Nc, th, W, hb0=hb0)
    return pl.pallas_call(
        _rss_kernel,
        grid=(B, out_h // th),
        in_specs=[cspec, cspec],
        out_specs=_img_spec(th, W),
        out_shape=jax.ShapeDtypeStruct((B, out_h, W), xr.dtype),
        compiler_params=_CPARAMS,
    )(xr, xi)


# ------------------------------ model forward ---------------------------------

def mamba_varnet_forward(masked_k, mask, params):
    """
    masked_k: (B, Nc, H, W, 2) undersampled k-space
    mask:     (B, 1, 1, W, 1)  sampling mask
    returns:  (B, min(384, H), min(384, W)) magnitude image
    """
    B, Nc, H, W, _ = masked_k.shape
    if H % 2 or W % 2:
        # TODO(synk): odd H/W needs the explicit fftshift path; fastMRI shapes are even.
        raise ValueError("MambaVarNet Pallas port requires even H and W")

    dtype = jnp.float32
    # One-time boundary pass (XLA fuses slice + multiply): move to the
    # modulated domain k~ = P * k, P = (-1)^(h+w) checkerboard.
    P = _checkerboard(H, W, dtype)
    kr0 = masked_k[..., 0].astype(dtype) * P
    ki0 = masked_k[..., 1].astype(dtype) * P
    mask_w = mask[:, 0, 0, :, 0].astype(dtype).reshape(B, 1, W)

    # --- sensitivity estimation + cascade 0, sharing one IFFT ------------------
    # TODO(synk): SensitivityModel's ACS-line masking + per-coil U-Net refinement
    # (chans=8, pools=4) are not provided; only the RSS normalization of
    # ifft2c(masked_k) is kept, which makes cascade-0's coil images identical to
    # the sens-net input, so this IFFT is computed once and reused.
    cr, ci = _ifft2(kr0, ki0)
    casc0 = params["cascades"][0]
    sr, si, er, ei = sens0_reduce_reg_expand(cr, ci, casc0["reg_params"])
    mr, mi = _fft2(er, ei)
    kr, ki = dc_combine_first(kr0, ki0, mr, mi)      # soft-DC is exactly zero here

    # --- cascades 1..N-1 --------------------------------------------------------
    for casc in params["cascades"][1:]:
        xr, xi = _ifft2(kr, ki)
        er, ei = reduce_reg_expand(xr, xi, sr, si, casc["reg_params"])
        mr, mi = _fft2(er, ei)
        kr, ki = dc_combine(kr, ki, kr0, ki0, mr, mi, mask_w, casc["dc_weight"])

    # --- final image: rss(complex_abs(ifft2c(k))) + center crop -----------------
    ir, ii = _ifft2(kr, ki)               # |ifft2c(k)| == |ifft2(k~)|, no un-modulation
    ch, cw = min(384, H), min(384, W)
    h0, w0 = (H - ch) // 2, (W - cw) // 2
    img = rss_abs(ir, ii, h_start=h0, out_h=ch)
    if w0 != 0 or cw != W:
        img = img[:, :, w0:w0 + cw]
    return img


# ----------------------------------- main --------------------------------------

if __name__ == "__main__":
    key = jax.random.PRNGKey(0)
    B, Nc, H, W = 2, 4, 16, 16
    k1, _ = jax.random.split(key)

    full_k = jax.random.normal(k1, (B, Nc, H, W, 2), dtype=jnp.float32)

    # deterministic undersampling mask over W: every other column + ACS center
    cols = jnp.arange(W)
    mask_1d = ((cols % 2 == 0) | (jnp.abs(cols - W // 2) < 2)).astype(jnp.float32)
    mask = jnp.broadcast_to(mask_1d[None, None, None, :, None], (B, 1, 1, W, 1))
    masked_k = full_k * mask

    # deterministic "checkpoint": dc_weight = 1.0 (nn.Parameter init), small fixed
    # per-cascade 2x2 regularizer weights packed as [w00, w01, w10, w11, b0, b1].
    num_cascades = 3
    params = {
        "cascades": [
            {
                "dc_weight": jnp.ones((1,), dtype=jnp.float32),
                "reg_params": jnp.array(
                    [0.10 + 0.01 * c, -0.05, 0.05, 0.10 - 0.01 * c, 0.01, -0.01],
                    dtype=jnp.float32),
            }
            for c in range(num_cascades)
        ]
    }

    fwd = jax.jit(mamba_varnet_forward)
    out = fwd(masked_k, mask, params)
    jax.block_until_ready(out)

    assert out.shape == (B, min(384, H), min(384, W)), out.shape
    assert bool(jnp.all(jnp.isfinite(out)))
    print("KERNEL_OK")
</pallas_src>

<mosaic_0001>
module attributes {stable_mosaic.version = 11 : i64} {
  func.func @_sens0_kernel(%arg0: i32, %arg1: i32, %arg2: memref<6xf32, #tpu.memory_space<smem>>, %arg3: memref<1x4x16x16xf32, #tpu.memory_space<vmem>>, %arg4: memref<1x4x16x16xf32, #tpu.memory_space<vmem>>, %arg5: memref<1x4x16x16xbf16, #tpu.memory_space<vmem>>, %arg6: memref<1x4x16x16xbf16, #tpu.memory_space<vmem>>, %arg7: memref<1x4x16x16xf32, #tpu.memory_space<vmem>>, %arg8: memref<1x4x16x16xf32, #tpu.memory_space<vmem>>) attributes {dimension_semantics = [#tpu.dimension_semantics<parallel>, #tpu.dimension_semantics<parallel>], iteration_bounds = array<i64: 2, 1>, scalar_prefetch = 0 : i64, scratch_operands = 0 : i64, tpu.core_type = #tpu.core_type<tc>, window_params = [{transform_indices = @transform_0, window_bounds = array<i64: 6>}, {transform_indices = @transform_1, window_bounds = array<i64: 1, 4, 16, 16>}, {transform_indices = @transform_2, window_bounds = array<i64: 1, 4, 16, 16>}, {transform_indices = @transform_3, window_bounds = array<i64: 1, 4, 16, 16>}, {transform_indices = @transform_4, window_bounds = array<i64: 1, 4, 16, 16>}, {transform_indices = @transform_5, window_bounds = array<i64: 1, 4, 16, 16>}, {transform_indices = @transform_6, window_bounds = array<i64: 1, 4, 16, 16>}]} {
    %c0 = arith.constant 0 : index
    %c0_0 = arith.constant 0 : index
    %c0_1 = arith.constant 0 : index
    %c0_2 = arith.constant 0 : index
    %0 = vector.load %arg3[%c0, %c0_0, %c0_1, %c0_2] : memref<1x4x16x16xf32, #tpu.memory_space<vmem>>, vector<1x1x16x16xf32>
    %1 = vector.shape_cast %0 : vector<1x1x16x16xf32> to vector<16x16xf32>
    %c0_3 = arith.constant 0 : index
    %c0_4 = arith.constant 0 : index
    %c0_5 = arith.constant 0 : index
    %c0_6 = arith.constant 0 : index
    %2 = vector.load %arg4[%c0_3, %c0_4, %c0_5, %c0_6] : memref<1x4x16x16xf32, #tpu.memory_space<vmem>>, vector<1x1x16x16xf32>
    %3 = vector.shape_cast %2 : vector<1x1x16x16xf32> to vector<16x16xf32>
    %4 = arith.mulf %1, %1 : vector<16x16xf32>
    %5 = arith.mulf %3, %3 : vector<16x16xf32>
    %6 = arith.addf %4, %5 : vector<16x16xf32>
    %c0_7 = arith.constant 0 : index
    %c1 = arith.constant 1 : index
    %c0_8 = arith.constant 0 : index
    %c0_9 = arith.constant 0 : index
    %7 = vector.load %arg3[%c0_7, %c1, %c0_8, %c0_9] : memref<1x4x16x16xf32, #tpu.memory_space<vmem>>, vector<1x1x16x16xf32>
    %8 = vector.shape_cast %7 : vector<1x1x16x16xf32> to vector<16x16xf32>
    %c0_10 = arith.constant 0 : index
    %c1_11 = arith.constant 1 : index
    %c0_12 = arith.constant 0 : index
    %c0_13 = arith.constant 0 : index
    %9 = vector.load %arg4[%c0_10, %c1_11, %c0_12, %c0_13] : memref<1x4x16x16xf32, #tpu.memory_space<vmem>>, vector<1x1x16x16xf32>
    %10 = vector.shape_cast %9 : vector<1x1x16x16xf32> to vector<16x16xf32>
    %11 = arith.mulf %8, %8 : vector<16x16xf32>
    %12 = arith.addf %6, %11 : vector<16x16xf32>
    %13 = arith.mulf %10, %10 : vector<16x16xf32>
    %14 = arith.addf %12, %13 : vector<16x16xf32>
    %c0_14 = arith.constant 0 : index
    %c2 = arith.constant 2 : index
    %c0_15 = arith.constant 0 : index
    %c0_16 = arith.constant 0 : index
    %15 = vector.load %arg3[%c0_14, %c2, %c0_15, %c0_16] : memref<1x4x16x16xf32, #tpu.memory_space<vmem>>, vector<1x1x16x16xf32>
    %16 = vector.shape_cast %15 : vector<1x1x16x16xf32> to vector<16x16xf32>
    %c0_17 = arith.constant 0 : index
    %c2_18 = arith.constant 2 : index
    %c0_19 = arith.constant 0 : index
    %c0_20 = arith.constant 0 : index
    %17 = vector.load %arg4[%c0_17, %c2_18, %c0_19, %c0_20] : memref<1x4x16x16xf32, #tpu.memory_space<vmem>>, vector<1x1x16x16xf32>
    %18 = vector.shape_cast %17 : vector<1x1x16x16xf32> to vector<16x16xf32>
    %19 = arith.mulf %16, %16 : vector<16x16xf32>
    %20 = arith.addf %14, %19 : vector<16x16xf32>
    %21 = arith.mulf %18, %18 : vector<16x16xf32>
    %22 = arith.addf %20, %21 : vector<16x16xf32>
    %c0_21 = arith.constant 0 : index
    %c3 = arith.constant 3 : index
    %c0_22 = arith.constant 0 : index
    %c0_23 = arith.constant 0 : index
    %23 = vector.load %arg3[%c0_21, %c3, %c0_22, %c0_23] : memref<1x4x16x16xf32, #tpu.memory_space<vmem>>, vector<1x1x16x16xf32>
    %24 = vector.shape_cast %23 : vector<1x1x16x16xf32> to vector<16x16xf32>
    %c0_24 = arith.constant 0 : index
    %c3_25 = arith.constant 3 : index
    %c0_26 = arith.constant 0 : index
    %c0_27 = arith.constant 0 : index
    %25 = vector.load %arg4[%c0_24, %c3_25, %c0_26, %c0_27] : memref<1x4x16x16xf32, #tpu.memory_space<vmem>>, vector<1x1x16x16xf32>
    %26 = vector.shape_cast %25 : vector<1x1x16x16xf32> to vector<16x16xf32>
    %27 = arith.mulf %24, %24 : vector<16x16xf32>
    %28 = arith.addf %22, %27 : vector<16x16xf32>
    %29 = arith.mulf %26, %26 : vector<16x16xf32>
    %30 = arith.addf %28, %29 : vector<16x16xf32>
    %cst = arith.constant 9.99999996E-13 : f32
    %31 = vector.broadcast %cst : f32 to vector<16x16xf32>
    %32 = arith.addf %30, %31 : vector<16x16xf32>
    %33 = math.rsqrt %32 : vector<16x16xf32>
    %cst_28 = arith.constant 0.000000e+00 : f32
    %34 = vector.broadcast %cst_28 : f32 to vector<16x16xf32>
    %cst_29 = arith.constant 0.000000e+00 : f32
    %35 = vector.broadcast %cst_29 : f32 to vector<16x16xf32>
    %c0_30 = arith.constant 0 : index
    %c0_31 = arith.constant 0 : index
    %c0_32 = arith.constant 0 : index
    %c0_33 = arith.constant 0 : index
    %36 = vector.load %arg3[%c0_30, %c0_31, %c0_32, %c0_33] : memref<1x4x16x16xf32, #tpu.memory_space<vmem>>, vector<1x1x16x16xf32>
    %37 = vector.shape_cast %36 : vector<1x1x16x16xf32> to vector<16x16xf32>
    %c0_34 = arith.constant 0 : index
    %c0_35 = arith.constant 0 : index
    %c0_36 = arith.constant 0 : index
    %c0_37 = arith.constant 0 : index
    %38 = vector.load %arg4[%c0_34, %c0_35, %c0_36, %c0_37] : memref<1x4x16x16xf32, #tpu.memory_space<vmem>>, vector<1x1x16x16xf32>
    %39 = vector.shape_cast %38 : vector<1x1x16x16xf32> to vector<16x16xf32>
    %40 = arith.mulf %37, %33 : vector<16x16xf32>
    %41 = arith.mulf %39, %33 : vector<16x16xf32>
    %42 = arith.truncf %40 : vector<16x16xf32> to vector<16x16xbf16>
    %c0_38 = arith.constant 0 : index
    %c0_39 = arith.constant 0 : index
    %c0_40 = arith.constant 0 : index
    %c0_41 = arith.constant 0 : index
    %43 = vector.load %arg5[%c0_38, %c0_39, %c0_40, %c0_41] : memref<1x4x16x16xbf16, #tpu.memory_space<vmem>>, vector<1x1x16x16xbf16>
    %44 = vector.shape_cast %43 : vector<1x1x16x16xbf16> to vector<16x16xbf16>
    %45 = vector.shape_cast %42 : vector<16x16xbf16> to vector<1x1x16x16xbf16>
    tpu.vector_store %arg5[%c0_38, %c0_39, %c0_40, %c0_41], %45 {strides = array<i32>} : memref<1x4x16x16xbf16, #tpu.memory_space<vmem>>, vector<1x1x16x16xbf16>,
    %46 = arith.truncf %41 : vector<16x16xf32> to vector<16x16xbf16>
    %c0_42 = arith.constant 0 : index
    %c0_43 = arith.constant 0 : index
    %c0_44 = arith.constant 0 : index
    %c0_45 = arith.constant 0 : index
    %47 = vector.load %arg6[%c0_42, %c0_43, %c0_44, %c0_45] : memref<1x4x16x16xbf16, #tpu.memory_space<vmem>>, vector<1x1x16x16xbf16>
    %48 = vector.shape_cast %47 : vector<1x1x16x16xbf16> to vector<16x16xbf16>
    %49 = vector.shape_cast %46 : vector<16x16xbf16> to vector<1x1x16x16xbf16>
    tpu.vector_store %arg6[%c0_42, %c0_43, %c0_44, %c0_45], %49 {strides = array<i32>} : memref<1x4x16x16xbf16, #tpu.memory_space<vmem>>, vector<1x1x16x16xbf16>,
    %50 = arith.mulf %37, %40 : vector<16x16xf32>
    %51 = arith.mulf %39, %41 : vector<16x16xf32>
    %52 = arith.addf %50, %51 : vector<16x16xf32>
    %53 = arith.addf %34, %52 : vector<16x16xf32>
    %54 = arith.mulf %39, %40 : vector<16x16xf32>
    %55 = arith.mulf %37, %41 : vector<16x16xf32>
    %56 = arith.subf %54, %55 : vector<16x16xf32>
    %57 = arith.addf %35, %56 : vector<16x16xf32>
    %c0_46 = arith.constant 0 : index
    %c1_47 = arith.constant 1 : index
    %c0_48 = arith.constant 0 : index
    %c0_49 = arith.constant 0 : index
    %58 = vector.load %arg3[%c0_46, %c1_47, %c0_48, %c0_49] : memref<1x4x16x16xf32, #tpu.memory_space<vmem>>, vector<1x1x16x16xf32>
    %59 = vector.shape_cast %58 : vector<1x1x16x16xf32> to vector<16x16xf32>
    %c0_50 = arith.constant 0 : index
    %c1_51 = arith.constant 1 : index
    %c0_52 = arith.constant 0 : index
    %c0_53 = arith.constant 0 : index
    %60 = vector.load %arg4[%c0_50, %c1_51, %c0_52, %c0_53] : memref<1x4x16x16xf32, #tpu.memory_space<vmem>>, vector<1x1x16x16xf32>
    %61 = vector.shape_cast %60 : vector<1x1x16x16xf32> to vector<16x16xf32>
    %62 = arith.mulf %59, %33 : vector<16x16xf32>
    %63 = arith.mulf %61, %33 : vector<16x16xf32>
    %64 = arith.truncf %62 : vector<16x16xf32> to vector<16x16xbf16>
    %c0_54 = arith.constant 0 : index
    %c1_55 = arith.constant 1 : index
    %c0_56 = arith.constant 0 : index
    %c0_57 = arith.constant 0 : index
    %65 = vector.load %arg5[%c0_54, %c1_55, %c0_56, %c0_57] : memref<1x4x16x16xbf16, #tpu.memory_space<vmem>>, vector<1x1x16x16xbf16>
    %66 = vector.shape_cast %65 : vector<1x1x16x16xbf16> to vector<16x16xbf16>
    %67 = vector.shape_cast %64 : vector<16x16xbf16> to vector<1x1x16x16xbf16>
    tpu.vector_store %arg5[%c0_54, %c1_55, %c0_56, %c0_57], %67 {strides = array<i32>} : memref<1x4x16x16xbf16, #tpu.memory_space<vmem>>, vector<1x1x16x16xbf16>,
    %68 = arith.truncf %63 : vector<16x16xf32> to vector<16x16xbf16>
    %c0_58 = arith.constant 0 : index
    %c1_59 = arith.constant 1 : index
    %c0_60 = arith.constant 0 : index
    %c0_61 = arith.constant 0 : index
    %69 = vector.load %arg6[%c0_58, %c1_59, %c0_60, %c0_61] : memref<1x4x16x16xbf16, #tpu.memory_space<vmem>>, vector<1x1x16x16xbf16>
    %70 = vector.shape_cast %69 : vector<1x1x16x16xbf16> to vector<16x16xbf16>
    %71 = vector.shape_cast %68 : vector<16x16xbf16> to vector<1x1x16x16xbf16>
    tpu.vector_store %arg6[%c0_58, %c1_59, %c0_60, %c0_61], %71 {strides = array<i32>} : memref<1x4x16x16xbf16, #tpu.memory_space<vmem>>, vector<1x1x16x16xbf16>,
    %72 = arith.mulf %59, %62 : vector<16x16xf32>
    %73 = arith.mulf %61, %63 : vector<16x16xf32>
    %74 = arith.addf %72, %73 : vector<16x16xf32>
    %75 = arith.addf %53, %74 : vector<16x16xf32>
    %76 = arith.mulf %61, %62 : vector<16x16xf32>
    %77 = arith.mulf %59, %63 : vector<16x16xf32>
    %78 = arith.subf %76, %77 : vector<16x16xf32>
    %79 = arith.addf %57, %78 : vector<16x16xf32>
    %c0_62 = arith.constant 0 : index
    %c2_63 = arith.constant 2 : index
    %c0_64 = arith.constant 0 : index
    %c0_65 = arith.constant 0 : index
    %80 = vector.load %arg3[%c0_62, %c2_63, %c0_64, %c0_65] : memref<1x4x16x16xf32, #tpu.memory_space<vmem>>, vector<1x1x16x16xf32>
    %81 = vector.shape_cast %80 : vector<1x1x16x16xf32> to vector<16x16xf32>
    %c0_66 = arith.constant 0 : index
    %c2_67 = arith.constant 2 : index
    %c0_68 = arith.constant 0 : index
    %c0_69 = arith.constant 0 : index
    %82 = vector.load %arg4[%c0_66, %c2_67, %c0_68, %c0_69] : memref<1x4x16x16xf32, #tpu.memory_space<vmem>>, vector<1x1x16x16xf32>
    %83 = vector.shape_cast %82 : vector<1x1x16x16xf32> to vector<16x16xf32>
    %84 = arith.mulf %81, %33 : vector<16x16xf32>
    %85 = arith.mulf %83, %33 : vector<16x16xf32>
    %86 = arith.truncf %84 : vector<16x16xf32> to vector<16x16xbf16>
    %c0_70 = arith.constant 0 : index
    %c2_71 = arith.constant 2 : index
    %c0_72 = arith.constant 0 : index
    %c0_73 = arith.constant 0 : index
    %87 = vector.load %arg5[%c0_70, %c2_71, %c0_72, %c0_73] : memref<1x4x16x16xbf16, #tpu.memory_space<vmem>>, vector<1x1x16x16xbf16>
    %88 = vector.shape_cast %87 : vector<1x1x16x16xbf16> to vector<16x16xbf16>
    %89 = vector.shape_cast %86 : vector<16x16xbf16> to vector<1x1x16x16xbf16>
    tpu.vector_store %arg5[%c0_70, %c2_71, %c0_72, %c0_73], %89 {strides = array<i32>} : memref<1x4x16x16xbf16, #tpu.memory_space<vmem>>, vector<1x1x16x16xbf16>,
    %90 = arith.truncf %85 : vector<16x16xf32> to vector<16x16xbf16>
    %c0_74 = arith.constant 0 : index
    %c2_75 = arith.constant 2 : index
    %c0_76 = arith.constant 0 : index
    %c0_77 = arith.constant 0 : index
    %91 = vector.load %arg6[%c0_74, %c2_75, %c0_76, %c0_77] : memref<1x4x16x16xbf16, #tpu.memory_space<vmem>>, vector<1x1x16x16xbf16>
    %92 = vector.shape_cast %91 : vector<1x1x16x16xbf16> to vector<16x16xbf16>
    %93 = vector.shape_cast %90 : vector<16x16xbf16> to vector<1x1x16x16xbf16>
    tpu.vector_store %arg6[%c0_74, %c2_75, %c0_76, %c0_77], %93 {strides = array<i32>} : memref<1x4x16x16xbf16, #tpu.memory_space<vmem>>, vector<1x1x16x16xbf16>,
    %94 = arith.mulf %81, %84 : vector<16x16xf32>
    %95 = arith.mulf %83, %85 : vector<16x16xf32>
    %96 = arith.addf %94, %95 : vector<16x16xf32>
    %97 = arith.addf %75, %96 : vector<16x16xf32>
    %98 = arith.mulf %83, %84 : vector<16x16xf32>
    %99 = arith.mulf %81, %85 : vector<16x16xf32>
    %100 = arith.subf %98, %99 : vector<16x16xf32>
    %101 = arith.addf %79, %100 : vector<16x16xf32>
    %c0_78 = arith.constant 0 : index
    %c3_79 = arith.constant 3 : index
    %c0_80 = arith.constant 0 : index
    %c0_81 = arith.constant 0 : index
    %102 = vector.load %arg3[%c0_78, %c3_79, %c0_80, %c0_81] : memref<1x4x16x16xf32, #tpu.memory_space<vmem>>, vector<1x1x16x16xf32>
    %103 = vector.shape_cast %102 : vector<1x1x16x16xf32> to vector<16x16xf32>
    %c0_82 = arith.constant 0 : index
    %c3_83 = arith.constant 3 : index
    %c0_84 = arith.constant 0 : index
    %c0_85 = arith.constant 0 : index
    %104 = vector.load %arg4[%c0_82, %c3_83, %c0_84, %c0_85] : memref<1x4x16x16xf32, #tpu.memory_space<vmem>>, vector<1x1x16x16xf32>
    %105 = vector.shape_cast %104 : vector<1x1x16x16xf32> to vector<16x16xf32>
    %106 = arith.mulf %103, %33 : vector<16x16xf32>
    %107 = arith.mulf %105, %33 : vector<16x16xf32>
    %108 = arith.truncf %106 : vector<16x16xf32> to vector<16x16xbf16>
    %c0_86 = arith.constant 0 : index
    %c3_87 = arith.constant 3 : index
    %c0_88 = arith.constant 0 : index
    %c0_89 = arith.constant 0 : index
    %109 = vector.load %arg5[%c0_86, %c3_87, %c0_88, %c0_89] : memref<1x4x16x16xbf16, #tpu.memory_space<vmem>>, vector<1x1x16x16xbf16>
    %110 = vector.shape_cast %109 : vector<1x1x16x16xbf16> to vector<16x16xbf16>
    %111 = vector.shape_cast %108 : vector<16x16xbf16> to vector<1x1x16x16xbf16>
    tpu.vector_store %arg5[%c0_86, %c3_87, %c0_88, %c0_89], %111 {strides = array<i32>} : memref<1x4x16x16xbf16, #tpu.memory_space<vmem>>, vector<1x1x16x16xbf16>,
    %112 = arith.truncf %107 : vector<16x16xf32> to vector<16x16xbf16>
    %c0_90 = arith.constant 0 : index
    %c3_91 = arith.constant 3 : index
    %c0_92 = arith.constant 0 : index
    %c0_93 = arith.constant 0 : index
    %113 = vector.load %arg6[%c0_90, %c3_91, %c0_92, %c0_93] : memref<1x4x16x16xbf16, #tpu.memory_space<vmem>>, vector<1x1x16x16xbf16>
    %114 = vector.shape_cast %113 : vector<1x1x16x16xbf16> to vector<16x16xbf16>
    %115 = vector.shape_cast %112 : vector<16x16xbf16> to vector<1x1x16x16xbf16>
    tpu.vector_store %arg6[%c0_90, %c3_91, %c0_92, %c0_93], %115 {strides = array<i32>} : memref<1x4x16x16xbf16, #tpu.memory_space<vmem>>, vector<1x1x16x16xbf16>,
    %116 = arith.mulf %103, %106 : vector<16x16xf32>
    %117 = arith.mulf %105, %107 : vector<16x16xf32>
    %118 = arith.addf %116, %117 : vector<16x16xf32>
    %119 = arith.addf %97, %118 : vector<16x16xf32>
    %120 = arith.mulf %105, %106 : vector<16x16xf32>
    %121 = arith.mulf %103, %107 : vector<16x16xf32>
    %122 = arith.subf %120, %121 : vector<16x16xf32>
    %123 = arith.addf %101, %122 : vector<16x16xf32>
    %c0_94 = arith.constant 0 : index
    %124 = memref.load %arg2[%c0_94] : memref<6xf32, #tpu.memory_space<smem>>
    %125 = vector.broadcast %124 : f32 to vector<16x16xf32>
    %126 = arith.mulf %125, %119 : vector<16x16xf32>
    %c1_95 = arith.constant 1 : index
    %127 = memref.load %arg2[%c1_95] : memref<6xf32, #tpu.memory_space<smem>>
    %128 = vector.broadcast %127 : f32 to vector<16x16xf32>
    %129 = arith.mulf %128, %123 : vector<16x16xf32>
    %130 = arith.addf %126, %129 : vector<16x16xf32>
    %c4 = arith.constant 4 : index
    %131 = memref.load %arg2[%c4] : memref<6xf32, #tpu.memory_space<smem>>
    %132 = vector.broadcast %131 : f32 to vector<16x16xf32>
    %133 = arith.addf %130, %132 : vector<16x16xf32>
    %c2_96 = arith.constant 2 : index
    %134 = memref.load %arg2[%c2_96] : memref<6xf32, #tpu.memory_space<smem>>
    %135 = vector.broadcast %134 : f32 to vector<16x16xf32>
    %136 = arith.mulf %135, %119 : vector<16x16xf32>
    %c3_97 = arith.constant 3 : index
    %137 = memref.load %arg2[%c3_97] : memref<6xf32, #tpu.memory_space<smem>>
    %138 = vector.broadcast %137 : f32 to vector<16x16xf32>
    %139 = arith.mulf %138, %123 : vector<16x16xf32>
    %140 = arith.addf %136, %139 : vector<16x16xf32>
    %c5 = arith.constant 5 : index
    %141 = memref.load %arg2[%c5] : memref<6xf32, #tpu.memory_space<smem>>
    %142 = vector.broadcast %141 : f32 to vector<16x16xf32>
    %143 = arith.addf %140, %142 : vector<16x16xf32>
    %c0_98 = arith.constant 0 : index
    %c0_99 = arith.constant 0 : index
    %c0_100 = arith.constant 0 : index
    %c0_101 = arith.constant 0 : index
    %144 = vector.load %arg5[%c0_98, %c0_99, %c0_100, %c0_101] : memref<1x4x16x16xbf16, #tpu.memory_space<vmem>>, vector<1x1x16x16xbf16>
    %145 = vector.shape_cast %144 : vector<1x1x16x16xbf16> to vector<16x16xbf16>
    %146 = arith.extf %145 : vector<16x16xbf16> to vector<16x16xf32>
    %c0_102 = arith.constant 0 : index
    %c0_103 = arith.constant 0 : index
    %c0_104 = arith.constant 0 : index
    %c0_105 = arith.constant 0 : index
    %147 = vector.load %arg6[%c0_102, %c0_103, %c0_104, %c0_105] : memref<1x4x16x16xbf16, #tpu.memory_space<vmem>>, vector<1x1x16x16xbf16>
    %148 = vector.shape_cast %147 : vector<1x1x16x16xbf16> to vector<16x16xbf16>
    %149 = arith.extf %148 : vector<16x16xbf16> to vector<16x16xf32>
    %150 = arith.mulf %133, %146 : vector<16x16xf32>
    %151 = arith.mulf %143, %149 : vector<16x16xf32>
    %152 = arith.subf %150, %151 : vector<16x16xf32>
    %c0_106 = arith.constant 0 : index
    %c0_107 = arith.constant 0 : index
    %c0_108 = arith.constant 0 : index
    %c0_109 = arith.constant 0 : index
    %153 = vector.load %arg7[%c0_106, %c0_107, %c0_108, %c0_109] : memref<1x4x16x16xf32, #tpu.memory_space<vmem>>, vector<1x1x16x16xf32>
    %154 = vector.shape_cast %153 : vector<1x1x16x16xf32> to vector<16x16xf32>
    %155 = vector.shape_cast %152 : vector<16x16xf32> to vector<1x1x16x16xf32>
    tpu.vector_store %arg7[%c0_106, %c0_107, %c0_108, %c0_109], %155 {strides = array<i32>} : memref<1x4x16x16xf32, #tpu.memory_space<vmem>>, vector<1x1x16x16xf32>,
    %156 = arith.mulf %133, %149 : vector<16x16xf32>
    %157 = arith.mulf %143, %146 : vector<16x16xf32>
    %158 = arith.addf %156, %157 : vector<16x16xf32>
    %c0_110 = arith.constant 0 : index
    %c0_111 = arith.constant 0 : index
    %c0_112 = arith.constant 0 : index
    %c0_113 = arith.constant 0 : index
    %159 = vector.load %arg8[%c0_110, %c0_111, %c0_112, %c0_113] : memref<1x4x16x16xf32, #tpu.memory_space<vmem>>, vector<1x1x16x16xf32>
    %160 = vector.shape_cast %159 : vector<1x1x16x16xf32> to vector<16x16xf32>
    %161 = vector.shape_cast %158 : vector<16x16xf32> to vector<1x1x16x16xf32>
    tpu.vector_store %arg8[%c0_110, %c0_111, %c0_112, %c0_113], %161 {strides = array<i32>} : memref<1x4x16x16xf32, #tpu.memory_space<vmem>>, vector<1x1x16x16xf32>,
    %c0_114 = arith.constant 0 : index
    %c1_115 = arith.constant 1 : index
    %c0_116 = arith.constant 0 : index
    %c0_117 = arith.constant 0 : index
    %162 = vector.load %arg5[%c0_114, %c1_115, %c0_116, %c0_117] : memref<1x4x16x16xbf16, #tpu.memory_space<vmem>>, vector<1x1x16x16xbf16>
    %163 = vector.shape_cast %162 : vector<1x1x16x16xbf16> to vector<16x16xbf16>
    %164 = arith.extf %163 : vector<16x16xbf16> to vector<16x16xf32>
    %c0_118 = arith.constant 0 : index
    %c1_119 = arith.constant 1 : index
    %c0_120 = arith.constant 0 : index
    %c0_121 = arith.constant 0 : index
    %165 = vector.load %arg6[%c0_118, %c1_119, %c0_120, %c0_121] : memref<1x4x16x16xbf16, #tpu.memory_space<vmem>>, vector<1x1x16x16xbf16>
    %166 = vector.shape_cast %165 : vector<1x1x16x16xbf16> to vector<16x16xbf16>
    %167 = arith.extf %166 : vector<16x16xbf16> to vector<16x16xf32>
    %168 = arith.mulf %133, %164 : vector<16x16xf32>
    %169 = arith.mulf %143, %167 : vector<16x16xf32>
    %170 = arith.subf %168, %169 : vector<16x16xf32>
    %c0_122 = arith.constant 0 : index
    %c1_123 = arith.constant 1 : index
    %c0_124 = arith.constant 0 : index
    %c0_125 = arith.constant 0 : index
    %171 = vector.load %arg7[%c0_122, %c1_123, %c0_124, %c0_125] : memref<1x4x16x16xf32, #tpu.memory_space<vmem>>, vector<1x1x16x16xf32>
    %172 = vector.shape_cast %171 : vector<1x1x16x16xf32> to vector<16x16xf32>
    %173 = vector.shape_cast %170 : vector<16x16xf32> to vector<1x1x16x16xf32>
    tpu.vector_store %arg7[%c0_122, %c1_123, %c0_124, %c0_125], %173 {strides = array<i32>} : memref<1x4x16x16xf32, #tpu.memory_space<vmem>>, vector<1x1x16x16xf32>,
    %174 = arith.mulf %133, %167 : vector<16x16xf32>
    %175 = arith.mulf %143, %164 : vector<16x16xf32>
    %176 = arith.addf %174, %175 : vector<16x16xf32>
    %c0_126 = arith.constant 0 : index
    %c1_127 = arith.constant 1 : index
    %c0_128 = arith.constant 0 : index
    %c0_129 = arith.constant 0 : index
    %177 = vector.load %arg8[%c0_126, %c1_127, %c0_128, %c0_129] : memref<1x4x16x16xf32, #tpu.memory_space<vmem>>, vector<1x1x16x16xf32>
    %178 = vector.shape_cast %177 : vector<1x1x16x16xf32> to vector<16x16xf32>
    %179 = vector.shape_cast %176 : vector<16x16xf32> to vector<1x1x16x16xf32>
    tpu.vector_store %arg8[%c0_126, %c1_127, %c0_128, %c0_129], %179 {strides = array<i32>} : memref<1x4x16x16xf32, #tpu.memory_space<vmem>>, vector<1x1x16x16xf32>,
    %c0_130 = arith.constant 0 : index
    %c2_131 = arith.constant 2 : index
    %c0_132 = arith.constant 0 : index
    %c0_133 = arith.constant 0 : index
    %180 = vector.load %arg5[%c0_130, %c2_131, %c0_132, %c0_133] : memref<1x4x16x16xbf16, #tpu.memory_space<vmem>>, vector<1x1x16x16xbf16>
    %181 = vector.shape_cast %180 : vector<1x1x16x16xbf16> to vector<16x16xbf16>
    %182 = arith.extf %181 : vector<16x16xbf16> to vector<16x16xf32>
    %c0_134 = arith.constant 0 : index
    %c2_135 = arith.constant 2 : index
    %c0_136 = arith.constant 0 : index
    %c0_137 = arith.constant 0 : index
    %183 = vector.load %arg6[%c0_134, %c2_135, %c0_136, %c0_137] : memref<1x4x16x16xbf16, #tpu.memory_space<vmem>>, vector<1x1x16x16xbf16>
    %184 = vector.shape_cast %183 : vector<1x1x16x16xbf16> to vector<16x16xbf16>
    %185 = arith.extf %184 : vector<16x16xbf16> to vector<16x16xf32>
    %186 = arith.mulf %133, %182 : vector<16x16xf32>
    %187 = arith.mulf %143, %185 : vector<16x16xf32>
    %188 = arith.subf %186, %187 : vector<16x16xf32>
    %c0_138 = arith.constant 0 : index
    %c2_139 = arith.constant 2 : index
    %c0_140 = arith.constant 0 : index
    %c0_141 = arith.constant 0 : index
    %189 = vector.load %arg7[%c0_138, %c2_139, %c0_140, %c0_141] : memref<1x4x16x16xf32, #tpu.memory_space<vmem>>, vector<1x1x16x16xf32>
    %190 = vector.shape_cast %189 : vector<1x1x16x16xf32> to vector<16x16xf32>
    %191 = vector.shape_cast %188 : vector<16x16xf32> to vector<1x1x16x16xf32>
    tpu.vector_store %arg7[%c0_138, %c2_139, %c0_140, %c0_141], %191 {strides = array<i32>} : memref<1x4x16x16xf32, #tpu.memory_space<vmem>>, vector<1x1x16x16xf32>,
    %192 = arith.mulf %133, %185 : vector<16x16xf32>
    %193 = arith.mulf %143, %182 : vector<16x16xf32>
    %194 = arith.addf %192, %193 : vector<16x16xf32>
    %c0_142 = arith.constant 0 : index
    %c2_143 = arith.constant 2 : index
    %c0_144 = arith.constant 0 : index
    %c0_145 = arith.constant 0 : index
    %195 = vector.load %arg8[%c0_142, %c2_143, %c0_144, %c0_145] : memref<1x4x16x16xf32, #tpu.memory_space<vmem>>, vector<1x1x16x16xf32>
    %196 = vector.shape_cast %195 : vector<1x1x16x16xf32> to vector<16x16xf32>
    %197 = vector.shape_cast %194 : vector<16x16xf32> to vector<1x1x16x16xf32>
    tpu.vector_store %arg8[%c0_142, %c2_143, %c0_144, %c0_145], %197 {strides = array<i32>} : memref<1x4x16x16xf32, #tpu.memory_space<vmem>>, vector<1x1x16x16xf32>,
    %c0_146 = arith.constant 0 : index
    %c3_147 = arith.constant 3 : index
    %c0_148 = arith.constant 0 : index
    %c0_149 = arith.constant 0 : index
    %198 = vector.load %arg5[%c0_146, %c3_147, %c0_148, %c0_149] : memref<1x4x16x16xbf16, #tpu.memory_space<vmem>>, vector<1x1x16x16xbf16>
    %199 = vector.shape_cast %198 : vector<1x1x16x16xbf16> to vector<16x16xbf16>
    %200 = arith.extf %199 : vector<16x16xbf16> to vector<16x16xf32>
    %c0_150 = arith.constant 0 : index
    %c3_151 = arith.constant 3 : index
    %c0_152 = arith.constant 0 : index
    %c0_153 = arith.constant 0 : index
    %201 = vector.load %arg6[%c0_150, %c3_151, %c0_152, %c0_153] : memref<1x4x16x16xbf16, #tpu.memory_space<vmem>>, vector<1x1x16x16xbf16>
    %202 = vector.shape_cast %201 : vector<1x1x16x16xbf16> to vector<16x16xbf16>
    %203 = arith.extf %202 : vector<16x16xbf16> to vector<16x16xf32>
    %204 = arith.mulf %133, %200 : vector<16x16xf32>
    %205 = arith.mulf %143, %203 : vector<16x16xf32>
    %206 = arith.subf %204, %205 : vector<16x16xf32>
    %c0_154 = arith.constant 0 : index
    %c3_155 = arith.constant 3 : index
    %c0_156 = arith.constant 0 : index
    %c0_157 = arith.constant 0 : index
    %207 = vector.load %arg7[%c0_154, %c3_155, %c0_156, %c0_157] : memref<1x4x16x16xf32, #tpu.memory_space<vmem>>, vector<1x1x16x16xf32>
    %208 = vector.shape_cast %207 : vector<1x1x16x16xf32> to vector<16x16xf32>
    %209 = vector.shape_cast %206 : vector<16x16xf32> to vector<1x1x16x16xf32>
    tpu.vector_store %arg7[%c0_154, %c3_155, %c0_156, %c0_157], %209 {strides = array<i32>} : memref<1x4x16x16xf32, #tpu.memory_space<vmem>>, vector<1x1x16x16xf32>,
    %210 = arith.mulf %133, %203 : vector<16x16xf32>
    %211 = arith.mulf %143, %200 : vector<16x16xf32>
    %212 = arith.addf %210, %211 : vector<16x16xf32>
    %c0_158 = arith.constant 0 : index
    %c3_159 = arith.constant 3 : index
    %c0_160 = arith.constant 0 : index
    %c0_161 = arith.constant 0 : index
    %213 = vector.load %arg8[%c0_158, %c3_159, %c0_160, %c0_161] : memref<1x4x16x16xf32, #tpu.memory_space<vmem>>, vector<1x1x16x16xf32>
    %214 = vector.shape_cast %213 : vector<1x1x16x16xf32> to vector<16x16xf32>
    %215 = vector.shape_cast %212 : vector<16x16xf32> to vector<1x1x16x16xf32>
    tpu.vector_store %arg8[%c0_158, %c3_159, %c0_160, %c0_161], %215 {strides = array<i32>} : memref<1x4x16x16xf32, #tpu.memory_space<vmem>>, vector<1x1x16x16xf32>,
    return
  }
  func.func @transform_0(%arg0: i32, %arg1: i32) -> i32 {
    %c0_i32 = arith.constant 0 : i32
    %c0_i32_0 = arith.constant 0 : i32
    return %c0_i32 : i32
  }
  func.func @transform_1(%arg0: i32, %arg1: i32) -> (i32, i32, i32, i32) {
    %c0_i32 = arith.constant 0 : i32
    %0 = arith.addi %arg1, %c0_i32 : i32
    %c0_i32_0 = arith.constant 0 : i32
    %c0_i32_1 = arith.constant 0 : i32
    %c0_i32_2 = arith.constant 0 : i32
    return %arg0, %c0_i32_0, %0, %c0_i32_1 : i32, i32, i32, i32
  }
  func.func @transform_2(%arg0: i32, %arg1: i32) -> (i32, i32, i32, i32) {
    %c0_i32 = arith.constant 0 : i32
    %0 = arith.addi %arg1, %c0_i32 : i32
    %c0_i32_0 = arith.constant 0 : i32
    %c0_i32_1 = arith.constant 0 : i32
    %c0_i32_2 = arith.constant 0 : i32
    return %arg0, %c0_i32_0, %0, %c0_i32_1 : i32, i32, i32, i32
  }
  func.func @transform_3(%arg0: i32, %arg1: i32) -> (i32, i32, i32, i32) {
    %c0_i32 = arith.constant 0 : i32
    %0 = arith.addi %arg1, %c0_i32 : i32
    %c0_i32_0 = arith.constant 0 : i32
    %c0_i32_1 = arith.constant 0 : i32
    %c0_i32_2 = arith.constant 0 : i32
    return %arg0, %c0_i32_0, %0, %c0_i32_1 : i32, i32, i32, i32
  }
  func.func @transform_4(%arg0: i32, %arg1: i32) -> (i32, i32, i32, i32) {
    %c0_i32 = arith.constant 0 : i32
    %0 = arith.addi %arg1, %c0_i32 : i32
    %c0_i32_0 = arith.constant 0 : i32
    %c0_i32_1 = arith.constant 0 : i32
    %c0_i32_2 = arith.constant 0 : i32
    return %arg0, %c0_i32_0, %0, %c0_i32_1 : i32, i32, i32, i32
  }
  func.func @transform_5(%arg0: i32, %arg1: i32) -> (i32, i32, i32, i32) {
    %c0_i32 = arith.constant 0 : i32
    %0 = arith.addi %arg1, %c0_i32 : i32
    %c0_i32_0 = arith.constant 0 : i32
    %c0_i32_1 = arith.constant 0 : i32
    %c0_i32_2 = arith.constant 0 : i32
    return %arg0, %c0_i32_0, %0, %c0_i32_1 : i32, i32, i32, i32
  }
  func.func @transform_6(%arg0: i32, %arg1: i32) -> (i32, i32, i32, i32) {
    %c0_i32 = arith.constant 0 : i32
    %0 = arith.addi %arg1, %c0_i32 : i32
    %c0_i32_0 = arith.constant 0 : i32
    %c0_i32_1 = arith.constant 0 : i32
    %c0_i32_2 = arith.constant 0 : i32
    return %arg0, %c0_i32_0, %0, %c0_i32_1 : i32, i32, i32, i32
  }
}

module attributes {stable_mosaic.version = 11 : i64} {
  func.func @_dc_first_kernel(%arg0: i32, %arg1: i32, %arg2: memref<1x4x16x16xf32, #tpu.memory_space<vmem>>, %arg3: memref<1x4x16x16xf32, #tpu.memory_space<vmem>>, %arg4: memref<1x4x16x16xf32, #tpu.memory_space<vmem>>, %arg5: memref<1x4x16x16xf32, #tpu.memory_space<vmem>>, %arg6: memref<1x4x16x16xf32, #tpu.memory_space<vmem>>, %arg7: memref<1x4x16x16xf32, #tpu.memory_space<vmem>>) attributes {dimension_semantics = [#tpu.dimension_semantics<parallel>, #tpu.dimension_semantics<parallel>], iteration_bounds = array<i64: 2, 1>, scalar_prefetch = 0 : i64, scratch_operands = 0 : i64, tpu.core_type = #tpu.core_type<tc>, window_params = [{transform_indices = @transform_0, window_bounds = array<i64: 1, 4, 16, 16>}, {transform_indices = @transform_1, window_bounds = array<i64: 1, 4, 16, 16>}, {transform_indices = @transform_2, window_bounds = array<i64: 1, 4, 16, 16>}, {transform_indices = @transform_3, window_bounds = array<i64: 1, 4, 16, 16>}, {transform_indices = @transform_4, window_bounds = array<i64: 1, 4, 16, 16>}, {transform_indices = @transform_5, window_bounds = array<i64: 1, 4, 16, 16>}]} {
    %c0 = arith.constant 0 : index
    %c0_0 = arith.constant 0 : index
    %c0_1 = arith.constant 0 : index
    %c0_2 = arith.constant 0 : index
    %0 = vector.load %arg2[%c0, %c0_0, %c0_1, %c0_2] : memref<1x4x16x16xf32, #tpu.memory_space<vmem>>, vector<1x4x16x16xf32>
    %c0_3 = arith.constant 0 : index
    %c0_4 = arith.constant 0 : index
    %c0_5 = arith.constant 0 : index
    %c0_6 = arith.constant 0 : index
    %1 = vector.load %arg4[%c0_3, %c0_4, %c0_5, %c0_6] : memref<1x4x16x16xf32, #tpu.memory_space<vmem>>, vector<1x4x16x16xf32>
    %2 = arith.subf %0, %1 : vector<1x4x16x16xf32>
    %c0_7 = arith.constant 0 : index
    %c0_8 = arith.constant 0 : index
    %c0_9 = arith.constant 0 : index
    %c0_10 = arith.constant 0 : index
    %3 = vector.load %arg6[%c0_7, %c0_8, %c0_9, %c0_10] : memref<1x4x16x16xf32, #tpu.memory_space<vmem>>, vector<1x4x16x16xf32>
    tpu.vector_store %arg6[%c0_7, %c0_8, %c0_9, %c0_10], %2 {strides = array<i32>} : memref<1x4x16x16xf32, #tpu.memory_space<vmem>>, vector<1x4x16x16xf32>,
    %c0_11 = arith.constant 0 : index
    %c0_12 = arith.constant 0 : index
    %c0_13 = arith.constant 0 : index
    %c0_14 = arith.constant 0 : index
    %4 = vector.load %arg3[%c0_11, %c0_12, %c0_13, %c0_14] : memref<1x4x16x16xf32, #tpu.memory_space<vmem>>, vector<1x4x16x16xf32>
    %c0_15 = arith.constant 0 : index
    %c0_16 = arith.constant 0 : index
    %c0_17 = arith.constant 0 : index
    %c0_18 = arith.constant 0 : index
    %5 = vector.load %arg5[%c0_15, %c0_16, %c0_17, %c0_18] : memref<1x4x16x16xf32, #tpu.memory_space<vmem>>, vector<1x4x16x16xf32>
    %6 = arith.subf %4, %5 : vector<1x4x16x16xf32>
    %c0_19 = arith.constant 0 : index
    %c0_20 = arith.constant 0 : index
    %c0_21 = arith.constant 0 : index
    %c0_22 = arith.constant 0 : index
    %7 = vector.load %arg7[%c0_19, %c0_20, %c0_21, %c0_22] : memref<1x4x16x16xf32, #tpu.memory_space<vmem>>, vector<1x4x16x16xf32>
    tpu.vector_store %arg7[%c0_19, %c0_20, %c0_21, %c0_22], %6 {strides = array<i32>} : memref<1x4x16x16xf32, #tpu.memory_space<vmem>>, vector<1x4x16x16xf32>,
    return
  }
  func.func @transform_0(%arg0: i32, %arg1: i32) -> (i32, i32, i32, i32) {
    %c0_i32 = arith.constant 0 : i32
    %0 = arith.addi %arg1, %c0_i32 : i32
    %c0_i32_0 = arith.constant 0 : i32
    %c0_i32_1 = arith.constant 0 : i32
    %c0_i32_2 = arith.constant 0 : i32
    return %arg0, %c0_i32_0, %0, %c0_i32_1 : i32, i32, i32, i32
  }
  func.func @transform_1(%arg0: i32, %arg1: i32) -> (i32, i32, i32, i32) {
    %c0_i32 = arith.constant 0 : i32
    %0 = arith.addi %arg1, %c0_i32 : i32
    %c0_i32_0 = arith.constant 0 : i32
    %c0_i32_1 = arith.constant 0 : i32
    %c0_i32_2 = arith.constant 0 : i32
    return %arg0, %c0_i32_0, %0, %c0_i32_1 : i32, i32, i32, i32
  }
  func.func @transform_2(%arg0: i32, %arg1: i32) -> (i32, i32, i32, i32) {
    %c0_i32 = arith.constant 0 : i32
    %0 = arith.addi %arg1, %c0_i32 : i32
    %c0_i32_0 = arith.constant 0 : i32
    %c0_i32_1 = arith.constant 0 : i32
    %c0_i32_2 = arith.constant 0 : i32
    return %arg0, %c0_i32_0, %0, %c0_i32_1 : i32, i32, i32, i32
  }
  func.func @transform_3(%arg0: i32, %arg1: i32) -> (i32, i32, i32, i32) {
    %c0_i32 = arith.constant 0 : i32
    %0 = arith.addi %arg1, %c0_i32 : i32
    %c0_i32_0 = arith.constant 0 : i32
    %c0_i32_1 = arith.constant 0 : i32
    %c0_i32_2 = arith.constant 0 : i32
    return %arg0, %c0_i32_0, %0, %c0_i32_1 : i32, i32, i32, i32
  }
  func.func @transform_4(%arg0: i32, %arg1: i32) -> (i32, i32, i32, i32) {
    %c0_i32 = arith.constant 0 : i32
    %0 = arith.addi %arg1, %c0_i32 : i32
    %c0_i32_0 = arith.constant 0 : i32
    %c0_i32_1 = arith.constant 0 : i32
    %c0_i32_2 = arith.constant 0 : i32
    return %arg0, %c0_i32_0, %0, %c0_i32_1 : i32, i32, i32, i32
  }
  func.func @transform_5(%arg0: i32, %arg1: i32) -> (i32, i32, i32, i32) {
    %c0_i32 = arith.constant 0 : i32
    %0 = arith.addi %arg1, %c0_i32 : i32
    %c0_i32_0 = arith.constant 0 : i32
    %c0_i32_1 = arith.constant 0 : i32
    %c0_i32_2 = arith.constant 0 : i32
    return %arg0, %c0_i32_0, %0, %c0_i32_1 : i32, i32, i32, i32
  }
}

module attributes {stable_mosaic.version = 11 : i64} {
  func.func @_reduce_reg_expand_kernel(%arg0: i32, %arg1: i32, %arg2: memref<6xf32, #tpu.memory_space<smem>>, %arg3: memref<1x4x16x16xf32, #tpu.memory_space<vmem>>, %arg4: memref<1x4x16x16xf32, #tpu.memory_space<vmem>>, %arg5: memref<1x4x16x16xbf16, #tpu.memory_space<vmem>>, %arg6: memref<1x4x16x16xbf16, #tpu.memory_space<vmem>>, %arg7: memref<1x4x16x16xf32, #tpu.memory_space<vmem>>, %arg8: memref<1x4x16x16xf32, #tpu.memory_space<vmem>>) attributes {dimension_semantics = [#tpu.dimension_semantics<parallel>, #tpu.dimension_semantics<parallel>], iteration_bounds = array<i64: 2, 1>, scalar_prefetch = 0 : i64, scratch_operands = 0 : i64, tpu.core_type = #tpu.core_type<tc>, window_params = [{transform_indices = @transform_0, window_bounds = array<i64: 6>}, {transform_indices = @transform_1, window_bounds = array<i64: 1, 4, 16, 16>}, {transform_indices = @transform_2, window_bounds = array<i64: 1, 4, 16, 16>}, {transform_indices = @transform_3, window_bounds = array<i64: 1, 4, 16, 16>}, {transform_indices = @transform_4, window_bounds = array<i64: 1, 4, 16, 16>}, {transform_indices = @transform_5, window_bounds = array<i64: 1, 4, 16, 16>}, {transform_indices = @transform_6, window_bounds = array<i64: 1, 4, 16, 16>}]} {
    %c0 = arith.constant 0 : index
    %c0_0 = arith.constant 0 : index
    %c0_1 = arith.constant 0 : index
    %c0_2 = arith.constant 0 : index
    %0 = vector.load %arg3[%c0, %c0_0, %c0_1, %c0_2] : memref<1x4x16x16xf32, #tpu.memory_space<vmem>>, vector<1x1x16x16xf32>
    %1 = vector.shape_cast %0 : vector<1x1x16x16xf32> to vector<16x16xf32>
    %c0_3 = arith.constant 0 : index
    %c0_4 = arith.constant 0 : index
    %c0_5 = arith.constant 0 : index
    %c0_6 = arith.constant 0 : index
    %2 = vector.load %arg4[%c0_3, %c0_4, %c0_5, %c0_6] : memref<1x4x16x16xf32, #tpu.memory_space<vmem>>, vector<1x1x16x16xf32>
    %3 = vector.shape_cast %2 : vector<1x1x16x16xf32> to vector<16x16xf32>
    %c0_7 = arith.constant 0 : index
    %c0_8 = arith.constant 0 : index
    %c0_9 = arith.constant 0 : index
    %c0_10 = arith.constant 0 : index
    %4 = vector.load %arg5[%c0_7, %c0_8, %c0_9, %c0_10] : memref<1x4x16x16xbf16, #tpu.memory_space<vmem>>, vector<1x1x16x16xbf16>
    %5 = vector.shape_cast %4 : vector<1x1x16x16xbf16> to vector<16x16xbf16>
    %6 = arith.extf %5 : vector<16x16xbf16> to vector<16x16xf32>
    %c0_11 = arith.constant 0 : index
    %c0_12 = arith.constant 0 : index
    %c0_13 = arith.constant 0 : index
    %c0_14 = arith.constant 0 : index
    %7 = vector.load %arg6[%c0_11, %c0_12, %c0_13, %c0_14] : memref<1x4x16x16xbf16, #tpu.memory_space<vmem>>, vector<1x1x16x16xbf16>
    %8 = vector.shape_cast %7 : vector<1x1x16x16xbf16> to vector<16x16xbf16>
    %9 = arith.extf %8 : vector<16x16xbf16> to vector<16x16xf32>
    %10 = arith.mulf %1, %6 : vector<16x16xf32>
    %11 = arith.mulf %3, %9 : vector<16x16xf32>
    %12 = arith.addf %10, %11 : vector<16x16xf32>
    %13 = arith.mulf %3, %6 : vector<16x16xf32>
    %14 = arith.mulf %1, %9 : vector<16x16xf32>
    %15 = arith.subf %13, %14 : vector<16x16xf32>
    %c0_15 = arith.constant 0 : index
    %c1 = arith.constant 1 : index
    %c0_16 = arith.constant 0 : index
    %c0_17 = arith.constant 0 : index
    %16 = vector.load %arg3[%c0_15, %c1, %c0_16, %c0_17] : memref<1x4x16x16xf32, #tpu.memory_space<vmem>>, vector<1x1x16x16xf32>
    %17 = vector.shape_cast %16 : vector<1x1x16x16xf32> to vector<16x16xf32>
    %c0_18 = arith.constant 0 : index
    %c1_19 = arith.constant 1 : index
    %c0_20 = arith.constant 0 : index
    %c0_21 = arith.constant 0 : index
    %18 = vector.load %arg4[%c0_18, %c1_19, %c0_20, %c0_21] : memref<1x4x16x16xf32, #tpu.memory_space<vmem>>, vector<1x1x16x16xf32>
    %19 = vector.shape_cast %18 : vector<1x1x16x16xf32> to vector<16x16xf32>
    %c0_22 = arith.constant 0 : index
    %c1_23 = arith.constant 1 : index
    %c0_24 = arith.constant 0 : index
    %c0_25 = arith.constant 0 : index
    %20 = vector.load %arg5[%c0_22, %c1_23, %c0_24, %c0_25] : memref<1x4x16x16xbf16, #tpu.memory_space<vmem>>, vector<1x1x16x16xbf16>
    %21 = vector.shape_cast %20 : vector<1x1x16x16xbf16> to vector<16x16xbf16>
    %22 = arith.extf %21 : vector<16x16xbf16> to vector<16x16xf32>
    %c0_26 = arith.constant 0 : index
    %c1_27 = arith.constant 1 : index
    %c0_28 = arith.constant 0 : index
    %c0_29 = arith.constant 0 : index
    %23 = vector.load %arg6[%c0_26, %c1_27, %c0_28, %c0_29] : memref<1x4x16x16xbf16, #tpu.memory_space<vmem>>, vector<1x1x16x16xbf16>
    %24 = vector.shape_cast %23 : vector<1x1x16x16xbf16> to vector<16x16xbf16>
    %25 = arith.extf %24 : vector<16x16xbf16> to vector<16x16xf32>
    %26 = arith.mulf %17, %22 : vector<16x16xf32>
    %27 = arith.mulf %19, %25 : vector<16x16xf32>
    %28 = arith.addf %26, %27 : vector<16x16xf32>
    %29 = arith.mulf %19, %22 : vector<16x16xf32>
    %30 = arith.mulf %17, %25 : vector<16x16xf32>
    %31 = arith.subf %29, %30 : vector<16x16xf32>
    %32 = arith.addf %12, %28 : vector<16x16xf32>
    %33 = arith.addf %15, %31 : vector<16x16xf32>
    %c0_30 = arith.constant 0 : index
    %c2 = arith.constant 2 : index
    %c0_31 = arith.constant 0 : index
    %c0_32 = arith.constant 0 : index
    %34 = vector.load %arg3[%c0_30, %c2, %c0_31, %c0_32] : memref<1x4x16x16xf32, #tpu.memory_space<vmem>>, vector<1x1x16x16xf32>
    %35 = vector.shape_cast %34 : vector<1x1x16x16xf32> to vector<16x16xf32>
    %c0_33 = arith.constant 0 : index
    %c2_34 = arith.constant 2 : index
    %c0_35 = arith.constant 0 : index
    %c0_36 = arith.constant 0 : index
    %36 = vector.load %arg4[%c0_33, %c2_34, %c0_35, %c0_36] : memref<1x4x16x16xf32, #tpu.memory_space<vmem>>, vector<1x1x16x16xf32>
    %37 = vector.shape_cast %36 : vector<1x1x16x16xf32> to vector<16x16xf32>
    %c0_37 = arith.constant 0 : index
    %c2_38 = arith.constant 2 : index
    %c0_39 = arith.constant 0 : index
    %c0_40 = arith.constant 0 : index
    %38 = vector.load %arg5[%c0_37, %c2_38, %c0_39, %c0_40] : memref<1x4x16x16xbf16, #tpu.memory_space<vmem>>, vector<1x1x16x16xbf16>
    %39 = vector.shape_cast %38 : vector<1x1x16x16xbf16> to vector<16x16xbf16>
    %40 = arith.extf %39 : vector<16x16xbf16> to vector<16x16xf32>
    %c0_41 = arith.constant 0 : index
    %c2_42 = arith.constant 2 : index
    %c0_43 = arith.constant 0 : index
    %c0_44 = arith.constant 0 : index
    %41 = vector.load %arg6[%c0_41, %c2_42, %c0_43, %c0_44] : memref<1x4x16x16xbf16, #tpu.memory_space<vmem>>, vector<1x1x16x16xbf16>
    %42 = vector.shape_cast %41 : vector<1x1x16x16xbf16> to vector<16x16xbf16>
    %43 = arith.extf %42 : vector<16x16xbf16> to vector<16x16xf32>
    %44 = arith.mulf %35, %40 : vector<16x16xf32>
    %45 = arith.mulf %37, %43 : vector<16x16xf32>
    %46 = arith.addf %44, %45 : vector<16x16xf32>
    %47 = arith.mulf %37, %40 : vector<16x16xf32>
    %48 = arith.mulf %35, %43 : vector<16x16xf32>
    %49 = arith.subf %47, %48 : vector<16x16xf32>
    %50 = arith.addf %32, %46 : vector<16x16xf32>
    %51 = arith.addf %33, %49 : vector<16x16xf32>
    %c0_45 = arith.constant 0 : index
    %c3 = arith.constant 3 : index
    %c0_46 = arith.constant 0 : index
    %c0_47 = arith.constant 0 : index
    %52 = vector.load %arg3[%c0_45, %c3, %c0_46, %c0_47] : memref<1x4x16x16xf32, #tpu.memory_space<vmem>>, vector<1x1x16x16xf32>
    %53 = vector.shape_cast %52 : vector<1x1x16x16xf32> to vector<16x16xf32>
    %c0_48 = arith.constant 0 : index
    %c3_49 = arith.constant 3 : index
    %c0_50 = arith.constant 0 : index
    %c0_51 = arith.constant 0 : index
    %54 = vector.load %arg4[%c0_48, %c3_49, %c0_50, %c0_51] : memref<1x4x16x16xf32, #tpu.memory_space<vmem>>, vector<1x1x16x16xf32>
    %55 = vector.shape_cast %54 : vector<1x1x16x16xf32> to vector<16x16xf32>
    %c0_52 = arith.constant 0 : index
    %c3_53 = arith.constant 3 : index
    %c0_54 = arith.constant 0 : index
    %c0_55 = arith.constant 0 : index
    %56 = vector.load %arg5[%c0_52, %c3_53, %c0_54, %c0_55] : memref<1x4x16x16xbf16, #tpu.memory_space<vmem>>, vector<1x1x16x16xbf16>
    %57 = vector.shape_cast %56 : vector<1x1x16x16xbf16> to vector<16x16xbf16>
    %58 = arith.extf %57 : vector<16x16xbf16> to vector<16x16xf32>
    %c0_56 = arith.constant 0 : index
    %c3_57 = arith.constant 3 : index
    %c0_58 = arith.constant 0 : index
    %c0_59 = arith.constant 0 : index
    %59 = vector.load %arg6[%c0_56, %c3_57, %c0_58, %c0_59] : memref<1x4x16x16xbf16, #tpu.memory_space<vmem>>, vector<1x1x16x16xbf16>
    %60 = vector.shape_cast %59 : vector<1x1x16x16xbf16> to vector<16x16xbf16>
    %61 = arith.extf %60 : vector<16x16xbf16> to vector<16x16xf32>
    %62 = arith.mulf %53, %58 : vector<16x16xf32>
    %63 = arith.mulf %55, %61 : vector<16x16xf32>
    %64 = arith.addf %62, %63 : vector<16x16xf32>
    %65 = arith.mulf %55, %58 : vector<16x16xf32>
    %66 = arith.mulf %53, %61 : vector<16x16xf32>
    %67 = arith.subf %65, %66 : vector<16x16xf32>
    %68 = arith.addf %50, %64 : vector<16x16xf32>
    %69 = arith.addf %51, %67 : vector<16x16xf32>
    %c0_60 = arith.constant 0 : index
    %70 = memref.load %arg2[%c0_60] : memref<6xf32, #tpu.memory_space<smem>>
    %71 = vector.broadcast %70 : f32 to vector<16x16xf32>
    %72 = arith.mulf %71, %68 : vector<16x16xf32>
    %c1_61 = arith.constant 1 : index
    %73 = memref.load %arg2[%c1_61] : memref<6xf32, #tpu.memory_space<smem>>
    %74 = vector.broadcast %73 : f32 to vector<16x16xf32>
    %75 = arith.mulf %74, %69 : vector<16x16xf32>
    %76 = arith.addf %72, %75 : vector<16x16xf32>
    %c4 = arith.constant 4 : index
    %77 = memref.load %arg2[%c4] : memref<6xf32, #tpu.memory_space<smem>>
    %78 = vector.broadcast %77 : f32 to vector<16x16xf32>
    %79 = arith.addf %76, %78 : vector<16x16xf32>
    %c2_62 = arith.constant 2 : index
    %80 = memref.load %arg2[%c2_62] : memref<6xf32, #tpu.memory_space<smem>>
    %81 = vector.broadcast %80 : f32 to vector<16x16xf32>
    %82 = arith.mulf %81, %68 : vector<16x16xf32>
    %c3_63 = arith.constant 3 : index
    %83 = memref.load %arg2[%c3_63] : memref<6xf32, #tpu.memory_space<smem>>
    %84 = vector.broadcast %83 : f32 to vector<16x16xf32>
    %85 = arith.mulf %84, %69 : vector<16x16xf32>
    %86 = arith.addf %82, %85 : vector<16x16xf32>
    %c5 = arith.constant 5 : index
    %87 = memref.load %arg2[%c5] : memref<6xf32, #tpu.memory_space<smem>>
    %88 = vector.broadcast %87 : f32 to vector<16x16xf32>
    %89 = arith.addf %86, %88 : vector<16x16xf32>
    %c0_64 = arith.constant 0 : index
    %c0_65 = arith.constant 0 : index
    %c0_66 = arith.constant 0 : index
    %c0_67 = arith.constant 0 : index
    %90 = vector.load %arg5[%c0_64, %c0_65, %c0_66, %c0_67] : memref<1x4x16x16xbf16, #tpu.memory_space<vmem>>, vector<1x1x16x16xbf16>
    %91 = vector.shape_cast %90 : vector<1x1x16x16xbf16> to vector<16x16xbf16>
    %92 = arith.extf %91 : vector<16x16xbf16> to vector<16x16xf32>
    %c0_68 = arith.constant 0 : index
    %c0_69 = arith.constant 0 : index
    %c0_70 = arith.constant 0 : index
    %c0_71 = arith.constant 0 : index
    %93 = vector.load %arg6[%c0_68, %c0_69, %c0_70, %c0_71] : memref<1x4x16x16xbf16, #tpu.memory_space<vmem>>, vector<1x1x16x16xbf16>
    %94 = vector.shape_cast %93 : vector<1x1x16x16xbf16> to vector<16x16xbf16>
    %95 = arith.extf %94 : vector<16x16xbf16> to vector<16x16xf32>
    %96 = arith.mulf %79, %92 : vector<16x16xf32>
    %97 = arith.mulf %89, %95 : vector<16x16xf32>
    %98 = arith.subf %96, %97 : vector<16x16xf32>
    %c0_72 = arith.constant 0 : index
    %c0_73 = arith.constant 0 : index
    %c0_74 = arith.constant 0 : index
    %c0_75 = arith.constant 0 : index
    %99 = vector.load %arg7[%c0_72, %c0_73, %c0_74, %c0_75] : memref<1x4x16x16xf32, #tpu.memory_space<vmem>>, vector<1x1x16x16xf32>
    %100 = vector.shape_cast %99 : vector<1x1x16x16xf32> to vector<16x16xf32>
    %101 = vector.shape_cast %98 : vector<16x16xf32> to vector<1x1x16x16xf32>
    tpu.vector_store %arg7[%c0_72, %c0_73, %c0_74, %c0_75], %101 {strides = array<i32>} : memref<1x4x16x16xf32, #tpu.memory_space<vmem>>, vector<1x1x16x16xf32>,
    %102 = arith.mulf %79, %95 : vector<16x16xf32>
    %103 = arith.mulf %89, %92 : vector<16x16xf32>
    %104 = arith.addf %102, %103 : vector<16x16xf32>
    %c0_76 = arith.constant 0 : index
    %c0_77 = arith.constant 0 : index
    %c0_78 = arith.constant 0 : index
    %c0_79 = arith.constant 0 : index
    %105 = vector.load %arg8[%c0_76, %c0_77, %c0_78, %c0_79] : memref<1x4x16x16xf32, #tpu.memory_space<vmem>>, vector<1x1x16x16xf32>
    %106 = vector.shape_cast %105 : vector<1x1x16x16xf32> to vector<16x16xf32>
    %107 = vector.shape_cast %104 : vector<16x16xf32> to vector<1x1x16x16xf32>
    tpu.vector_store %arg8[%c0_76, %c0_77, %c0_78, %c0_79], %107 {strides = array<i32>} : memref<1x4x16x16xf32, #tpu.memory_space<vmem>>, vector<1x1x16x16xf32>,
    %c0_80 = arith.constant 0 : index
    %c1_81 = arith.constant 1 : index
    %c0_82 = arith.constant 0 : index
    %c0_83 = arith.constant 0 : index
    %108 = vector.load %arg5[%c0_80, %c1_81, %c0_82, %c0_83] : memref<1x4x16x16xbf16, #tpu.memory_space<vmem>>, vector<1x1x16x16xbf16>
    %109 = vector.shape_cast %108 : vector<1x1x16x16xbf16> to vector<16x16xbf16>
    %110 = arith.extf %109 : vector<16x16xbf16> to vector<16x16xf32>
    %c0_84 = arith.constant 0 : index
    %c1_85 = arith.constant 1 : index
    %c0_86 = arith.constant 0 : index
    %c0_87 = arith.constant 0 : index
    %111 = vector.load %arg6[%c0_84, %c1_85, %c0_86, %c0_87] : memref<1x4x16x16xbf16, #tpu.memory_space<vmem>>, vector<1x1x16x16xbf16>
    %112 = vector.shape_cast %111 : vector<1x1x16x16xbf16> to vector<16x16xbf16>
    %113 = arith.extf %112 : vector<16x16xbf16> to vector<16x16xf32>
    %114 = arith.mulf %79, %110 : vector<16x16xf32>
    %115 = arith.mulf %89, %113 : vector<16x16xf32>
    %116 = arith.subf %114, %115 : vector<16x16xf32>
    %c0_88 = arith.constant 0 : index
    %c1_89 = arith.constant 1 : index
    %c0_90 = arith.constant 0 : index
    %c0_91 = arith.constant 0 : index
    %117 = vector.load %arg7[%c0_88, %c1_89, %c0_90, %c0_91] : memref<1x4x16x16xf32, #tpu.memory_space<vmem>>, vector<1x1x16x16xf32>
    %118 = vector.shape_cast %117 : vector<1x1x16x16xf32> to vector<16x16xf32>
    %119 = vector.shape_cast %116 : vector<16x16xf32> to vector<1x1x16x16xf32>
    tpu.vector_store %arg7[%c0_88, %c1_89, %c0_90, %c0_91], %119 {strides = array<i32>} : memref<1x4x16x16xf32, #tpu.memory_space<vmem>>, vector<1x1x16x16xf32>,
    %120 = arith.mulf %79, %113 : vector<16x16xf32>
    %121 = arith.mulf %89, %110 : vector<16x16xf32>
    %122 = arith.addf %120, %121 : vector<16x16xf32>
    %c0_92 = arith.constant 0 : index
    %c1_93 = arith.constant 1 : index
    %c0_94 = arith.constant 0 : index
    %c0_95 = arith.constant 0 : index
    %123 = vector.load %arg8[%c0_92, %c1_93, %c0_94, %c0_95] : memref<1x4x16x16xf32, #tpu.memory_space<vmem>>, vector<1x1x16x16xf32>
    %124 = vector.shape_cast %123 : vector<1x1x16x16xf32> to vector<16x16xf32>
    %125 = vector.shape_cast %122 : vector<16x16xf32> to vector<1x1x16x16xf32>
    tpu.vector_store %arg8[%c0_92, %c1_93, %c0_94, %c0_95], %125 {strides = array<i32>} : memref<1x4x16x16xf32, #tpu.memory_space<vmem>>, vector<1x1x16x16xf32>,
    %c0_96 = arith.constant 0 : index
    %c2_97 = arith.constant 2 : index
    %c0_98 = arith.constant 0 : index
    %c0_99 = arith.constant 0 : index
    %126 = vector.load %arg5[%c0_96, %c2_97, %c0_98, %c0_99] : memref<1x4x16x16xbf16, #tpu.memory_space<vmem>>, vector<1x1x16x16xbf16>
    %127 = vector.shape_cast %126 : vector<1x1x16x16xbf16> to vector<16x16xbf16>
    %128 = arith.extf %127 : vector<16x16xbf16> to vector<16x16xf32>
    %c0_100 = arith.constant 0 : index
    %c2_101 = arith.constant 2 : index
    %c0_102 = arith.constant 0 : index
    %c0_103 = arith.constant 0 : index
    %129 = vector.load %arg6[%c0_100, %c2_101, %c0_102, %c0_103] : memref<1x4x16x16xbf16, #tpu.memory_space<vmem>>, vector<1x1x16x16xbf16>
    %130 = vector.shape_cast %129 : vector<1x1x16x16xbf16> to vector<16x16xbf16>
    %131 = arith.extf %130 : vector<16x16xbf16> to vector<16x16xf32>
    %132 = arith.mulf %79, %128 : vector<16x16xf32>
    %133 = arith.mulf %89, %131 : vector<16x16xf32>
    %134 = arith.subf %132, %133 : vector<16x16xf32>
    %c0_104 = arith.constant 0 : index
    %c2_105 = arith.constant 2 : index
    %c0_106 = arith.constant 0 : index
    %c0_107 = arith.constant 0 : index
    %135 = vector.load %arg7[%c0_104, %c2_105, %c0_106, %c0_107] : memref<1x4x16x16xf32, #tpu.memory_space<vmem>>, vector<1x1x16x16xf32>
    %136 = vector.shape_cast %135 : vector<1x1x16x16xf32> to vector<16x16xf32>
    %137 = vector.shape_cast %134 : vector<16x16xf32> to vector<1x1x16x16xf32>
    tpu.vector_store %arg7[%c0_104, %c2_105, %c0_106, %c0_107], %137 {strides = array<i32>} : memref<1x4x16x16xf32, #tpu.memory_space<vmem>>, vector<1x1x16x16xf32>,
    %138 = arith.mulf %79, %131 : vector<16x16xf32>
    %139 = arith.mulf %89, %128 : vector<16x16xf32>
    %140 = arith.addf %138, %139 : vector<16x16xf32>
    %c0_108 = arith.constant 0 : index
    %c2_109 = arith.constant 2 : index
    %c0_110 = arith.constant 0 : index
    %c0_111 = arith.constant 0 : index
    %141 = vector.load %arg8[%c0_108, %c2_109, %c0_110, %c0_111] : memref<1x4x16x16xf32, #tpu.memory_space<vmem>>, vector<1x1x16x16xf32>
    %142 = vector.shape_cast %141 : vector<1x1x16x16xf32> to vector<16x16xf32>
    %143 = vector.shape_cast %140 : vector<16x16xf32> to vector<1x1x16x16xf32>
    tpu.vector_store %arg8[%c0_108, %c2_109, %c0_110, %c0_111], %143 {strides = array<i32>} : memref<1x4x16x16xf32, #tpu.memory_space<vmem>>, vector<1x1x16x16xf32>,
    %c0_112 = arith.constant 0 : index
    %c3_113 = arith.constant 3 : index
    %c0_114 = arith.constant 0 : index
    %c0_115 = arith.constant 0 : index
    %144 = vector.load %arg5[%c0_112, %c3_113, %c0_114, %c0_115] : memref<1x4x16x16xbf16, #tpu.memory_space<vmem>>, vector<1x1x16x16xbf16>
    %145 = vector.shape_cast %144 : vector<1x1x16x16xbf16> to vector<16x16xbf16>
    %146 = arith.extf %145 : vector<16x16xbf16> to vector<16x16xf32>
    %c0_116 = arith.constant 0 : index
    %c3_117 = arith.constant 3 : index
    %c0_118 = arith.constant 0 : index
    %c0_119 = arith.constant 0 : index
    %147 = vector.load %arg6[%c0_116, %c3_117, %c0_118, %c0_119] : memref<1x4x16x16xbf16, #tpu.memory_space<vmem>>, vector<1x1x16x16xbf16>
    %148 = vector.shape_cast %147 : vector<1x1x16x16xbf16> to vector<16x16xbf16>
    %149 = arith.extf %148 : vector<16x16xbf16> to vector<16x16xf32>
    %150 = arith.mulf %79, %146 : vector<16x16xf32>
    %151 = arith.mulf %89, %149 : vector<16x16xf32>
    %152 = arith.subf %150, %151 : vector<16x16xf32>
    %c0_120 = arith.constant 0 : index
    %c3_121 = arith.constant 3 : index
    %c0_122 = arith.constant 0 : index
    %c0_123 = arith.constant 0 : index
    %153 = vector.load %arg7[%c0_120, %c3_121, %c0_122, %c0_123] : memref<1x4x16x16xf32, #tpu.memory_space<vmem>>, vector<1x1x16x16xf32>
    %154 = vector.shape_cast %153 : vector<1x1x16x16xf32> to vector<16x16xf32>
    %155 = vector.shape_cast %152 : vector<16x16xf32> to vector<1x1x16x16xf32>
    tpu.vector_store %arg7[%c0_120, %c3_121, %c0_122, %c0_123], %155 {strides = array<i32>} : memref<1x4x16x16xf32, #tpu.memory_space<vmem>>, vector<1x1x16x16xf32>,
    %156 = arith.mulf %79, %149 : vector<16x16xf32>
    %157 = arith.mulf %89, %146 : vector<16x16xf32>
    %158 = arith.addf %156, %157 : vector<16x16xf32>
    %c0_124 = arith.constant 0 : index
    %c3_125 = arith.constant 3 : index
    %c0_126 = arith.constant 0 : index
    %c0_127 = arith.constant 0 : index
    %159 = vector.load %arg8[%c0_124, %c3_125, %c0_126, %c0_127] : memref<1x4x16x16xf32, #tpu.memory_space<vmem>>, vector<1x1x16x16xf32>
    %160 = vector.shape_cast %159 : vector<1x1x16x16xf32> to vector<16x16xf32>
    %161 = vector.shape_cast %158 : vector<16x16xf32> to vector<1x1x16x16xf32>
    tpu.vector_store %arg8[%c0_124, %c3_125, %c0_126, %c0_127], %161 {strides = array<i32>} : memref<1x4x16x16xf32, #tpu.memory_space<vmem>>, vector<1x1x16x16xf32>,
    return
  }
  func.func @transform_0(%arg0: i32, %arg1: i32) -> i32 {
    %c0_i32 = arith.constant 0 : i32
    %c0_i32_0 = arith.constant 0 : i32
    return %c0_i32 : i32
  }
  func.func @transform_1(%arg0: i32, %arg1: i32) -> (i32, i32, i32, i32) {
    %c0_i32 = arith.constant 0 : i32
    %0 = arith.addi %arg1, %c0_i32 : i32
    %c0_i32_0 = arith.constant 0 : i32
    %c0_i32_1 = arith.constant 0 : i32
    %c0_i32_2 = arith.constant 0 : i32
    return %arg0, %c0_i32_0, %0, %c0_i32_1 : i32, i32, i32, i32
  }
  func.func @transform_2(%arg0: i32, %arg1: i32) -> (i32, i32, i32, i32) {
    %c0_i32 = arith.constant 0 : i32
    %0 = arith.addi %arg1, %c0_i32 : i32
    %c0_i32_0 = arith.constant 0 : i32
    %c0_i32_1 = arith.constant 0 : i32
    %c0_i32_2 = arith.constant 0 : i32
    return %arg0, %c0_i32_0, %0, %c0_i32_1 : i32, i32, i32, i32
  }
  func.func @transform_3(%arg0: i32, %arg1: i32) -> (i32, i32, i32, i32) {
    %c0_i32 = arith.constant 0 : i32
    %0 = arith.addi %arg1, %c0_i32 : i32
    %c0_i32_0 = arith.constant 0 : i32
    %c0_i32_1 = arith.constant 0 : i32
    %c0_i32_2 = arith.constant 0 : i32
    return %arg0, %c0_i32_0, %0, %c0_i32_1 : i32, i32, i32, i32
  }
  func.func @transform_4(%arg0: i32, %arg1: i32) -> (i32, i32, i32, i32) {
    %c0_i32 = arith.constant 0 : i32
    %0 = arith.addi %arg1, %c0_i32 : i32
    %c0_i32_0 = arith.constant 0 : i32
    %c0_i32_1 = arith.constant 0 : i32
    %c0_i32_2 = arith.constant 0 : i32
    return %arg0, %c0_i32_0, %0, %c0_i32_1 : i32, i32, i32, i32
  }
  func.func @transform_5(%arg0: i32, %arg1: i32) -> (i32, i32, i32, i32) {
    %c0_i32 = arith.constant 0 : i32
    %0 = arith.addi %arg1, %c0_i32 : i32
    %c0_i32_0 = arith.constant 0 : i32
    %c0_i32_1 = arith.constant 0 : i32
    %c0_i32_2 = arith.constant 0 : i32
    return %arg0, %c0_i32_0, %0, %c0_i32_1 : i32, i32, i32, i32
  }
  func.func @transform_6(%arg0: i32, %arg1: i32) -> (i32, i32, i32, i32) {
    %c0_i32 = arith.constant 0 : i32
    %0 = arith.addi %arg1, %c0_i32 : i32
    %c0_i32_0 = arith.constant 0 : i32
    %c0_i32_1 = arith.constant 0 : i32
    %c0_i32_2 = arith.constant 0 : i32
    return %arg0, %c0_i32_0, %0, %c0_i32_1 : i32, i32, i32, i32
  }
}

module attributes {stable_mosaic.version = 11 : i64} {
  func.func @_dc_kernel(%arg0: i32, %arg1: i32, %arg2: memref<1xf32, #tpu.memory_space<smem>>, %arg3: memref<1x1x16xf32, #tpu.memory_space<vmem>>, %arg4: memref<1x4x16x16xf32, #tpu.memory_space<vmem>>, %arg5: memref<1x4x16x16xf32, #tpu.memory_space<vmem>>, %arg6: memref<1x4x16x16xf32, #tpu.memory_space<vmem>>, %arg7: memref<1x4x16x16xf32, #tpu.memory_space<vmem>>, %arg8: memref<1x4x16x16xf32, #tpu.memory_space<vmem>>, %arg9: memref<1x4x16x16xf32, #tpu.memory_space<vmem>>, %arg10: memref<1x4x16x16xf32, #tpu.memory_space<vmem>>, %arg11: memref<1x4x16x16xf32, #tpu.memory_space<vmem>>) attributes {dimension_semantics = [#tpu.dimension_semantics<parallel>, #tpu.dimension_semantics<parallel>], iteration_bounds = array<i64: 2, 1>, scalar_prefetch = 0 : i64, scratch_operands = 0 : i64, tpu.core_type = #tpu.core_type<tc>, window_params = [{transform_indices = @transform_0, window_bounds = array<i64: 1>}, {transform_indices = @transform_1, window_bounds = array<i64: 1, 1, 16>}, {transform_indices = @transform_2, window_bounds = array<i64: 1, 4, 16, 16>}, {transform_indices = @transform_3, window_bounds = array<i64: 1, 4, 16, 16>}, {transform_indices = @transform_4, window_bounds = array<i64: 1, 4, 16, 16>}, {transform_indices = @transform_5, window_bounds = array<i64: 1, 4, 16, 16>}, {transform_indices = @transform_6, window_bounds = array<i64: 1, 4, 16, 16>}, {transform_indices = @transform_7, window_bounds = array<i64: 1, 4, 16, 16>}, {transform_indices = @transform_8, window_bounds = array<i64: 1, 4, 16, 16>}, {transform_indices = @transform_9, window_bounds = array<i64: 1, 4, 16, 16>}]} {
    %c0 = arith.constant 0 : index
    %0 = memref.load %arg2[%c0] : memref<1xf32, #tpu.memory_space<smem>>
    %c0_0 = arith.constant 0 : index
    %c0_1 = arith.constant 0 : index
    %c0_2 = arith.constant 0 : index
    %1 = vector.load %arg3[%c0_0, %c0_1, %c0_2] : memref<1x1x16xf32, #tpu.memory_space<vmem>>, vector<1x1x16xf32>
    %2 = vector.shape_cast %1 : vector<1x1x16xf32> to vector<1x16xf32>
    %cst = arith.constant 0.000000e+00 : f32
    %3 = vector.broadcast %cst : f32 to vector<1x16xf32>
    %4 = arith.cmpf ogt, %2, %3 : vector<1x16xf32>
    %c0_3 = arith.constant 0 : index
    %c0_4 = arith.constant 0 : index
    %c0_5 = arith.constant 0 : index
    %c0_6 = arith.constant 0 : index
    %5 = vector.load %arg4[%c0_3, %c0_4, %c0_5, %c0_6] : memref<1x4x16x16xf32, #tpu.memory_space<vmem>>, vector<1x4x16x16xf32>
    %6 = vector.shape_cast %5 : vector<1x4x16x16xf32> to vector<4x16x16xf32>
    %c0_7 = arith.constant 0 : index
    %c0_8 = arith.constant 0 : index
    %c0_9 = arith.constant 0 : index
    %c0_10 = arith.constant 0 : index
    %7 = vector.load %arg5[%c0_7, %c0_8, %c0_9, %c0_10] : memref<1x4x16x16xf32, #tpu.memory_space<vmem>>, vector<1x4x16x16xf32>
    %8 = vector.shape_cast %7 : vector<1x4x16x16xf32> to vector<4x16x16xf32>
    %9 = vector.shape_cast %4 : vector<1x16xi1> to vector<1x1x16xi1>
    %c0_11 = arith.constant 0 : index
    %c0_12 = arith.constant 0 : index
    %c0_13 = arith.constant 0 : index
    %c0_14 = arith.constant 0 : index
    %10 = vector.load %arg6[%c0_11, %c0_12, %c0_13, %c0_14] : memref<1x4x16x16xf32, #tpu.memory_space<vmem>>, vector<1x4x16x16xf32>
    %11 = vector.shape_cast %10 : vector<1x4x16x16xf32> to vector<4x16x16xf32>
    %12 = arith.subf %6, %11 : vector<4x16x16xf32>
    %13 = vector.broadcast %0 : f32 to vector<4x16x16xf32>
    %14 = arith.mulf %12, %13 : vector<4x16x16xf32>
    %cst_15 = arith.constant 0.000000e+00 : f32
    %15 = vector.shape_cast %9 : vector<1x1x16xi1> to vector<1x1x16xi1>
    %16 = vector.broadcast %15 : vector<1x1x16xi1> to vector<4x16x16xi1>
    %17 = vector.broadcast %cst_15 : f32 to vector<4x16x16xf32>
    %18 = arith.select %16, %14, %17 : vector<4x16x16xi1>, vector<4x16x16xf32>
    %19 = vector.shape_cast %4 : vector<1x16xi1> to vector<1x1x16xi1>
    %c0_16 = arith.constant 0 : index
    %c0_17 = arith.constant 0 : index
    %c0_18 = arith.constant 0 : index
    %c0_19 = arith.constant 0 : index
    %20 = vector.load %arg7[%c0_16, %c0_17, %c0_18, %c0_19] : memref<1x4x16x16xf32, #tpu.memory_space<vmem>>, vector<1x4x16x16xf32>
    %21 = vector.shape_cast %20 : vector<1x4x16x16xf32> to vector<4x16x16xf32>
    %22 = arith.subf %8, %21 : vector<4x16x16xf32>
    %23 = vector.broadcast %0 : f32 to vector<4x16x16xf32>
    %24 = arith.mulf %22, %23 : vector<4x16x16xf32>
    %cst_20 = arith.constant 0.000000e+00 : f32
    %25 = vector.shape_cast %19 : vector<1x1x16xi1> to vector<1x1x16xi1>
    %26 = vector.broadcast %25 : vector<1x1x16xi1> to vector<4x16x16xi1>
    %27 = vector.broadcast %cst_20 : f32 to vector<4x16x16xf32>
    %28 = arith.select %26, %24, %27 : vector<4x16x16xi1>, vector<4x16x16xf32>
    %29 = arith.subf %6, %18 : vector<4x16x16xf32>
    %c0_21 = arith.constant 0 : index
    %c0_22 = arith.constant 0 : index
    %c0_23 = arith.constant 0 : index
    %c0_24 = arith.constant 0 : index
    %30 = vector.load %arg8[%c0_21, %c0_22, %c0_23, %c0_24] : memref<1x4x16x16xf32, #tpu.memory_space<vmem>>, vector<1x4x16x16xf32>
    %31 = vector.shape_cast %30 : vector<1x4x16x16xf32> to vector<4x16x16xf32>
    %32 = arith.subf %29, %31 : vector<4x16x16xf32>
    %c0_25 = arith.constant 0 : index
    %c0_26 = arith.constant 0 : index
    %c0_27 = arith.constant 0 : index
    %c0_28 = arith.constant 0 : index
    %33 = vector.load %arg10[%c0_25, %c0_26, %c0_27, %c0_28] : memref<1x4x16x16xf32, #tpu.memory_space<vmem>>, vector<1x4x16x16xf32>
    %34 = vector.shape_cast %33 : vector<1x4x16x16xf32> to vector<4x16x16xf32>
    %35 = vector.shape_cast %32 : vector<4x16x16xf32> to vector<1x4x16x16xf32>
    tpu.vector_store %arg10[%c0_25, %c0_26, %c0_27, %c0_28], %35 {strides = array<i32>} : memref<1x4x16x16xf32, #tpu.memory_space<vmem>>, vector<1x4x16x16xf32>,
    %36 = arith.subf %8, %28 : vector<4x16x16xf32>
    %c0_29 = arith.constant 0 : index
    %c0_30 = arith.constant 0 : index
    %c0_31 = arith.constant 0 : index
    %c0_32 = arith.constant 0 : index
    %37 = vector.load %arg9[%c0_29, %c0_30, %c0_31, %c0_32] : memref<1x4x16x16xf32, #tpu.memory_space<vmem>>, vector<1x4x16x16xf32>
    %38 = vector.shape_cast %37 : vector<1x4x16x16xf32> to vector<4x16x16xf32>
    %39 = arith.subf %36, %38 : vector<4x16x16xf32>
    %c0_33 = arith.constant 0 : index
    %c0_34 = arith.constant 0 : index
    %c0_35 = arith.constant 0 : index
    %c0_36 = arith.constant 0 : index
    %40 = vector.load %arg11[%c0_33, %c0_34, %c0_35, %c0_36] : memref<1x4x16x16xf32, #tpu.memory_space<vmem>>, vector<1x4x16x16xf32>
    %41 = vector.shape_cast %40 : vector<1x4x16x16xf32> to vector<4x16x16xf32>
    %42 = vector.shape_cast %39 : vector<4x16x16xf32> to vector<1x4x16x16xf32>
    tpu.vector_store %arg11[%c0_33, %c0_34, %c0_35, %c0_36], %42 {strides = array<i32>} : memref<1x4x16x16xf32, #tpu.memory_space<vmem>>, vector<1x4x16x16xf32>,
    return
  }
  func.func @transform_0(%arg0: i32, %arg1: i32) -> i32 {
    %c0_i32 = arith.constant 0 : i32
    %c0_i32_0 = arith.constant 0 : i32
    return %c0_i32 : i32
  }
  func.func @transform_1(%arg0: i32, %arg1: i32) -> (i32, i32, i32) {
    %c0_i32 = arith.constant 0 : i32
    %c0_i32_0 = arith.constant 0 : i32
    %c0_i32_1 = arith.constant 0 : i32
    return %arg0, %c0_i32, %c0_i32_0 : i32, i32, i32
  }
  func.func @transform_2(%arg0: i32, %arg1: i32) -> (i32, i32, i32, i32) {
    %c0_i32 = arith.constant 0 : i32
    %0 = arith.addi %arg1, %c0_i32 : i32
    %c0_i32_0 = arith.constant 0 : i32
    %c0_i32_1 = arith.constant 0 : i32
    %c0_i32_2 = arith.constant 0 : i32
    return %arg0, %c0_i32_0, %0, %c0_i32_1 : i32, i32, i32, i32
  }
  func.func @transform_3(%arg0: i32, %arg1: i32) -> (i32, i32, i32, i32) {
    %c0_i32 = arith.constant 0 : i32
    %0 = arith.addi %arg1, %c0_i32 : i32
    %c0_i32_0 = arith.constant 0 : i32
    %c0_i32_1 = arith.constant 0 : i32
    %c0_i32_2 = arith.constant 0 : i32
    return %arg0, %c0_i32_0, %0, %c0_i32_1 : i32, i32, i32, i32
  }
  func.func @transform_4(%arg0: i32, %arg1: i32) -> (i32, i32, i32, i32) {
    %c0_i32 = arith.constant 0 : i32
    %0 = arith.addi %arg1, %c0_i32 : i32
    %c0_i32_0 = arith.constant 0 : i32
    %c0_i32_1 = arith.constant 0 : i32
    %c0_i32_2 = arith.constant 0 : i32
    return %arg0, %c0_i32_0, %0, %c0_i32_1 : i32, i32, i32, i32
  }
  func.func @transform_5(%arg0: i32, %arg1: i32) -> (i32, i32, i32, i32) {
    %c0_i32 = arith.constant 0 : i32
    %0 = arith.addi %arg1, %c0_i32 : i32
    %c0_i32_0 = arith.constant 0 : i32
    %c0_i32_1 = arith.constant 0 : i32
    %c0_i32_2 = arith.constant 0 : i32
    return %arg0, %c0_i32_0, %0, %c0_i32_1 : i32, i32, i32, i32
  }
  func.func @transform_6(%arg0: i32, %arg1: i32) -> (i32, i32, i32, i32) {
    %c0_i32 = arith.constant 0 : i32
    %0 = arith.addi %arg1, %c0_i32 : i32
    %c0_i32_0 = arith.constant 0 : i32
    %c0_i32_1 = arith.constant 0 : i32
    %c0_i32_2 = arith.constant 0 : i32
    return %arg0, %c0_i32_0, %0, %c0_i32_1 : i32, i32, i32, i32
  }
  func.func @transform_7(%arg0: i32, %arg1: i32) -> (i32, i32, i32, i32) {
    %c0_i32 = arith.constant 0 : i32
    %0 = arith.addi %arg1, %c0_i32 : i32
    %c0_i32_0 = arith.constant 0 : i32
    %c0_i32_1 = arith.constant 0 : i32
    %c0_i32_2 = arith.constant 0 : i32
    return %arg0, %c0_i32_0, %0, %c0_i32_1 : i32, i32, i32, i32
  }
  func.func @transform_8(%arg0: i32, %arg1: i32) -> (i32, i32, i32, i32) {
    %c0_i32 = arith.constant 0 : i32
    %0 = arith.addi %arg1, %c0_i32 : i32
    %c0_i32_0 = arith.constant 0 : i32
    %c0_i32_1 = arith.constant 0 : i32
    %c0_i32_2 = arith.constant 0 : i32
    return %arg0, %c0_i32_0, %0, %c0_i32_1 : i32, i32, i32, i32
  }
  func.func @transform_9(%arg0: i32, %arg1: i32) -> (i32, i32, i32, i32) {
    %c0_i32 = arith.constant 0 : i32
    %0 = arith.addi %arg1, %c0_i32 : i32
    %c0_i32_0 = arith.constant 0 : i32
    %c0_i32_1 = arith.constant 0 : i32
    %c0_i32_2 = arith.constant 0 : i32
    return %arg0, %c0_i32_0, %0, %c0_i32_1 : i32, i32, i32, i32
  }
}

module attributes {stable_mosaic.version = 11 : i64} {
  func.func @_rss_kernel(%arg0: i32, %arg1: i32, %arg2: memref<1x4x16x16xf32, #tpu.memory_space<vmem>>, %arg3: memref<1x4x16x16xf32, #tpu.memory_space<vmem>>, %arg4: memref<1x16x16xf32, #tpu.memory_space<vmem>>) attributes {dimension_semantics = [#tpu.dimension_semantics<parallel>, #tpu.dimension_semantics<parallel>], iteration_bounds = array<i64: 2, 1>, scalar_prefetch = 0 : i64, scratch_operands = 0 : i64, tpu.core_type = #tpu.core_type<tc>, window_params = [{transform_indices = @transform_0, window_bounds = array<i64: 1, 4, 16, 16>}, {transform_indices = @transform_1, window_bounds = array<i64: 1, 4, 16, 16>}, {transform_indices = @transform_2, window_bounds = array<i64: 1, 16, 16>}]} {
    %c0 = arith.constant 0 : index
    %c0_0 = arith.constant 0 : index
    %c0_1 = arith.constant 0 : index
    %c0_2 = arith.constant 0 : index
    %0 = vector.load %arg2[%c0, %c0_0, %c0_1, %c0_2] : memref<1x4x16x16xf32, #tpu.memory_space<vmem>>, vector<1x1x16x16xf32>
    %1 = vector.shape_cast %0 : vector<1x1x16x16xf32> to vector<16x16xf32>
    %c0_3 = arith.constant 0 : index
    %c0_4 = arith.constant 0 : index
    %c0_5 = arith.constant 0 : index
    %c0_6 = arith.constant 0 : index
    %2 = vector.load %arg3[%c0_3, %c0_4, %c0_5, %c0_6] : memref<1x4x16x16xf32, #tpu.memory_space<vmem>>, vector<1x1x16x16xf32>
    %3 = vector.shape_cast %2 : vector<1x1x16x16xf32> to vector<16x16xf32>
    %4 = arith.mulf %1, %1 : vector<16x16xf32>
    %5 = arith.mulf %3, %3 : vector<16x16xf32>
    %6 = arith.addf %4, %5 : vector<16x16xf32>
    %c0_7 = arith.constant 0 : index
    %c1 = arith.constant 1 : index
    %c0_8 = arith.constant 0 : index
    %c0_9 = arith.constant 0 : index
    %7 = vector.load %arg2[%c0_7, %c1, %c0_8, %c0_9] : memref<1x4x16x16xf32, #tpu.memory_space<vmem>>, vector<1x1x16x16xf32>
    %8 = vector.shape_cast %7 : vector<1x1x16x16xf32> to vector<16x16xf32>
    %c0_10 = arith.constant 0 : index
    %c1_11 = arith.constant 1 : index
    %c0_12 = arith.constant 0 : index
    %c0_13 = arith.constant 0 : index
    %9 = vector.load %arg3[%c0_10, %c1_11, %c0_12, %c0_13] : memref<1x4x16x16xf32, #tpu.memory_space<vmem>>, vector<1x1x16x16xf32>
    %10 = vector.shape_cast %9 : vector<1x1x16x16xf32> to vector<16x16xf32>
    %11 = arith.mulf %8, %8 : vector<16x16xf32>
    %12 = arith.addf %6, %11 : vector<16x16xf32>
    %13 = arith.mulf %10, %10 : vector<16x16xf32>
    %14 = arith.addf %12, %13 : vector<16x16xf32>
    %c0_14 = arith.constant 0 : index
    %c2 = arith.constant 2 : index
    %c0_15 = arith.constant 0 : index
    %c0_16 = arith.constant 0 : index
    %15 = vector.load %arg2[%c0_14, %c2, %c0_15, %c0_16] : memref<1x4x16x16xf32, #tpu.memory_space<vmem>>, vector<1x1x16x16xf32>
    %16 = vector.shape_cast %15 : vector<1x1x16x16xf32> to vector<16x16xf32>
    %c0_17 = arith.constant 0 : index
    %c2_18 = arith.constant 2 : index
    %c0_19 = arith.constant 0 : index
    %c0_20 = arith.constant 0 : index
    %17 = vector.load %arg3[%c0_17, %c2_18, %c0_19, %c0_20] : memref<1x4x16x16xf32, #tpu.memory_space<vmem>>, vector<1x1x16x16xf32>
    %18 = vector.shape_cast %17 : vector<1x1x16x16xf32> to vector<16x16xf32>
    %19 = arith.mulf %16, %16 : vector<16x16xf32>
    %20 = arith.addf %14, %19 : vector<16x16xf32>
    %21 = arith.mulf %18, %18 : vector<16x16xf32>
    %22 = arith.addf %20, %21 : vector<16x16xf32>
    %c0_21 = arith.constant 0 : index
    %c3 = arith.constant 3 : index
    %c0_22 = arith.constant 0 : index
    %c0_23 = arith.constant 0 : index
    %23 = vector.load %arg2[%c0_21, %c3, %c0_22, %c0_23] : memref<1x4x16x16xf32, #tpu.memory_space<vmem>>, vector<1x1x16x16xf32>
    %24 = vector.shape_cast %23 : vector<1x1x16x16xf32> to vector<16x16xf32>
    %c0_24 = arith.constant 0 : index
    %c3_25 = arith.constant 3 : index
    %c0_26 = arith.constant 0 : index
    %c0_27 = arith.constant 0 : index
    %25 = vector.load %arg3[%c0_24, %c3_25, %c0_26, %c0_27] : memref<1x4x16x16xf32, #tpu.memory_space<vmem>>, vector<1x1x16x16xf32>
    %26 = vector.shape_cast %25 : vector<1x1x16x16xf32> to vector<16x16xf32>
    %27 = arith.mulf %24, %24 : vector<16x16xf32>
    %28 = arith.addf %22, %27 : vector<16x16xf32>
    %29 = arith.mulf %26, %26 : vector<16x16xf32>
    %30 = arith.addf %28, %29 : vector<16x16xf32>
    %31 = math.sqrt %30 : vector<16x16xf32>
    %c0_28 = arith.constant 0 : index
    %c0_29 = arith.constant 0 : index
    %c0_30 = arith.constant 0 : index
    %32 = vector.load %arg4[%c0_28, %c0_29, %c0_30] : memref<1x16x16xf32, #tpu.memory_space<vmem>>, vector<1x16x16xf32>
    %33 = vector.shape_cast %32 : vector<1x16x16xf32> to vector<16x16xf32>
    %34 = vector.shape_cast %31 : vector<16x16xf32> to vector<1x16x16xf32>
    tpu.vector_store %arg4[%c0_28, %c0_29, %c0_30], %34 {strides = array<i32>} : memref<1x16x16xf32, #tpu.memory_space<vmem>>, vector<1x16x16xf32>,
    return
  }
  func.func @transform_0(%arg0: i32, %arg1: i32) -> (i32, i32, i32, i32) {
    %c0_i32 = arith.constant 0 : i32
    %0 = arith.addi %arg1, %c0_i32 : i32
    %c0_i32_0 = arith.constant 0 : i32
    %c0_i32_1 = arith.constant 0 : i32
    %c0_i32_2 = arith.constant 0 : i32
    return %arg0, %c0_i32_0, %0, %c0_i32_1 : i32, i32, i32, i32
  }
  func.func @transform_1(%arg0: i32, %arg1: i32) -> (i32, i32, i32, i32) {
    %c0_i32 = arith.constant 0 : i32
    %0 = arith.addi %arg1, %c0_i32 : i32
    %c0_i32_0 = arith.constant 0 : i32
    %c0_i32_1 = arith.constant 0 : i32
    %c0_i32_2 = arith.constant 0 : i32
    return %arg0, %c0_i32_0, %0, %c0_i32_1 : i32, i32, i32, i32
  }
  func.func @transform_2(%arg0: i32, %arg1: i32) -> (i32, i32, i32) {
    %c0_i32 = arith.constant 0 : i32
    %c0_i32_0 = arith.constant 0 : i32
    return %arg0, %arg1, %c0_i32 : i32, i32, i32
  }
}

</mosaic_0001>

<bundles_post_ra>
// kernel: mamba_varnet_forward.7
= control target key start
LH: loop header
LB: loop body
LE: loop exit
PB: predicated region body
PF: predicated region fallthrough
CT: control target
= control target key end

     0   :  { %12 = vsyncpa [#allocation3], 0  ;;  %s1324_s21 = smov 0   ;;  %s1326_s22 = smov 0   ;;  %s1709_s0 = inlined_call_operand.vmem [shape: f32[6], index: 0, kind: input, shape index: {}]   ;;  %s1710_s1 = inlined_call_operand.vmem [shape: f32[2,4,16,16], index: 1, kind: input, shape index: {}]   ;;  %s1711_s2 = inlined_call_operand.vmem [shape: f32[2,4,16,16], index: 2, kind: input, shape index: {}]   ;;  %s1712_s3 = inlined_call_operand.vmem [shape: bf16[2,4,16,16], index: 3, kind: output, shape index: {0}]   ;;  %s1713_s4 = inlined_call_operand.vmem [shape: bf16[2,4,16,16], index: 4, kind: output, shape index: {1}]   ;;  %s1714_s5 = inlined_call_operand.vmem [shape: f32[2,4,16,16], index: 5, kind: output, shape index: {2}]   ;;  %s1715_s6 = inlined_call_operand.vmem [shape: f32[2,4,16,16], index: 6, kind: output, shape index: {3}]  }
   0x1   :  { %s1328_s23 = smov 0  }
   0x2 LB: > { %s1044_s24 = sadd.s32 4294967295, %s1286_s23   ;;  %s30_s25 = sadd.s32 1, %s1282_s22  ;;  %s1286_s23 = sphi %s1328_s23, %s18_s23   ;;  %s1282_s22 = sphi %s1326_s22, %s1719_s22   ;;  %s1278_s21 = sphi %s1324_s21, %s1718_s21  }
   0x3   : > { %p32_p0 = scmp.ge.s32.totalorder %s30_s25, 2  ;;  %p1046_p1 = scmp.ge.s32.totalorder %s1286_s23, 1 }
   0x4   : > { %p224_p2 = scmp.lt.s32.totalorder %s1286_s23, 3  ;;  %p1349_p4 = scmp.eq.s32.totalorder %s1044_s24, 0 }
   0x5   : > { %s1721_s25 = smov (%p32_p0, %s30_s25), 0  ;;  %s237_s30 = sshll.u32 %s1709_s0, 4  ;;  %s238_s30 = int_to_ptr.vmem [resolvable:$true] %s237_s30 }
   0x6   : > { %p1345_p3 = pnand %p1046_p1, %p224_p2  ;;  %s1245_s7 = scalar_lea.vmem %s238_s30, 16 }
   0x7   : > { %p1246_p7 = scmp.ne.s32.totalorder %s238_s30, %s1245_s7  ;;  %p1253_p11 = scmp.lt.s32.totalorder %s238_s30, %s238_s30 }
   0x8   : > { %p1210_p5 = pneg %p1345_p3  ;;  %p1254_p12 = scmp.lt.s32.totalorder %s1245_s7, %s1245_s7 }
   0xa   : > { %p1211_p6 = pnand %p1349_p4, %p1210_p5  ;;  %p1255_p13 = por %p1254_p12, %p1253_p11 }
   0xc   : > { %p1247_p8 = pneg %p1211_p6 }
   0xe   : > { %p1248_p9 = pnand %p1247_p8, %p1246_p7 }
  0x10   : > { %p1249_p10 = pneg %p1248_p9 }
  0x12   : > { %p1256_p0 = pnand %p1255_p13, %p1249_p10 }
  0x14   : > { %1259 = shalt.err (!%p1256_p0)
}
  0x15   : > { %s1288_s8 = smov [#allocation2]   ;;  %276 = sbr.rel (%p1345_p3) target bundleno = 115 (0x73), region = 32 }
  0x16   : > { %1213 = dma.vmem_to_smem (!%p1211_p6), %s238_s30, 16, %s1288_s8, [#allocation3]  }
  0x1c   : > { %1273 = dma.done.wait (%p1349_p4), [#allocation3], 16  }
  0x1d   : > { %1275 = vsyncadd (%p1349_p4), [#allocation3], 4294967280 }
  0x1e   : > { %282 = sfence }
  0x1f   : > { %p352_p1 = scmp.lt.s32.totalorder %s1278_s21, 1  ;;  %s1465_s16 = sld [smem:[#allocation2]]  ;;  %vm479_vm0 = vcmask 125952   ;;  %vm688_vm1 = vcmask 130048  }
  0x20   : > { %s1467_s17 = sld [smem:[#allocation2 + $0x1]]  ;;  %s1469_s18 = sld [smem:[#allocation2 + $0x4]] }
  0x21   : > { %s1723_s21 = smov (!%p352_p1, %s1278_s21), 1  ;;  %s1546_s29 = sld [smem:[#allocation2 + $0x2]] }
  0x22   : > { %s1371_s9 = sshll.u32 %s1723_s21, 6  ;;  %s1148_s19 = sshll.u32 %s1723_s21, 5 }
  0x23   : > { %s1377_s12 = scalar_lea.vmem %s1710_s1, %s1371_s9  ;;  %s1383_s15 = scalar_lea.vmem %s1711_s2, %s1371_s9 }
  0x24   : > { %v1386_v0 = vld [vmem:[%s1377_s12] sm:$0xff]  ;;  %v1392_v2 = vld [vmem:[%s1377_s12 + $0x10] sm:$0xff]  ;;  %v1407_v8 = vld [vmem:[%s1377_s12 + $0x8] sm:$0xff]  ;;  %s1481_s26 = scalar_lea.vmem %s1712_s3, %s1148_s19  ;;  %s1486_s21 = scalar_lea.vmem %s1713_s4, %s1148_s19 }
  0x25   : > { %v1389_v1 = vld [vmem:[%s1383_s15] sm:$0xff]  ;;  %v415_v3 = vmul.f32 %v1386_v0, %v1386_v0  ;;  %v1399_v5 = vld [vmem:[%s1383_s15 + $0x10] sm:$0xff]  ;;  %v427_v6 = vmul.f32 %v1392_v2, %v1392_v2  ;;  %v1412_v11 = vld [vmem:[%s1383_s15 + $0x8] sm:$0xff]  ;;  %v416_v12 = vmul.f32 %v1407_v8, %v1407_v8  ;;  %v647_v49 = vstv %s1465_s16  ;;  %s1548_s30 = sld [smem:[#allocation2 + $0x3]]  ;;  %s1557_s7 = sld [smem:[#allocation2 + $0x5]] }
  0x26   : > { %v417_v4 = vmul.f32 %v1389_v1, %v1389_v1  ;;  %v1404_v7 = vld [vmem:[%s1377_s12 + $0x20] sm:$0xff]  ;;  %v431_v10 = vmul.f32 %v1399_v5, %v1399_v5  ;;  %v1417_v13 = vld [vmem:[%s1377_s12 + $0x18] sm:$0xff]  ;;  %v418_v16 = vmul.f32 %v1412_v11, %v1412_v11  ;;  %v1432_v20 = vld [vmem:[%s1377_s12 + $0x28] sm:$0xff]  ;;  %v651_v50 = vstv %s1467_s17  ;;  %s1647_s11 = scalar_lea.vmem %s1714_s5, %s1371_s9  ;;  %s1653_s14 = scalar_lea.vmem %s1715_s6, %s1371_s9 }
  0x27   : > { %v1420_v14 = vld [vmem:[%s1383_s15 + $0x18] sm:$0xff]  ;;  %v1423_v15 = vld [vmem:[%s1383_s15 + $0x20] sm:$0xff]  ;;  %v428_v17 = vmul.f32 %v1417_v13, %v1417_v13  ;;  %v441_v19 = vmul.f32 %v1404_v7, %v1404_v7  ;;  %v1435_v21 = vld [vmem:[%s1377_s12 + $0x30] sm:$0xff]  ;;  %v442_v29 = vmul.f32 %v1432_v20, %v1432_v20  ;;  %v657_v54 = vstv %s1469_s18 }
  0x28   : > { %v419_v9 = vadd.f32 %v417_v4, %v415_v3  ;;  %v420_v22 = vadd.f32 %v418_v16, %v416_v12  ;;  %v432_v23 = vmul.f32 %v1420_v14, %v1420_v14  ;;  %v445_v25 = vmul.f32 %v1423_v15, %v1423_v15  ;;  %v1442_v26 = vld [vmem:[%s1383_s15 + $0x28] sm:$0xff]  ;;  %v1445_v27 = vld [vmem:[%s1383_s15 + $0x30] sm:$0xff]  ;;  %v1452_v32 = vld [vmem:[%s1377_s12 + $0x38] sm:$0xff] }
  0x29   : > { %v455_v31 = vmul.f32 %v1435_v21, %v1435_v21  ;;  %v446_v34 = vmul.f32 %v1442_v26, %v1442_v26  ;;  %v459_v36 = vmul.f32 %v1445_v27, %v1445_v27  ;;  %v1459_v37 = vld [vmem:[%s1383_s15 + $0x38] sm:$0xff]  ;;  %v456_v39 = vmul.f32 %v1452_v32, %v1452_v32 }
  0x2a   : > { %v429_v18 = vadd.f32 %v427_v6, %v419_v9  ;;  %v430_v28 = vadd.f32 %v428_v17, %v420_v22  ;;  %v460_v42 = vmul.f32 %v1459_v37, %v1459_v37 }
  0x2c   : > { %v433_v24 = vadd.f32 %v431_v10, %v429_v18  ;;  %v434_v33 = vadd.f32 %v432_v23, %v430_v28 }
  0x2e   : > { %v443_v30 = vadd.f32 %v441_v19, %v433_v24  ;;  %v444_v38 = vadd.f32 %v442_v29, %v434_v33 }
  0x30   : > { %v447_v35 = vadd.f32 %v445_v25, %v443_v30  ;;  %v448_v41 = vadd.f32 %v446_v34, %v444_v38 }
  0x32   : > { %v457_v40 = vadd.f32 %v455_v31, %v447_v35  ;;  %v458_v44 = vadd.f32 %v456_v39, %v448_v41 }
  0x34   : > { %v461_v43 = vadd.f32 %v459_v36, %v457_v40  ;;  %v462_v46 = vadd.f32 %v460_v42, %v458_v44 }
  0x36   : > { %v463_v45 = vadd.f32 1e-12, %v461_v43  ;;  %v464_v47 = vadd.f32 1e-12, %v462_v46 }
  0x38   : > { %1241 = vrsqrt.f32 %v463_v45 }
  0x39   : > { %1243 = vrsqrt.f32 %v464_v47 }
  0x42   : > { %v1242_v48 = vpop.eup %1241 }
  0x43   : > { %v467_v51 = vmul.f32 %v1242_v48, %v1386_v0  ;;  %v469_v52 = vmul.f32 %v1242_v48, %v1389_v1  ;;  %v512_v53 = vmul.f32 %v1242_v48, %v1392_v2  ;;  %v514_v55 = vmul.f32 %v1242_v48, %v1399_v5  ;;  %v1494_v59 = vpop.eup %1243 }
  0x44   : > { %v558_v56 = vmul.f32 %v1242_v48, %v1404_v7  ;;  %v560_v57 = vmul.f32 %v1242_v48, %v1423_v15  ;;  %v1492_v58 = vmul.f32 %v1242_v48, %v1435_v21  ;;  %v468_v3 = vmul.f32 %v1494_v59, %v1407_v8 }
  0x45   : > { %v1152_v60 = vpack.c.bf16 %v467_v51, %v467_v51  ;;  %v492_v61 = vmul.f32 %v467_v51, %v1386_v0  ;;  %v500_v62 = vmul.f32 %v467_v51, %v1389_v1  ;;  %v1154_v63 = vpack.c.bf16 %v469_v52, %v469_v52 }
  0x46   : > { %v494_v4 = vmul.f32 %v469_v52, %v1389_v1  ;;  %v502_v6 = vmul.f32 %v469_v52, %v1386_v0  ;;  %v470_v9 = vmul.f32 %v1494_v59, %v1412_v11  ;;  %v1156_v10 = vpack.c.bf16 %v512_v53, %v512_v53 }
  0x47   : > { %480 = vst.msk [vmem:[%s1481_s26] sm:$0xf] %vm479_vm0, %v1152_v60  ;;  %490 = vst.msk [vmem:[%s1486_s21] sm:$0xf] %vm479_vm0, %v1154_v63  ;;  %v513_v12 = vmul.f32 %v1494_v59, %v1417_v13  ;;  %v1158_v16 = vpack.c.bf16 %v514_v55, %v514_v55  ;;  %v1511_v17 = vmul.f32 %v1242_v48, %v1445_v27 }
  0x48   : > { %v1153_v0 = vpack.c.bf16 %v468_v3, %v468_v3  ;;  %v493_v1 = vmul.f32 %v468_v3, %v1407_v8  ;;  %v501_v18 = vmul.f32 %v468_v3, %v1412_v11  ;;  %v538_v19 = vmul.f32 %v1392_v2, %v512_v53  ;;  %1085 = vst.msk [vmem:[%s1481_s26 + $0x8] sm:$0xf] %vm479_vm0, %v1156_v10 }
  0x49   : > { %v496_v22 = vadd.f32 %v494_v4, %v492_v61  ;;  %v504_v23 = vsub.f32 %v500_v62, %v502_v6  ;;  %v1155_v24 = vpack.c.bf16 %v470_v9, %v470_v9  ;;  %v495_v25 = vmul.f32 %v470_v9, %v1412_v11  ;;  %1089 = vst.msk [vmem:[%s1486_s21 + $0x8] sm:$0xf] %vm479_vm0, %v1158_v16 }
  0x4a   : > { %481 = vst.msk [vmem:[%s1481_s26 + $0x4] sm:$0xf] %vm479_vm0, %v1153_v0  ;;  %v503_v28 = vmul.f32 %v470_v9, %v1407_v8  ;;  %v1157_v29 = vpack.c.bf16 %v513_v12, %v513_v12  ;;  %v540_v30 = vmul.f32 %v1399_v5, %v514_v55  ;;  %v546_v31 = vmul.f32 %v1399_v5, %v512_v53 }
  0x4b   : > { %491 = vst.msk [vmem:[%s1486_s21 + $0x4] sm:$0xf] %vm479_vm0, %v1155_v24  ;;  %v497_v33 = vadd.f32 %v495_v25, %v493_v1  ;;  %v539_v34 = vmul.f32 %v1417_v13, %v513_v12  ;;  %v548_v11 = vmul.f32 %v1392_v2, %v514_v55  ;;  %v515_v35 = vmul.f32 %v1494_v59, %v1420_v14 }
  0x4c   : > { %1086 = vst.msk [vmem:[%s1481_s26 + $0xc] sm:$0xf] %vm479_vm0, %v1157_v29  ;;  %v542_v8 = vadd.f32 %v540_v30, %v538_v19  ;;  %v547_v36 = vmul.f32 %v1420_v14, %v513_v12  ;;  %v1160_v38 = vpack.c.bf16 %v558_v56, %v558_v56  ;;  %v584_v5 = vmul.f32 %v1404_v7, %v558_v56 }
  0x4d   : > { %v550_v39 = vsub.f32 %v546_v31, %v548_v11  ;;  %v1159_v40 = vpack.c.bf16 %v515_v35, %v515_v35  ;;  %v541_v41 = vmul.f32 %v1420_v14, %v515_v35  ;;  %v549_v42 = vmul.f32 %v1417_v13, %v515_v35 }
  0x4e   : > { %v505_v2 = vsub.f32 %v501_v18, %v503_v28  ;;  %1097 = vst.msk [vmem:[%s1481_s26 + $0x10] sm:$0xf] %vm479_vm0, %v1160_v38  ;;  %v559_v43 = vmul.f32 %v1494_v59, %v1432_v20  ;;  %v1162_v44 = vpack.c.bf16 %v560_v57, %v560_v57  ;;  %v586_v45 = vmul.f32 %v1423_v15, %v560_v57 }
  0x4f   : > { %v544_v46 = vadd.f32 %v542_v8, %v496_v22  ;;  %1090 = vst.msk [vmem:[%s1486_s21 + $0xc] sm:$0xf] %vm479_vm0, %v1159_v40  ;;  %v543_v47 = vadd.f32 %v541_v41, %v539_v34  ;;  %v551_v48 = vsub.f32 %v547_v36, %v549_v42  ;;  %v592_v14 = vmul.f32 %v1423_v15, %v558_v56 }
  0x50   : > { %v552_v13 = vadd.f32 %v550_v39, %v504_v23  ;;  %v1161_v51 = vpack.c.bf16 %v559_v43, %v559_v43  ;;  %1101 = vst.msk [vmem:[%s1486_s21 + $0x10] sm:$0xf] %vm479_vm0, %v1162_v44  ;;  %v588_v52 = vadd.f32 %v586_v45, %v584_v5  ;;  %v594_v53 = vmul.f32 %v1404_v7, %v560_v57 }
  0x51   : > { %v545_v55 = vadd.f32 %v543_v47, %v497_v33  ;;  %v585_v60 = vmul.f32 %v1432_v20, %v559_v43  ;;  %v561_v61 = vmul.f32 %v1494_v59, %v1442_v26  ;;  %v593_v15 = vmul.f32 %v1442_v26, %v559_v43 }
  0x52   : > { %v553_v56 = vadd.f32 %v551_v48, %v505_v2  ;;  %1098 = vst.msk [vmem:[%s1481_s26 + $0x14] sm:$0xf] %vm479_vm0, %v1161_v51  ;;  %v596_v62 = vsub.f32 %v592_v14, %v594_v53  ;;  %v1164_v63 = vpack.c.bf16 %v1492_v58, %v1492_v58  ;;  %v630_v7 = vmul.f32 %v1435_v21, %v1492_v58 }
  0x53   : > { %v1163_v57 = vpack.c.bf16 %v561_v61, %v561_v61  ;;  %v587_v3 = vmul.f32 %v1442_v26, %v561_v61  ;;  %v595_v4 = vmul.f32 %v1432_v20, %v561_v61  ;;  %v605_v6 = vmul.f32 %v1494_v59, %v1452_v32  ;;  %v1600_v35 = vld [vmem:[%s1481_s26 + $0x8] sm:$0xff]  }
  0x54   : > { %v590_v9 = vadd.f32 %v588_v52, %v544_v46  ;;  %1109 = vst.msk [vmem:[%s1481_s26 + $0x18] sm:$0xf] %vm479_vm0, %v1164_v63  ;;  %v1166_v10 = vpack.c.bf16 %v1511_v17, %v1511_v17  ;;  %v632_v12 = vmul.f32 %v1445_v27, %v1511_v17  ;;  %v638_v26 = vmul.f32 %v1445_v27, %v1492_v58  ;;  %v1587_v27 = vld [vmem:[%s1481_s26] sm:$0xff]  }
  0x55   : > { %v598_v20 = vadd.f32 %v596_v62, %v552_v13  ;;  %1102 = vst.msk [vmem:[%s1486_s21 + $0x14] sm:$0xf] %vm479_vm0, %v1163_v57  ;;  %v589_v16 = vadd.f32 %v587_v3, %v585_v60  ;;  %v597_v0 = vsub.f32 %v593_v15, %v595_v4  ;;  %v1165_v1 = vpack.c.bf16 %v605_v6, %v605_v6 }
  0x56   : > { %v631_v18 = vmul.f32 %v1452_v32, %v605_v6  ;;  %1113 = vst.msk [vmem:[%s1486_s21 + $0x18] sm:$0xf] %vm479_vm0, %v1166_v10  ;;  %v634_v19 = vadd.f32 %v632_v12, %v630_v7  ;;  %v640_v22 = vmul.f32 %v1435_v21, %v1511_v17  ;;  %v607_v23 = vmul.f32 %v1494_v59, %v1459_v37  ;;  %v1173_v17 = vld [vmem:[%s1486_s21] sm:$0xff]  }
  0x57   : > { %v591_v58 = vadd.f32 %v589_v16, %v545_v55  ;;  %1110 = vst.msk [vmem:[%s1481_s26 + $0x1c] sm:$0xf] %vm479_vm0, %v1165_v1  ;;  %v661_v24 = vstv %s1546_s29  ;;  %v665_v25 = vstv %s1548_s30  ;;  %v639_v28 = vmul.f32 %v1459_v37, %v605_v6 }
  0x58   : > { %v636_v29 = vadd.f32 %v634_v19, %v590_v9  ;;  %v642_v30 = vsub.f32 %v638_v26, %v640_v22  ;;  %v1167_v31 = vpack.c.bf16 %v607_v23, %v607_v23  ;;  %v633_v21 = vmul.f32 %v1459_v37, %v607_v23  ;;  %v1201_v37 = vld [vmem:[%s1486_s21 + $0x8] sm:$0xff]  }
  0x59   : > { %v599_v59 = vadd.f32 %v597_v0, %v553_v56  ;;  %v671_v33 = vstv %s1557_s7  ;;  %v641_v34 = vmul.f32 %v1452_v32, %v607_v23  ;;  %v1170_v11 = vunpack.c.l.bf16 %v1587_v27  ;;  %v1612_v45 = vld [vmem:[%s1481_s26 + $0x10] sm:$0xff]  }
  0x5a   : > { %v644_v8 = vadd.f32 %v642_v30, %v598_v20  ;;  %v648_v36 = vmul.f32 %v647_v49, %v636_v29  ;;  %v662_v38 = vmul.f32 %v661_v24, %v636_v29  ;;  %1114 = vst.msk [vmem:[%s1486_s21 + $0x1c] sm:$0xf] %vm479_vm0, %v1167_v31  ;;  %v635_v5 = vadd.f32 %v633_v21, %v631_v18 }
  0x5b   : > { %v643_v39 = vsub.f32 %v639_v28, %v641_v34  ;;  %v1174_v40 = vunpack.c.l.bf16 %v1173_v17  ;;  %v1171_v32 = vunpack.c.h.bf16 %v1587_v27  ;;  %v1175_v41 = vunpack.c.h.bf16 %v1173_v17 }
  0x5c   : > { %v652_v42 = vmul.f32 %v651_v50, %v644_v8  ;;  %v666_v2 = vmul.f32 %v665_v25, %v644_v8  ;;  %v637_v43 = vadd.f32 %v635_v5, %v591_v58  ;;  %v1178_v44 = vunpack.c.l.bf16 %v1600_v35  ;;  %v1615_v46 = vld [vmem:[%s1486_s21 + $0x10] sm:$0xff]  }
  0x5d   : > { %v645_v47 = vadd.f32 %v643_v39, %v599_v59  ;;  %v1182_v48 = vunpack.c.l.bf16 %v1201_v37  ;;  %v1179_v14 = vunpack.c.h.bf16 %v1600_v35  ;;  %v1183_v13 = vunpack.c.h.bf16 %v1201_v37 }
  0x5e   : > { %v654_v51 = vadd.f32 %v652_v42, %v648_v36  ;;  %v668_v52 = vadd.f32 %v666_v2, %v662_v38  ;;  %v649_v53 = vmul.f32 %v647_v49, %v637_v43  ;;  %v663_v55 = vmul.f32 %v661_v24, %v637_v43  ;;  %v1621_v60 = vld [vmem:[%s1481_s26 + $0x18] sm:$0xff]  }
  0x5f   : > { %v653_v61 = vmul.f32 %v651_v50, %v645_v47  ;;  %v667_v15 = vmul.f32 %v665_v25, %v645_v47  ;;  %v1186_v56 = vunpack.c.l.bf16 %v1612_v45  ;;  %v1190_v62 = vunpack.c.l.bf16 %v1615_v46 }
  0x60   : > { %v1629_v63 = vadd.f32 %v657_v54, %v654_v51  ;;  %v1631_v7 = vadd.f32 %v671_v33, %v668_v52  ;;  %v1187_v49 = vunpack.c.h.bf16 %v1612_v45  ;;  %v1191_v57 = vunpack.c.h.bf16 %v1615_v46 }
  0x61   : > { %v655_v3 = vadd.f32 %v653_v61, %v649_v53  ;;  %v669_v4 = vadd.f32 %v667_v15, %v663_v55  ;;  %v1194_v50 = vunpack.c.l.bf16 %v1621_v60  ;;  %v1195_v6 = vunpack.c.h.bf16 %v1621_v60 }
  0x62   : > { %v682_v9 = vmul.f32 %v1170_v11, %v1629_v63  ;;  %v684_v10 = vmul.f32 %v1174_v40, %v1631_v7  ;;  %v691_v12 = vmul.f32 %v1174_v40, %v1629_v63  ;;  %v693_v26 = vmul.f32 %v1170_v11, %v1631_v7 }
  0x63   : > { %v659_v20 = vadd.f32 %v657_v54, %v655_v3  ;;  %v673_v16 = vadd.f32 %v671_v33, %v669_v4  ;;  %v707_v0 = vmul.f32 %v1178_v44, %v1629_v63  ;;  %v709_v1 = vmul.f32 %v1182_v48, %v1631_v7  ;;  %v1205_v33 = vld [vmem:[%s1486_s21 + $0x18] sm:$0xff]  }
  0x64   : > { %v686_v18 = vsub.f32 %v682_v9, %v684_v10  ;;  %v695_v19 = vadd.f32 %v693_v26, %v691_v12  ;;  %v716_v54 = vmul.f32 %v1182_v48, %v1629_v63  ;;  %v718_v22 = vmul.f32 %v1178_v44, %v1631_v7 }
  0x65   : > { %v683_v23 = vmul.f32 %v1171_v32, %v659_v20  ;;  %v685_v27 = vmul.f32 %v1175_v41, %v673_v16  ;;  %v692_v58 = vmul.f32 %v1175_v41, %v659_v20  ;;  %v694_v24 = vmul.f32 %v1171_v32, %v673_v16 }
  0x66   : > { %689 = vst.msk [vmem:[%s1647_s11] sm:$0xff] %vm688_vm1, %v686_v18  ;;  %697 = vst.msk [vmem:[%s1653_s14] sm:$0xff] %vm688_vm1, %v695_v19  ;;  %v711_v25 = vsub.f32 %v707_v0, %v709_v1  ;;  %v708_v28 = vmul.f32 %v1179_v14, %v659_v20  ;;  %v710_v29 = vmul.f32 %v1183_v13, %v673_v16  ;;  %v1198_v41 = vunpack.c.l.bf16 %v1205_v33 }
  0x67   : > { %v720_v30 = vadd.f32 %v718_v22, %v716_v54  ;;  %v687_v31 = vsub.f32 %v683_v23, %v685_v27  ;;  %v696_v21 = vadd.f32 %v694_v24, %v692_v58  ;;  %v717_v17 = vmul.f32 %v1183_v13, %v659_v20 }
  0x68   : > { %v719_v59 = vmul.f32 %v1179_v14, %v673_v16  ;;  %1124 = vst.msk [vmem:[%s1647_s11 + $0x10] sm:$0xff] %vm688_vm1, %v711_v25  ;;  %v712_v34 = vsub.f32 %v708_v28, %v710_v29  ;;  %v733_v11 = vmul.f32 %v1186_v56, %v1629_v63  ;;  %v735_v35 = vmul.f32 %v1190_v62, %v1631_v7 }
  0x69   : > { %1126 = vst.msk [vmem:[%s1653_s14 + $0x10] sm:$0xff] %vm688_vm1, %v720_v30  ;;  %v734_v8 = vmul.f32 %v1187_v49, %v659_v20  ;;  %690 = vst.msk [vmem:[%s1647_s11 + $0x8] sm:$0xff] %vm688_vm1, %v687_v31  ;;  %v736_v38 = vmul.f32 %v1191_v57, %v673_v16  ;;  %v742_v5 = vmul.f32 %v1190_v62, %v1629_v63  ;;  %v1199_v44 = vunpack.c.h.bf16 %v1205_v33 }
  0x6a   : > { %698 = vst.msk [vmem:[%s1653_s14 + $0x8] sm:$0xff] %vm688_vm1, %v696_v21  ;;  %v721_v36 = vadd.f32 %v719_v59, %v717_v17  ;;  %v744_v37 = vmul.f32 %v1186_v56, %v1631_v7  ;;  %1125 = vst.msk [vmem:[%s1647_s11 + $0x18] sm:$0xff] %vm688_vm1, %v712_v34  ;;  %v737_v39 = vsub.f32 %v733_v11, %v735_v35 }
  0x6b   : > { %v743_v40 = vmul.f32 %v1191_v57, %v659_v20  ;;  %v745_v32 = vmul.f32 %v1187_v49, %v673_v16  ;;  %v738_v42 = vsub.f32 %v734_v8, %v736_v38  ;;  %v759_v43 = vmul.f32 %v1194_v50, %v1629_v63 }
  0x6c   : > { %1127 = vst.msk [vmem:[%s1653_s14 + $0x18] sm:$0xff] %vm688_vm1, %v721_v36  ;;  %v746_v2 = vadd.f32 %v744_v37, %v742_v5  ;;  %1132 = vst.msk [vmem:[%s1647_s11 + $0x20] sm:$0xff] %vm688_vm1, %v737_v39  ;;  %v761_v46 = vmul.f32 %v1198_v41, %v1631_v7  ;;  %v760_v47 = vmul.f32 %v1195_v6, %v659_v20 }
  0x6d   : > { %v747_v45 = vadd.f32 %v745_v32, %v743_v40  ;;  %v768_v48 = vmul.f32 %v1198_v41, %v1629_v63  ;;  %1133 = vst.msk [vmem:[%s1647_s11 + $0x28] sm:$0xff] %vm688_vm1, %v738_v42  ;;  %v762_v14 = vmul.f32 %v1199_v44, %v673_v16  ;;  %v770_v13 = vmul.f32 %v1194_v50, %v1631_v7 }
  0x6e   : > { %1134 = vst.msk [vmem:[%s1653_s14 + $0x20] sm:$0xff] %vm688_vm1, %v746_v2  ;;  %v769_v51 = vmul.f32 %v1199_v44, %v659_v20  ;;  %v771_v52 = vmul.f32 %v1195_v6, %v673_v16  ;;  %v763_v53 = vsub.f32 %v759_v43, %v761_v46 }
  0x6f   : > { %1135 = vst.msk [vmem:[%s1653_s14 + $0x28] sm:$0xff] %vm688_vm1, %v747_v45  ;;  %v764_v55 = vsub.f32 %v760_v47, %v762_v14  ;;  %v772_v60 = vadd.f32 %v770_v13, %v768_v48 }
  0x70   : > { %v773_v61 = vadd.f32 %v771_v52, %v769_v51  ;;  %1140 = vst.msk [vmem:[%s1647_s11 + $0x30] sm:$0xff] %vm688_vm1, %v763_v53 }
  0x71   : > { %1141 = vst.msk [vmem:[%s1647_s11 + $0x38] sm:$0xff] %vm688_vm1, %v764_v55  ;;  %1142 = vst.msk [vmem:[%s1653_s14 + $0x30] sm:$0xff] %vm688_vm1, %v772_v60 }
  0x72   : > { %1143 = vst.msk [vmem:[%s1653_s14 + $0x38] sm:$0xff] %vm688_vm1, %v773_v61 }
  0x73 PF: > { %s18_s23 = sadd.s32 1, %s1286_s23   ;;  %s1718_s21 = smov %s1282_s22 }
  0x74   : > { %p15_p2 = scmp.ge.s32.totalorder %s18_s23, 4   ;;  %s1719_s22 = smov %s1721_s25 }
  0x76   :  { %17 = sbr.rel (!%p15_p2) target bundleno = 2 (0x2), region = 124 }
  0x7d   :  { %882 = vsyncpa [#allocation3], 1 }
  0x7e   :  { %884 = vsyncpa [#allocation3 + $0x1], 1 }

// kernel: mamba_varnet_forward.8
= control target key start
LH: loop header
LB: loop body
LE: loop exit
PB: predicated region body
PF: predicated region fallthrough
CT: control target
= control target key end

     0   :  { %s755_s18 = smov 0   ;;  %s757_s19 = smov 0   ;;  %s874_s0 = inlined_call_operand.vmem [shape: f32[2,4,16,16], index: 0, kind: input, shape index: {}]   ;;  %s875_s1 = inlined_call_operand.vmem [shape: f32[2,4,16,16], index: 1, kind: input, shape index: {}]   ;;  %s876_s2 = inlined_call_operand.vmem [shape: f32[2,4,16,16], index: 2, kind: input, shape index: {}]   ;;  %s877_s3 = inlined_call_operand.vmem [shape: f32[2,4,16,16], index: 3, kind: input, shape index: {}]   ;;  %s878_s4 = inlined_call_operand.vmem [shape: f32[2,4,16,16], index: 4, kind: output, shape index: {0}]   ;;  %s879_s5 = inlined_call_operand.vmem [shape: f32[2,4,16,16], index: 5, kind: output, shape index: {1}]  }
   0x1   :  { %s759_s20 = smov 0  }
   0x2 LB: > { %s28_s21 = sadd.s32 1, %s719_s19  ;;  %p656_p0 = scmp.ge.s32.totalorder %s723_s20, 1  ;;  %s723_s20 = sphi %s759_s20, %s16_s20   ;;  %s719_s19 = sphi %s757_s19, %s881_s19   ;;  %s715_s18 = sphi %s755_s18, %s880_s18  }
   0x3   : > { %p30_p1 = scmp.ge.s32.totalorder %s28_s21, 2  ;;  %p264_p2 = scmp.lt.s32.totalorder %s723_s20, 3 }
   0x5   : > { %s883_s21 = smov (%p30_p1, %s28_s21), 0  ;;  %p265_p3 = pnand %p656_p0, %p264_p2 }
   0x6   : > { %p337_p4 = scmp.lt.s32.totalorder (!%p265_p3), %s715_s18, 1  ;;  %vm420_vm0 = vcmask (!%p265_p3), 130048  }
   0x7   : > { %268 = sbr.rel (%p265_p3) target bundleno = 33 (0x21), region = 36 }
   0xe   : > { %s885_s18 = smov (!%p337_p4, %s715_s18), 1 }
   0xf   : > { %s773_s22 = sshll.u32 %s885_s18, 6 }
  0x10   : > { %s344_s25 = scalar_lea.vmem %s874_s0, %s773_s22  ;;  %s783_s28 = scalar_lea.vmem %s876_s2, %s773_s22 }
  0x11   : > { %s789_s6 = scalar_lea.vmem %s878_s4, %s773_s22  ;;  %v396_v0 = vld [vmem:[%s344_s25] sm:$0xff]  ;;  %v397_v2 = vld [vmem:[%s344_s25 + $0x8] sm:$0xff]  ;;  %v398_v5 = vld [vmem:[%s344_s25 + $0x10] sm:$0xff]  ;;  %s799_s9 = scalar_lea.vmem %s875_s1, %s773_s22 }
  0x12   : > { %v404_v1 = vld [vmem:[%s783_s28] sm:$0xff]  ;;  %v405_v4 = vld [vmem:[%s783_s28 + $0x8] sm:$0xff]  ;;  %v406_v6 = vld [vmem:[%s783_s28 + $0x10] sm:$0xff]  ;;  %s805_s12 = scalar_lea.vmem %s877_s3, %s773_s22  ;;  %s823_s15 = scalar_lea.vmem %s879_s5, %s773_s22 }
  0x13   : > { %v412_v3 = vsub.f32 %v396_v0, %v404_v1  ;;  %v413_v7 = vsub.f32 %v397_v2, %v405_v4  ;;  %v414_v8 = vsub.f32 %v398_v5, %v406_v6  ;;  %v399_v9 = vld [vmem:[%s344_s25 + $0x18] sm:$0xff]  ;;  %v400_v11 = vld [vmem:[%s344_s25 + $0x20] sm:$0xff]  ;;  %v401_v14 = vld [vmem:[%s344_s25 + $0x28] sm:$0xff] }
  0x14   : > { %v407_v10 = vld [vmem:[%s783_s28 + $0x18] sm:$0xff]  ;;  %v408_v13 = vld [vmem:[%s783_s28 + $0x20] sm:$0xff]  ;;  %v409_v15 = vld [vmem:[%s783_s28 + $0x28] sm:$0xff] }
  0x15   : > { %421 = vst.msk [vmem:[%s789_s6] sm:$0xff] %vm420_vm0, %v412_v3  ;;  %v415_v12 = vsub.f32 %v399_v9, %v407_v10  ;;  %422 = vst.msk [vmem:[%s789_s6 + $0x8] sm:$0xff] %vm420_vm0, %v413_v7  ;;  %v416_v16 = vsub.f32 %v400_v11, %v408_v13  ;;  %v417_v17 = vsub.f32 %v401_v14, %v409_v15  ;;  %v402_v18 = vld [vmem:[%s344_s25 + $0x30] sm:$0xff]  ;;  %v403_v20 = vld [vmem:[%s344_s25 + $0x38] sm:$0xff] }
  0x16   : > { %423 = vst.msk [vmem:[%s789_s6 + $0x10] sm:$0xff] %vm420_vm0, %v414_v8  ;;  %v410_v19 = vld [vmem:[%s783_s28 + $0x30] sm:$0xff]  ;;  %v411_v22 = vld [vmem:[%s783_s28 + $0x38] sm:$0xff]  ;;  %v429_v23 = vld [vmem:[%s799_s9] sm:$0xff] }
  0x17   : > { %424 = vst.msk [vmem:[%s789_s6 + $0x18] sm:$0xff] %vm420_vm0, %v415_v12  ;;  %v418_v21 = vsub.f32 %v402_v18, %v410_v19  ;;  %v437_v24 = vld [vmem:[%s805_s12] sm:$0xff]  ;;  %425 = vst.msk [vmem:[%s789_s6 + $0x20] sm:$0xff] %vm420_vm0, %v416_v16  ;;  %v419_v25 = vsub.f32 %v403_v20, %v411_v22  ;;  %v430_v27 = vld [vmem:[%s799_s9 + $0x8] sm:$0xff] }
  0x18   : > { %426 = vst.msk [vmem:[%s789_s6 + $0x28] sm:$0xff] %vm420_vm0, %v417_v17  ;;  %v445_v26 = vsub.f32 %v429_v23, %v437_v24  ;;  %v438_v28 = vld [vmem:[%s805_s12 + $0x8] sm:$0xff]  ;;  %v431_v29 = vld [vmem:[%s799_s9 + $0x10] sm:$0xff]  ;;  %v432_v32 = vld [vmem:[%s799_s9 + $0x18] sm:$0xff] }
  0x19   : > { %427 = vst.msk [vmem:[%s789_s6 + $0x30] sm:$0xff] %vm420_vm0, %v418_v21  ;;  %v446_v30 = vsub.f32 %v430_v27, %v438_v28  ;;  %v439_v31 = vld [vmem:[%s805_s12 + $0x10] sm:$0xff]  ;;  %v440_v33 = vld [vmem:[%s805_s12 + $0x18] sm:$0xff]  ;;  %428 = vst.msk [vmem:[%s789_s6 + $0x38] sm:$0xff] %vm420_vm0, %v419_v25 }
  0x1a   : > { %453 = vst.msk [vmem:[%s823_s15] sm:$0xff] %vm420_vm0, %v445_v26  ;;  %v447_v34 = vsub.f32 %v431_v29, %v439_v31  ;;  %v448_v35 = vsub.f32 %v432_v32, %v440_v33  ;;  %v433_v36 = vld [vmem:[%s799_s9 + $0x20] sm:$0xff]  ;;  %v434_v38 = vld [vmem:[%s799_s9 + $0x28] sm:$0xff]  ;;  %v435_v41 = vld [vmem:[%s799_s9 + $0x30] sm:$0xff] }
  0x1b   : > { %v441_v37 = vld [vmem:[%s805_s12 + $0x20] sm:$0xff]  ;;  %454 = vst.msk [vmem:[%s823_s15 + $0x8] sm:$0xff] %vm420_vm0, %v446_v30  ;;  %v442_v40 = vld [vmem:[%s805_s12 + $0x28] sm:$0xff]  ;;  %v443_v42 = vld [vmem:[%s805_s12 + $0x30] sm:$0xff] }
  0x1c   : > { %v449_v39 = vsub.f32 %v433_v36, %v441_v37  ;;  %455 = vst.msk [vmem:[%s823_s15 + $0x10] sm:$0xff] %vm420_vm0, %v447_v34  ;;  %456 = vst.msk [vmem:[%s823_s15 + $0x18] sm:$0xff] %vm420_vm0, %v448_v35  ;;  %v450_v43 = vsub.f32 %v434_v38, %v442_v40  ;;  %v451_v44 = vsub.f32 %v435_v41, %v443_v42  ;;  %v436_v45 = vld [vmem:[%s799_s9 + $0x38] sm:$0xff] }
  0x1d   : > { %v444_v46 = vld [vmem:[%s805_s12 + $0x38] sm:$0xff] }
  0x1e   : > { %457 = vst.msk [vmem:[%s823_s15 + $0x20] sm:$0xff] %vm420_vm0, %v449_v39  ;;  %v452_v47 = vsub.f32 %v436_v45, %v444_v46  ;;  %458 = vst.msk [vmem:[%s823_s15 + $0x28] sm:$0xff] %vm420_vm0, %v450_v43 }
  0x1f   : > { %459 = vst.msk [vmem:[%s823_s15 + $0x30] sm:$0xff] %vm420_vm0, %v451_v44 }
  0x20   : > { %460 = vst.msk [vmem:[%s823_s15 + $0x38] sm:$0xff] %vm420_vm0, %v452_v47 }
  0x21 PF: > { %s16_s20 = sadd.s32 1, %s723_s20   ;;  %s880_s18 = smov %s719_s19 }
  0x22   : > { %p13_p5 = scmp.ge.s32.totalorder %s16_s20, 4   ;;  %s881_s19 = smov %s883_s21 }
  0x24   :  { %15 = sbr.rel (!%p13_p5) target bundleno = 2 (0x2), region = 87 }

// kernel: mamba_varnet_forward.9
= control target key start
LH: loop header
LB: loop body
LE: loop exit
PB: predicated region body
PF: predicated region fallthrough
CT: control target
= control target key end

     0   :  { %12 = vsyncpa [#allocation3], 0  ;;  %s1145_s21 = smov 0   ;;  %s1147_s22 = smov 0   ;;  %s1434_s0 = inlined_call_operand.vmem [shape: f32[6], index: 0, kind: input, shape index: {}]   ;;  %s1435_s1 = inlined_call_operand.vmem [shape: f32[2,4,16,16], index: 1, kind: input, shape index: {}]   ;;  %s1436_s2 = inlined_call_operand.vmem [shape: f32[2,4,16,16], index: 2, kind: input, shape index: {}]   ;;  %s1437_s3 = inlined_call_operand.vmem [shape: bf16[2,4,16,16], index: 3, kind: input, shape index: {}]   ;;  %s1438_s4 = inlined_call_operand.vmem [shape: bf16[2,4,16,16], index: 4, kind: input, shape index: {}]   ;;  %s1439_s5 = inlined_call_operand.vmem [shape: f32[2,4,16,16], index: 5, kind: output, shape index: {0}]   ;;  %s1440_s6 = inlined_call_operand.vmem [shape: f32[2,4,16,16], index: 6, kind: output, shape index: {1}]  }
   0x1   :  { %s1149_s23 = smov 0  }
   0x2 LB: > { %s883_s24 = sadd.s32 4294967295, %s1107_s23   ;;  %s30_s25 = sadd.s32 1, %s1103_s22  ;;  %s1107_s23 = sphi %s1149_s23, %s18_s23   ;;  %s1103_s22 = sphi %s1147_s22, %s1444_s22   ;;  %s1099_s21 = sphi %s1145_s21, %s1443_s21  }
   0x3   : > { %p32_p0 = scmp.ge.s32.totalorder %s30_s25, 2  ;;  %p885_p1 = scmp.ge.s32.totalorder %s1107_s23, 1 }
   0x4   : > { %p224_p2 = scmp.lt.s32.totalorder %s1107_s23, 3  ;;  %p1170_p4 = scmp.eq.s32.totalorder %s883_s24, 0 }
   0x5   : > { %s1446_s25 = smov (%p32_p0, %s30_s25), 0  ;;  %s237_s30 = sshll.u32 %s1434_s0, 4  ;;  %s238_s30 = int_to_ptr.vmem [resolvable:$true] %s237_s30 }
   0x6   : > { %p1166_p3 = pnand %p885_p1, %p224_p2  ;;  %s1066_s7 = scalar_lea.vmem %s238_s30, 16 }
   0x7   : > { %p1067_p7 = scmp.ne.s32.totalorder %s238_s30, %s1066_s7  ;;  %p1074_p11 = scmp.lt.s32.totalorder %s238_s30, %s238_s30 }
   0x8   : > { %p1035_p5 = pneg %p1166_p3  ;;  %p1075_p12 = scmp.lt.s32.totalorder %s1066_s7, %s1066_s7 }
   0xa   : > { %p1036_p6 = pnand %p1170_p4, %p1035_p5  ;;  %p1076_p13 = por %p1075_p12, %p1074_p11 }
   0xc   : > { %p1068_p8 = pneg %p1036_p6 }
   0xe   : > { %p1069_p9 = pnand %p1068_p8, %p1067_p7 }
  0x10   : > { %p1070_p10 = pneg %p1069_p9 }
  0x12   : > { %p1077_p0 = pnand %p1076_p13, %p1070_p10 }
  0x14   : > { %1080 = shalt.err (!%p1077_p0)
}
  0x15   : > { %s1109_s8 = smov [#allocation2]   ;;  %302 = sbr.rel (%p1166_p3) target bundleno = 80 (0x50), region = 40 }
  0x16   : > { %1038 = dma.vmem_to_smem (!%p1036_p6), %s238_s30, 16, %s1109_s8, [#allocation3]  }
  0x1c   : > { %1094 = dma.done.wait (%p1170_p4), [#allocation3], 16  }
  0x1d   : > { %1096 = vsyncadd (%p1170_p4), [#allocation3], 4294967280 }
  0x1e   : > { %308 = sfence }
  0x1f   : > { %p378_p1 = scmp.lt.s32.totalorder %s1099_s21, 1  ;;  %s1188_s9 = sld [smem:[#allocation2]]  ;;  %vm591_vm0 = vcmask 130048  }
  0x20   : > { %s1190_s10 = sld [smem:[#allocation2 + $0x1]]  ;;  %s1192_s11 = sld [smem:[#allocation2 + $0x4]] }
  0x21   : > { %s1448_s21 = smov (!%p378_p1, %s1099_s21), 1  ;;  %s1195_s12 = sld [smem:[#allocation2 + $0x2]] }
  0x22   : > { %s1197_s13 = sshll.u32 %s1448_s21, 6  ;;  %s959_s14 = sshll.u32 %s1448_s21, 5 }
  0x23   : > { %s1203_s17 = scalar_lea.vmem %s1435_s1, %s1197_s13  ;;  %s1209_s20 = scalar_lea.vmem %s1436_s2, %s1197_s13 }
  0x24   : > { %s405_s27 = scalar_lea.vmem %s1437_s3, %s959_s14  ;;  %s1217_s29 = scalar_lea.vmem %s1438_s4, %s959_s14  ;;  %v437_v0 = vld [vmem:[%s1203_s17] sm:$0xff]  ;;  %v902_v2 = vld [vmem:[%s1203_s17 + $0x10] sm:$0xff]  ;;  %v438_v46 = vld [vmem:[%s1203_s17 + $0x8] sm:$0xff] }
  0x25   : > { %v439_v1 = vld [vmem:[%s1209_s20] sm:$0xff]  ;;  %v558_v5 = vstv %s1188_s9  ;;  %v904_v9 = vld [vmem:[%s1209_s20 + $0x10] sm:$0xff]  ;;  %v1019_v10 = vld [vmem:[%s405_s27 + $0x8] sm:$0xff]   ;;  %s1242_s30 = sld [smem:[#allocation2 + $0x3]]  ;;  %s1244_s7 = sld [smem:[#allocation2 + $0x5]] }
  0x26   : > { %v964_v3 = vld [vmem:[%s405_s27] sm:$0xff]   ;;  %v562_v6 = vstv %s1190_s10  ;;  %v1020_v11 = vld [vmem:[%s1217_s29 + $0x8] sm:$0xff]   ;;  %v568_v12 = vstv %s1192_s11  ;;  %v1234_v14 = vunpack.c.l.bf16 %v1019_v10  ;;  %s1343_s15 = scalar_lea.vmem %s1439_s5, %s1197_s13  ;;  %s1351_s18 = scalar_lea.vmem %s1440_s6, %s1197_s13 }
  0x27   : > { %v968_v4 = vld [vmem:[%s1217_s29] sm:$0xff]   ;;  %v1225_v7 = vunpack.c.l.bf16 %v964_v3  ;;  %v1232_v13 = vunpack.c.h.bf16 %v964_v3  ;;  %v1236_v15 = vunpack.c.l.bf16 %v1020_v11  ;;  %v1021_v16 = vld [vmem:[%s405_s27 + $0x10] sm:$0xff]   ;;  %v572_v18 = vstv %s1195_s12  ;;  %v1252_v24 = vld [vmem:[%s405_s27 + $0x18] sm:$0xff]  }
  0x28   : > { %v1227_v8 = vunpack.c.l.bf16 %v968_v4  ;;  %v1239_v17 = vld [vmem:[%s1217_s29 + $0x10] sm:$0xff]   ;;  %v1246_v19 = vunpack.c.h.bf16 %v968_v4  ;;  %v477_v25 = vmul.f32 %v1234_v14, %v902_v2  ;;  %v483_v27 = vmul.f32 %v1234_v14, %v904_v9  ;;  %v910_v29 = vld [vmem:[%s1203_s17 + $0x20] sm:$0xff]  ;;  %v1261_v31 = vld [vmem:[%s1217_s29 + $0x18] sm:$0xff]  }
  0x29   : > { %v449_v20 = vmul.f32 %v1225_v7, %v437_v0  ;;  %v455_v22 = vmul.f32 %v1225_v7, %v439_v1  ;;  %v479_v26 = vmul.f32 %v1236_v15, %v904_v9  ;;  %v485_v28 = vmul.f32 %v1236_v15, %v902_v2  ;;  %v912_v30 = vld [vmem:[%s1209_s20 + $0x20] sm:$0xff]  ;;  %v918_v36 = vld [vmem:[%s1203_s17 + $0x30] sm:$0xff]  ;;  %v440_v51 = vld [vmem:[%s1209_s20 + $0x8] sm:$0xff] }
  0x2a   : > { %v451_v21 = vmul.f32 %v1227_v8, %v439_v1  ;;  %v457_v23 = vmul.f32 %v1227_v8, %v437_v0  ;;  %v1263_v34 = vunpack.c.l.bf16 %v1021_v16  ;;  %v1266_v35 = vunpack.c.l.bf16 %v1239_v17  ;;  %v920_v37 = vld [vmem:[%s1209_s20 + $0x30] sm:$0xff]  ;;  %v903_v0 = vld [vmem:[%s1203_s17 + $0x18] sm:$0xff] }
  0x2b   : > { %v481_v38 = vadd.f32 %v479_v26, %v477_v25  ;;  %v487_v39 = vsub.f32 %v483_v27, %v485_v28  ;;  %v1271_v40 = vunpack.c.l.bf16 %v1252_v24  ;;  %v1274_v41 = vunpack.c.l.bf16 %v1261_v31  ;;  %v905_v1 = vld [vmem:[%s1209_s20 + $0x18] sm:$0xff] }
  0x2c   : > { %v453_v32 = vadd.f32 %v451_v21, %v449_v20  ;;  %v459_v33 = vsub.f32 %v455_v22, %v457_v23  ;;  %v509_v42 = vmul.f32 %v1263_v34, %v910_v29  ;;  %v511_v43 = vmul.f32 %v1266_v35, %v912_v30  ;;  %v911_v23 = vld [vmem:[%s1203_s17 + $0x28] sm:$0xff] }
  0x2d   : > { %v515_v44 = vmul.f32 %v1263_v34, %v912_v30  ;;  %v517_v45 = vmul.f32 %v1266_v35, %v910_v29  ;;  %v541_v49 = vmul.f32 %v1271_v40, %v918_v36  ;;  %v543_v50 = vmul.f32 %v1274_v41, %v920_v37  ;;  %v913_v29 = vld [vmem:[%s1209_s20 + $0x28] sm:$0xff] }
  0x2e   : > { %v489_v47 = vadd.f32 %v481_v38, %v453_v32  ;;  %v491_v48 = vadd.f32 %v487_v39, %v459_v33  ;;  %v513_v52 = vadd.f32 %v511_v43, %v509_v42  ;;  %v547_v54 = vmul.f32 %v1271_v40, %v920_v37  ;;  %v919_v39 = vld [vmem:[%s1203_s17 + $0x38] sm:$0xff] }
  0x2f   : > { %v519_v53 = vsub.f32 %v515_v44, %v517_v45  ;;  %v549_v55 = vmul.f32 %v1274_v41, %v918_v36  ;;  %v545_v56 = vadd.f32 %v543_v50, %v541_v49  ;;  %v576_v57 = vstv %s1242_s30  ;;  %v921_v45 = vld [vmem:[%s1209_s20 + $0x38] sm:$0xff] }
  0x30   : > { %v582_v58 = vstv %s1244_s7  ;;  %v450_v59 = vmul.f32 %v1232_v13, %v438_v46  ;;  %v521_v60 = vadd.f32 %v513_v52, %v489_v47  ;;  %v452_v63 = vmul.f32 %v1246_v19, %v440_v51 }
  0x31   : > { %v523_v61 = vadd.f32 %v519_v53, %v491_v48  ;;  %v551_v62 = vsub.f32 %v547_v54, %v549_v55  ;;  %v456_v2 = vmul.f32 %v1232_v13, %v440_v51  ;;  %v458_v3 = vmul.f32 %v1246_v19, %v438_v46 }
  0x32   : > { %v1294_v4 = vunpack.c.h.bf16 %v1019_v10  ;;  %v1296_v9 = vunpack.c.h.bf16 %v1020_v11  ;;  %v553_v20 = vadd.f32 %v545_v56, %v521_v60  ;;  %v454_v22 = vadd.f32 %v452_v63, %v450_v59 }
  0x33   : > { %v555_v21 = vadd.f32 %v551_v62, %v523_v61  ;;  %v1299_v25 = vunpack.c.h.bf16 %v1021_v16  ;;  %v460_v26 = vsub.f32 %v456_v2, %v458_v3  ;;  %v1315_v37 = vunpack.c.h.bf16 %v1239_v17 }
  0x34   : > { %v478_v27 = vmul.f32 %v1294_v4, %v903_v0  ;;  %v480_v28 = vmul.f32 %v1296_v9, %v905_v1  ;;  %v484_v10 = vmul.f32 %v1294_v4, %v905_v1  ;;  %v559_v11 = vmul.f32 %v558_v5, %v553_v20 }
  0x35   : > { %v563_v30 = vmul.f32 %v562_v6, %v555_v21  ;;  %v573_v32 = vmul.f32 %v572_v18, %v553_v20  ;;  %v577_v16 = vmul.f32 %v576_v57, %v555_v21  ;;  %v486_v36 = vmul.f32 %v1296_v9, %v903_v0 }
  0x36   : > { %v482_v33 = vadd.f32 %v480_v28, %v478_v27  ;;  %v510_v38 = vmul.f32 %v1299_v25, %v911_v23  ;;  %v516_v44 = vmul.f32 %v1299_v25, %v913_v29  ;;  %v1322_v46 = vunpack.c.h.bf16 %v1252_v24 }
  0x37   : > { %v565_v42 = vadd.f32 %v563_v30, %v559_v11  ;;  %v579_v43 = vadd.f32 %v577_v16, %v573_v32  ;;  %v488_v47 = vsub.f32 %v484_v10, %v486_v36  ;;  %v512_v49 = vmul.f32 %v1315_v37, %v913_v29 }
  0x38   : > { %v490_v48 = vadd.f32 %v482_v33, %v454_v22  ;;  %v518_v50 = vmul.f32 %v1315_v37, %v911_v23  ;;  %v1331_v52 = vunpack.c.h.bf16 %v1261_v31  ;;  %v542_v53 = vmul.f32 %v1322_v46, %v919_v39 }
  0x39   : > { %v569_v17 = vadd.f32 %v568_v12, %v565_v42  ;;  %v583_v51 = vadd.f32 %v582_v58, %v579_v43  ;;  %v492_v54 = vadd.f32 %v488_v47, %v460_v26  ;;  %v514_v24 = vadd.f32 %v512_v49, %v510_v38 }
  0x3a   : > { %v520_v55 = vsub.f32 %v516_v44, %v518_v50  ;;  %v548_v56 = vmul.f32 %v1322_v46, %v921_v45  ;;  %v544_v61 = vmul.f32 %v1331_v52, %v921_v45  ;;  %v550_v62 = vmul.f32 %v1331_v52, %v919_v39 }
  0x3b   : > { %v585_v59 = vmul.f32 %v1225_v7, %v569_v17  ;;  %v587_v60 = vmul.f32 %v1227_v8, %v583_v51  ;;  %v522_v31 = vadd.f32 %v514_v24, %v490_v48  ;;  %v594_v0 = vmul.f32 %v1227_v8, %v569_v17 }
  0x3c   : > { %v524_v63 = vadd.f32 %v520_v55, %v492_v54  ;;  %v596_v1 = vmul.f32 %v1225_v7, %v583_v51  ;;  %v546_v3 = vadd.f32 %v544_v61, %v542_v53  ;;  %v552_v20 = vsub.f32 %v548_v56, %v550_v62 }
  0x3d   : > { %v589_v2 = vsub.f32 %v585_v59, %v587_v60  ;;  %v610_v21 = vmul.f32 %v1234_v14, %v569_v17  ;;  %v612_v23 = vmul.f32 %v1236_v15, %v583_v51  ;;  %v619_v7 = vmul.f32 %v1236_v15, %v569_v17 }
  0x3e   : > { %v598_v22 = vadd.f32 %v596_v1, %v594_v0  ;;  %v621_v8 = vmul.f32 %v1234_v14, %v583_v51  ;;  %v554_v26 = vadd.f32 %v546_v3, %v522_v31  ;;  %v556_v27 = vadd.f32 %v552_v20, %v524_v63 }
  0x3f   : > { %592 = vst.msk [vmem:[%s1343_s15] sm:$0xff] %vm591_vm0, %v589_v2  ;;  %v636_v28 = vmul.f32 %v1263_v34, %v569_v17  ;;  %v638_v10 = vmul.f32 %v1266_v35, %v583_v51  ;;  %v614_v29 = vsub.f32 %v610_v21, %v612_v23  ;;  %v645_v30 = vmul.f32 %v1266_v35, %v569_v17 }
  0x40   : > { %600 = vst.msk [vmem:[%s1351_s18] sm:$0xff] %vm591_vm0, %v598_v22  ;;  %v623_v11 = vadd.f32 %v621_v8, %v619_v7  ;;  %v647_v15 = vmul.f32 %v1263_v34, %v583_v51  ;;  %v560_v14 = vmul.f32 %v558_v5, %v554_v26  ;;  %v564_v32 = vmul.f32 %v562_v6, %v556_v27 }
  0x41   : > { %v574_v16 = vmul.f32 %v572_v18, %v554_v26  ;;  %v578_v33 = vmul.f32 %v576_v57, %v556_v27  ;;  %935 = vst.msk [vmem:[%s1343_s15 + $0x10] sm:$0xff] %vm591_vm0, %v614_v29  ;;  %v640_v35 = vsub.f32 %v636_v28, %v638_v10  ;;  %v662_v34 = vmul.f32 %v1271_v40, %v569_v17 }
  0x42   : > { %937 = vst.msk [vmem:[%s1351_s18 + $0x10] sm:$0xff] %vm591_vm0, %v623_v11  ;;  %v649_v36 = vadd.f32 %v647_v15, %v645_v30  ;;  %v664_v38 = vmul.f32 %v1274_v41, %v583_v51  ;;  %v566_v5 = vadd.f32 %v564_v32, %v560_v14  ;;  %v671_v39 = vmul.f32 %v1274_v41, %v569_v17 }
  0x43   : > { %v580_v6 = vadd.f32 %v578_v33, %v574_v16  ;;  %v673_v18 = vmul.f32 %v1271_v40, %v583_v51  ;;  %943 = vst.msk [vmem:[%s1343_s15 + $0x20] sm:$0xff] %vm591_vm0, %v640_v35 }
  0x44   : > { %945 = vst.msk [vmem:[%s1351_s18 + $0x20] sm:$0xff] %vm591_vm0, %v649_v36  ;;  %v666_v57 = vsub.f32 %v662_v34, %v664_v38  ;;  %v570_v42 = vadd.f32 %v568_v12, %v566_v5 }
  0x45   : > { %v584_v43 = vadd.f32 %v582_v58, %v580_v6  ;;  %v675_v44 = vadd.f32 %v673_v18, %v671_v39 }
  0x46   : > { %951 = vst.msk [vmem:[%s1343_s15 + $0x30] sm:$0xff] %vm591_vm0, %v666_v57  ;;  %v586_v45 = vmul.f32 %v1232_v13, %v570_v42  ;;  %v595_v41 = vmul.f32 %v1246_v19, %v570_v42  ;;  %v611_v48 = vmul.f32 %v1294_v4, %v570_v42  ;;  %v620_v58 = vmul.f32 %v1296_v9, %v570_v42 }
  0x47   : > { %v588_v47 = vmul.f32 %v1246_v19, %v584_v43  ;;  %v597_v40 = vmul.f32 %v1232_v13, %v584_v43  ;;  %953 = vst.msk [vmem:[%s1351_s18 + $0x30] sm:$0xff] %vm591_vm0, %v675_v44  ;;  %v613_v12 = vmul.f32 %v1296_v9, %v584_v43  ;;  %v622_v49 = vmul.f32 %v1294_v4, %v584_v43 }
  0x48   : > { %v637_v51 = vmul.f32 %v1299_v25, %v570_v42  ;;  %v639_v19 = vmul.f32 %v1315_v37, %v584_v43  ;;  %v646_v54 = vmul.f32 %v1315_v37, %v570_v42  ;;  %v648_v24 = vmul.f32 %v1299_v25, %v584_v43 }
  0x49   : > { %v590_v50 = vsub.f32 %v586_v45, %v588_v47  ;;  %v599_v17 = vadd.f32 %v597_v40, %v595_v41  ;;  %v615_v13 = vsub.f32 %v611_v48, %v613_v12  ;;  %v624_v53 = vadd.f32 %v622_v49, %v620_v58 }
  0x4a   : > { %v641_v4 = vsub.f32 %v637_v51, %v639_v19  ;;  %v663_v9 = vmul.f32 %v1322_v46, %v570_v42  ;;  %v665_v55 = vmul.f32 %v1331_v52, %v584_v43  ;;  %v672_v56 = vmul.f32 %v1331_v52, %v570_v42 }
  0x4b   : > { %593 = vst.msk [vmem:[%s1343_s15 + $0x8] sm:$0xff] %vm591_vm0, %v590_v50  ;;  %601 = vst.msk [vmem:[%s1351_s18 + $0x8] sm:$0xff] %vm591_vm0, %v599_v17  ;;  %v650_v37 = vadd.f32 %v648_v24, %v646_v54  ;;  %v674_v59 = vmul.f32 %v1322_v46, %v584_v43 }
  0x4c   : > { %936 = vst.msk [vmem:[%s1343_s15 + $0x18] sm:$0xff] %vm591_vm0, %v615_v13  ;;  %938 = vst.msk [vmem:[%s1351_s18 + $0x18] sm:$0xff] %vm591_vm0, %v624_v53  ;;  %v667_v25 = vsub.f32 %v663_v9, %v665_v55 }
  0x4d   : > { %944 = vst.msk [vmem:[%s1343_s15 + $0x28] sm:$0xff] %vm591_vm0, %v641_v4  ;;  %946 = vst.msk [vmem:[%s1351_s18 + $0x28] sm:$0xff] %vm591_vm0, %v650_v37  ;;  %v676_v60 = vadd.f32 %v674_v59, %v672_v56 }
  0x4e   : > { %952 = vst.msk [vmem:[%s1343_s15 + $0x38] sm:$0xff] %vm591_vm0, %v667_v25 }
  0x4f   : > { %954 = vst.msk [vmem:[%s1351_s18 + $0x38] sm:$0xff] %vm591_vm0, %v676_v60 }
  0x50 PF: > { %s18_s23 = sadd.s32 1, %s1107_s23   ;;  %s1443_s21 = smov %s1103_s22 }
  0x51   : > { %p15_p2 = scmp.ge.s32.totalorder %s18_s23, 4   ;;  %s1444_s22 = smov %s1446_s25 }
  0x53   :  { %17 = sbr.rel (!%p15_p2) target bundleno = 2 (0x2), region = 114 }
  0x5a   :  { %735 = vsyncpa [#allocation3], 1 }
  0x5b   :  { %737 = vsyncpa [#allocation3 + $0x1], 1 }

// kernel: mamba_varnet_forward.10
= control target key start
LH: loop header
LB: loop body
LE: loop exit
PB: predicated region body
PF: predicated region fallthrough
CT: control target
= control target key end

     0   :  { %s1116_s11 = smov 0   ;;  %s1118_s12 = smov 0   ;;  %s1345_s0 = inlined_call_operand.<no memory space> [shape: f32[1], index: 0, kind: input, shape index: {}]   ;;  %s1346_s1 = inlined_call_operand.vmem [shape: f32[2,1,16], index: 1, kind: input, shape index: {}]   ;;  %s1347_s2 = inlined_call_operand.vmem [shape: f32[2,4,16,16], index: 2, kind: input, shape index: {}]   ;;  %s1348_s3 = inlined_call_operand.vmem [shape: f32[2,4,16,16], index: 3, kind: input, shape index: {}]   ;;  %s1349_s4 = inlined_call_operand.vmem [shape: f32[2,4,16,16], index: 4, kind: input, shape index: {}]   ;;  %s1350_s5 = inlined_call_operand.vmem [shape: f32[2,4,16,16], index: 5, kind: input, shape index: {}]   ;;  %s1351_s6 = inlined_call_operand.vmem [shape: f32[2,4,16,16], index: 6, kind: input, shape index: {}]   ;;  %s1352_s7 = inlined_call_operand.vmem [shape: f32[2,4,16,16], index: 7, kind: input, shape index: {}]   ;;  %s1353_s8 = inlined_call_operand.vmem [shape: f32[2,4,16,16], index: 8, kind: output, shape index: {0}]   ;;  %s1354_s9 = inlined_call_operand.vmem [shape: f32[2,4,16,16], index: 9, kind: output, shape index: {1}]  }
   0x1   :  { %15 = sst [smem:[#allocation2]] %s1345_s0  ;;  %s1120_s13 = smov 0  }
   0x2 LB: > { %s33_s0 = sadd.s32 1, %s1056_s12  ;;  %p986_p0 = scmp.ge.s32.totalorder %s1060_s13, 1  ;;  %s1060_s13 = sphi %s1120_s13, %s21_s13   ;;  %s1056_s12 = sphi %s1118_s12, %s1356_s12   ;;  %s1052_s11 = sphi %s1116_s11, %s1355_s11  }
   0x3   : > { %p35_p1 = scmp.ge.s32.totalorder %s33_s0, 2  ;;  %p407_p2 = scmp.lt.s32.totalorder %s1060_s13, 3 }
   0x5   : > { %s1358_s0 = smov (%p35_p1, %s33_s0), 0  ;;  %p408_p3 = pnand %p986_p0, %p407_p2 }
   0x6   : > { %p508_p4 = scmp.lt.s32.totalorder (!%p408_p3), %s1052_s11, 1  ;;  %s591_s14 = sld [smem:[#allocation2]] (!%p408_p3)  ;;  %v636_v0 = vlaneseq (!%p408_p3)  ;;  %v1062_v9 = vmov (!%p408_p3), 0   ;;  %vm705_vm2 = vcmask (!%p408_p3), 130048  }
   0x7   : > { %411 = sbr.rel (%p408_p3) target bundleno = 47 (0x2f), region = 52 }
   0x8   : > { %v637_v1 = vshrl.u32 (!%p408_p3), %v636_v0, 7 }
   0xa   : > { %v638_v2 = vsub.s32 (!%p408_p3), 0, %v637_v1 }
   0xc   : > { %v1153_v6 = vstv (!%p408_p3), %s591_s14 }
   0xe   : > { %s1360_s11 = smov (!%p508_p4, %s1052_s11), 1 }
   0xf   : > { %s510_s17 = scalar_lea.vmem %s1346_s1, %s1360_s11  ;;  %s1137_s18 = sshll.u32 %s1360_s11, 6 }
  0x10   : > { %s1143_s21 = scalar_lea.vmem %s1347_s2, %s1137_s18  ;;  %s1149_s24 = scalar_lea.vmem %s1349_s4, %s1137_s18  ;;  %v592_v3 = vld [vmem:[%s510_s17] sm:$0x1] }
  0x11   : > { %vm593_vm0 = vcmp.gt.f32.partialorder %v592_v3, 0.0  ;;  %v594_v4 = vld [vmem:[%s1143_s21] sm:$0xff]  ;;  %v595_v7 = vld [vmem:[%s1143_s21 + $0x8] sm:$0xff]  ;;  %s1161_s27 = scalar_lea.vmem %s1351_s6, %s1137_s18  ;;  %v596_v14 = vld [vmem:[%s1143_s21 + $0x10] sm:$0xff]  ;;  %s1184_s30 = scalar_lea.vmem %s1348_s3, %s1137_s18 }
  0x12   : > { %v610_v5 = vld [vmem:[%s1149_s24] sm:$0xff]  ;;  %v635_v10 = vsel %vm593_vm0, 1, %v1062_v9  ;;  %v611_v11 = vld [vmem:[%s1149_s24 + $0x8] sm:$0xff]  ;;  %v612_v15 = vld [vmem:[%s1149_s24 + $0x10] sm:$0xff]  ;;  %s1190_s14 = scalar_lea.vmem %s1350_s5, %s1137_s18  ;;  %s1202_s17 = scalar_lea.vmem %s1353_s8, %s1137_s18 }
  0x13   : > { %v618_v8 = vsub.f32 %v594_v4, %v610_v5  ;;  %v1163_v12 = vrot.slane %v635_v10, %v638_v2  ;;  %v619_v13 = vsub.f32 %v595_v7, %v611_v11  ;;  %v620_v17 = vsub.f32 %v596_v14, %v612_v15  ;;  %v597_v18 = vld [vmem:[%s1143_s21 + $0x18] sm:$0xff]  ;;  %v598_v22 = vld [vmem:[%s1143_s21 + $0x20] sm:$0xff]  ;;  %v599_v28 = vld [vmem:[%s1143_s21 + $0x28] sm:$0xff] }
  0x14   : > { %v613_v19 = vld [vmem:[%s1149_s24 + $0x18] sm:$0xff]  ;;  %v614_v23 = vld [vmem:[%s1149_s24 + $0x20] sm:$0xff]  ;;  %v615_v29 = vld [vmem:[%s1149_s24 + $0x28] sm:$0xff] }
  0x15   : > { %v627_v16 = vmul.f32 %v1153_v6, %v618_v8  ;;  %vm640_vm1 = vcmp.eq.s32.totalorder %v1163_v12, 1  ;;  %v628_v20 = vmul.f32 %v1153_v6, %v619_v13  ;;  %v621_v21 = vsub.f32 %v597_v18, %v613_v19  ;;  %v689_v25 = vld [vmem:[%s1161_s27] sm:$0xff]  ;;  %v690_v32 = vld [vmem:[%s1161_s27 + $0x8] sm:$0xff]  ;;  %v600_v35 = vld [vmem:[%s1143_s21 + $0x30] sm:$0xff] }
  0x16   : > { %v629_v26 = vmul.f32 %v1153_v6, %v620_v17  ;;  %v622_v27 = vsub.f32 %v598_v22, %v614_v23  ;;  %v623_v34 = vsub.f32 %v599_v28, %v615_v29  ;;  %v616_v36 = vld [vmem:[%s1149_s24 + $0x30] sm:$0xff]  ;;  %v1209_v42 = vld [vmem:[%s1143_s21 + $0x38] sm:$0xff]  ;;  %v1217_v49 = vld [vmem:[%s1184_s30] sm:$0xff]  ;;  %s1253_s21 = scalar_lea.vmem %s1352_s7, %s1137_s18 }
  0x17   : > { %v641_v24 = vsel %vm640_vm1, %v627_v16, 0.0  ;;  %v642_v31 = vsel %vm640_vm1, %v628_v20, 0.0  ;;  %v630_v33 = vmul.f32 %v1153_v6, %v621_v21  ;;  %v691_v39 = vld [vmem:[%s1161_s27 + $0x10] sm:$0xff]  ;;  %v624_v41 = vsub.f32 %v600_v35, %v616_v36  ;;  %v617_v43 = vld [vmem:[%s1149_s24 + $0x38] sm:$0xff]  ;;  %v649_v50 = vld [vmem:[%s1190_s14] sm:$0xff]  ;;  %s1292_s24 = scalar_lea.vmem %s1354_s9, %s1137_s18 }
  0x18   : > { %v681_v30 = vsub.f32 %v594_v4, %v641_v24  ;;  %v682_v37 = vsub.f32 %v595_v7, %v642_v31  ;;  %v643_v38 = vsel %vm640_vm1, %v629_v26, 0.0  ;;  %v631_v40 = vmul.f32 %v1153_v6, %v622_v27  ;;  %v692_v47 = vld [vmem:[%s1161_s27 + $0x18] sm:$0xff]  ;;  %v693_v54 = vld [vmem:[%s1161_s27 + $0x20] sm:$0xff]  ;;  %v1225_v56 = vld [vmem:[%s1184_s30 + $0x8] sm:$0xff] }
  0x19   : > { %v683_v45 = vsub.f32 %v596_v14, %v643_v38  ;;  %v644_v46 = vsel %vm640_vm1, %v630_v33, 0.0  ;;  %v632_v48 = vmul.f32 %v1153_v6, %v623_v34  ;;  %v633_v55 = vmul.f32 %v1153_v6, %v624_v41  ;;  %v650_v57 = vld [vmem:[%s1190_s14 + $0x8] sm:$0xff]  ;;  %v1235_v63 = vld [vmem:[%s1184_s30 + $0x10] sm:$0xff]  ;;  %v605_v7 = vld [vmem:[%s1184_s30 + $0x18] sm:$0xff] }
  0x1a   : > { %v697_v44 = vsub.f32 %v681_v30, %v689_v25  ;;  %v698_v51 = vsub.f32 %v682_v37, %v690_v32  ;;  %v684_v52 = vsub.f32 %v597_v18, %v644_v46  ;;  %v645_v53 = vsel %vm640_vm1, %v631_v40, 0.0  ;;  %v694_v61 = vld [vmem:[%s1161_s27 + $0x28] sm:$0xff]  ;;  %v651_v0 = vld [vmem:[%s1190_s14 + $0x10] sm:$0xff]  ;;  %v652_v8 = vld [vmem:[%s1190_s14 + $0x18] sm:$0xff] }
  0x1b   : > { %v699_v58 = vsub.f32 %v683_v45, %v691_v39  ;;  %v685_v59 = vsub.f32 %v598_v22, %v645_v53  ;;  %v646_v60 = vsel %vm640_vm1, %v632_v48, 0.0  ;;  %v625_v62 = vsub.f32 %v1209_v42, %v617_v43  ;;  %v695_v4 = vld [vmem:[%s1161_s27 + $0x30] sm:$0xff]  ;;  %v606_v14 = vld [vmem:[%s1184_s30 + $0x20] sm:$0xff]  ;;  %v607_v20 = vld [vmem:[%s1184_s30 + $0x28] sm:$0xff] }
  0x1c   : > { %706 = vst.msk [vmem:[%s1202_s17] sm:$0xff] %vm705_vm2, %v697_v44  ;;  %707 = vst.msk [vmem:[%s1202_s17 + $0x8] sm:$0xff] %vm705_vm2, %v698_v51  ;;  %v700_v1 = vsub.f32 %v684_v52, %v692_v47  ;;  %v686_v2 = vsub.f32 %v599_v28, %v646_v60  ;;  %v647_v3 = vsel %vm640_vm1, %v633_v55, 0.0  ;;  %v657_v5 = vsub.f32 %v1217_v49, %v649_v50  ;;  %v653_v15 = vld [vmem:[%s1190_s14 + $0x20] sm:$0xff]  ;;  %v654_v21 = vld [vmem:[%s1190_s14 + $0x28] sm:$0xff] }
  0x1d   : > { %708 = vst.msk [vmem:[%s1202_s17 + $0x10] sm:$0xff] %vm705_vm2, %v699_v58  ;;  %v701_v9 = vsub.f32 %v685_v59, %v693_v54  ;;  %v687_v10 = vsub.f32 %v600_v35, %v647_v3  ;;  %v634_v11 = vmul.f32 %v1153_v6, %v625_v62  ;;  %v658_v13 = vsub.f32 %v1225_v56, %v650_v57  ;;  %v696_v24 = vld [vmem:[%s1161_s27 + $0x38] sm:$0xff]  ;;  %v722_v29 = vld [vmem:[%s1253_s21] sm:$0xff]  ;;  %v723_v30 = vld [vmem:[%s1253_s21 + $0x8] sm:$0xff] }
  0x1e   : > { %709 = vst.msk [vmem:[%s1202_s17 + $0x18] sm:$0xff] %vm705_vm2, %v700_v1  ;;  %v702_v16 = vsub.f32 %v686_v2, %v694_v61  ;;  %v665_v17 = vmul.f32 %v657_v5, %v1153_v6  ;;  %v659_v18 = vsub.f32 %v1235_v63, %v651_v0  ;;  %v660_v19 = vsub.f32 %v605_v7, %v652_v8  ;;  %v724_v35 = vld [vmem:[%s1253_s21 + $0x10] sm:$0xff]  ;;  %v725_v44 = vld [vmem:[%s1253_s21 + $0x18] sm:$0xff]  ;;  %v726_v51 = vld [vmem:[%s1253_s21 + $0x20] sm:$0xff] }
  0x1f   : > { %710 = vst.msk [vmem:[%s1202_s17 + $0x20] sm:$0xff] %vm705_vm2, %v701_v9  ;;  %v703_v22 = vsub.f32 %v687_v10, %v695_v4  ;;  %v648_v23 = vsel %vm640_vm1, %v634_v11, 0.0  ;;  %v666_v25 = vmul.f32 %v658_v13, %v1153_v6  ;;  %v661_v26 = vsub.f32 %v606_v14, %v653_v15  ;;  %v608_v38 = vld [vmem:[%s1184_s30 + $0x30] sm:$0xff]  ;;  %v609_v45 = vld [vmem:[%s1184_s30 + $0x38] sm:$0xff]  ;;  %v727_v61 = vld [vmem:[%s1253_s21 + $0x28] sm:$0xff] }
  0x20   : > { %711 = vst.msk [vmem:[%s1202_s17 + $0x28] sm:$0xff] %vm705_vm2, %v702_v16  ;;  %v688_v27 = vsub.f32 %v1209_v42, %v648_v23  ;;  %v673_v28 = vsel %vm640_vm1, %v665_v17, 0.0  ;;  %v667_v31 = vmul.f32 %v659_v18, %v1153_v6  ;;  %v668_v32 = vmul.f32 %v660_v19, %v1153_v6  ;;  %v655_v39 = vld [vmem:[%s1190_s14 + $0x30] sm:$0xff]  ;;  %v656_v46 = vld [vmem:[%s1190_s14 + $0x38] sm:$0xff] }
  0x21   : > { %712 = vst.msk [vmem:[%s1202_s17 + $0x30] sm:$0xff] %vm705_vm2, %v703_v22  ;;  %v714_v33 = vsub.f32 %v1217_v49, %v673_v28  ;;  %v674_v34 = vsel %vm640_vm1, %v666_v25, 0.0  ;;  %v669_v36 = vmul.f32 %v661_v26, %v1153_v6  ;;  %v662_v37 = vsub.f32 %v607_v20, %v654_v21  ;;  %v728_v2 = vld [vmem:[%s1253_s21 + $0x30] sm:$0xff] }
  0x22   : > { %v704_v40 = vsub.f32 %v688_v27, %v696_v24  ;;  %v715_v41 = vsub.f32 %v1225_v56, %v674_v34  ;;  %v675_v42 = vsel %vm640_vm1, %v667_v31, 0.0  ;;  %v676_v43 = vsel %vm640_vm1, %v668_v32, 0.0 }
  0x23   : > { %v730_v47 = vsub.f32 %v714_v33, %v722_v29  ;;  %v716_v48 = vsub.f32 %v1235_v63, %v675_v42  ;;  %v717_v49 = vsub.f32 %v605_v7, %v676_v43  ;;  %v677_v50 = vsel %vm640_vm1, %v669_v36, 0.0  ;;  %v729_v7 = vld [vmem:[%s1253_s21 + $0x38] sm:$0xff] }
  0x24   : > { %713 = vst.msk [vmem:[%s1202_s17 + $0x38] sm:$0xff] %vm705_vm2, %v704_v40  ;;  %v731_v52 = vsub.f32 %v715_v41, %v723_v30  ;;  %v718_v53 = vsub.f32 %v606_v14, %v677_v50  ;;  %v670_v54 = vmul.f32 %v662_v37, %v1153_v6  ;;  %v663_v55 = vsub.f32 %v608_v38, %v655_v39 }
  0x25   : > { %738 = vst.msk [vmem:[%s1292_s24] sm:$0xff] %vm705_vm2, %v730_v47  ;;  %v732_v56 = vsub.f32 %v716_v48, %v724_v35  ;;  %v733_v57 = vsub.f32 %v717_v49, %v725_v44  ;;  %v664_v58 = vsub.f32 %v609_v45, %v656_v46 }
  0x26   : > { %739 = vst.msk [vmem:[%s1292_s24 + $0x8] sm:$0xff] %vm705_vm2, %v731_v52  ;;  %v734_v59 = vsub.f32 %v718_v53, %v726_v51  ;;  %v678_v60 = vsel %vm640_vm1, %v670_v54, 0.0  ;;  %v671_v62 = vmul.f32 %v663_v55, %v1153_v6 }
  0x27   : > { %740 = vst.msk [vmem:[%s1292_s24 + $0x10] sm:$0xff] %vm705_vm2, %v732_v56  ;;  %741 = vst.msk [vmem:[%s1292_s24 + $0x18] sm:$0xff] %vm705_vm2, %v733_v57  ;;  %v719_v63 = vsub.f32 %v607_v20, %v678_v60  ;;  %v672_v0 = vmul.f32 %v664_v58, %v1153_v6 }
  0x28   : > { %742 = vst.msk [vmem:[%s1292_s24 + $0x20] sm:$0xff] %vm705_vm2, %v734_v59  ;;  %v679_v1 = vsel %vm640_vm1, %v671_v62, 0.0 }
  0x29   : > { %v735_v3 = vsub.f32 %v719_v63, %v727_v61  ;;  %v720_v4 = vsub.f32 %v608_v38, %v679_v1  ;;  %v680_v5 = vsel %vm640_vm1, %v672_v0, 0.0 }
  0x2a   : > { %v721_v8 = vsub.f32 %v609_v45, %v680_v5 }
  0x2b   : > { %743 = vst.msk [vmem:[%s1292_s24 + $0x28] sm:$0xff] %vm705_vm2, %v735_v3  ;;  %v736_v9 = vsub.f32 %v720_v4, %v728_v2 }
  0x2c   : > { %v737_v10 = vsub.f32 %v721_v8, %v729_v7 }
  0x2d   : > { %744 = vst.msk [vmem:[%s1292_s24 + $0x30] sm:$0xff] %vm705_vm2, %v736_v9 }
  0x2e   : > { %745 = vst.msk [vmem:[%s1292_s24 + $0x38] sm:$0xff] %vm705_vm2, %v737_v10 }
  0x2f PF: > { %s21_s13 = sadd.s32 1, %s1060_s13   ;;  %s1355_s11 = smov %s1056_s12 }
  0x30   : > { %p18_p5 = scmp.ge.s32.totalorder %s21_s13, 4   ;;  %s1356_s12 = smov %s1358_s0 }
  0x32   :  { %20 = sbr.rel (!%p18_p5) target bundleno = 2 (0x2), region = 112 }

// kernel: mamba_varnet_forward.13
= control target key start
LH: loop header
LB: loop body
LE: loop exit
PB: predicated region body
PF: predicated region fallthrough
CT: control target
= control target key end

     0   :  { %7 = vsyncpa [#allocation3], 0  ;;  %s720_s0 = inlined_call_operand.vmem [shape: f32[2,4,16,16], index: 0, kind: input, shape index: {}]   ;;  %s721_s1 = inlined_call_operand.vmem [shape: f32[2,4,16,16], index: 1, kind: input, shape index: {}]   ;;  %s722_s2 = inlined_call_operand.hbm [shape: f32[2,16,16], index: 2, kind: output, shape index: {}]  }
   0x1   :  { %9 = vsyncpa [#allocation3 + $0x1], 0  ;;  %s580_s9 = smov 0   ;;  %s582_s10 = smov 0  }
   0x2   :  { %s584_s11 = smov 0   ;;  %s586_s12 = smov 0  }
   0x3   :  { %s588_s13 = smov 0   ;;  %s590_s14 = smov 0  }
   0x4 LB: > { %s391_s15 = sadd.s32 4294967295, %s560_s14   ;;  %s392_s16 = sadd.s32 4294967294, %s560_s14   ;;  %s560_s14 = sphi %s590_s14, %s15_s14   ;;  %s556_s13 = sphi %s588_s13, %s729_s13   ;;  %s552_s12 = sphi %s586_s12, %s728_s12   ;;  %s548_s11 = sphi %s584_s11, %s727_s11   ;;  %s544_s10 = sphi %s582_s10, %s726_s10   ;;  %s540_s9 = sphi %s580_s9, %s725_s9  }
   0x5   : > { %s27_s17 = sadd.s32 1, %s556_s13  ;;  %s92_s18 = sadd.s32 1, %s548_s11 }
   0x6   : > { %p29_p0 = scmp.ge.s32.totalorder %s27_s17, 2  ;;  %p102_p1 = scmp.ne.s32.totalorder %s548_s11, %s544_s10 }
   0x7   : > { %p103_p2 = scmp.eq.s32.totalorder %s391_s15, 1  ;;  %p108_p3 = scmp.ne.s32.totalorder %s544_s10, %s540_s9 }
   0x8   : > { %s731_s17 = smov (%p29_p0, %s27_s17), 0  ;;  %p109_p5 = scmp.eq.s32.totalorder %s392_s16, 1 }
   0x9   : > { %p620_p4 = por %p103_p2, %p102_p1  ;;  %s87_s20 = ssub.s32 %s556_s13, %s731_s17 }
   0xa   : > { %p395_p6 = scmp.ge.s32.totalorder %s560_s14, 1  ;;  %p90_p7 = scmp.eq.s32.totalorder %s87_s20, 0 }
   0xb   : > { %p627_p8 = por %p109_p5, %p108_p3  ;;  %p153_p9 = scmp.lt.s32.totalorder %s560_s14, 3 }
   0xc   : > { %s633_s22 = scalar_select %p90_p7, %s548_s11, %s92_s18  }
   0xd   : > { %p154_p10 = pnand %p395_p6, %p153_p9 }
   0xe   : > { %p189_p11 = scmp.lt.s32.totalorder (!%p154_p10), %s552_s12, 1  ;;  %s185_s3 = sand.u32 (!%p154_p10), 1, %s544_s10   ;;  %vm275_vm2 = vcmask (!%p154_p10), 130048  }
   0xf   : > { %157 = sbr.rel (%p154_p10) target bundleno = 75 (0x4b), region = 28  ;;  %s396_s4 = sshll.u32 (!%p154_p10), %s185_s3, 4 }
  0x10   : > { %s187_s5 = scalar_lea.vmem (!%p154_p10), [#allocation2], %s396_s4  ;;  %s420_s7 = sshll.u32 (!%p154_p10), %s552_s12, 8 }
  0x11   : > { %s294_s6 = sshll.u32 (!%p154_p10), %s187_s5, 4  ;;  %s671_s16 = scalar_lea.hbm (!%p154_p10), %s722_s2, %s420_s7  ;;  %s666_s6 = int_to_ptr.vmem [resolvable:$true] %s294_s6 }
  0x12   : > { %s482_s18 = scalar_lea.vmem (!%p154_p10), %s666_s6, 256  ;;  %s562_s20 = smov (!%p154_p10), [#allocation2]  }
  0x13   : > { %p483_p12 = scmp.ne.s32.totalorder (!%p154_p10), %s666_s6, %s482_s18 }
  0x15   : > { %p484_p13 = pnand (!%p154_p10), %p483_p12, %p620_p4 }
  0x16   : > { %s190_s23 = scalar_select %p189_p11, %s552_s12, 1 }
  0x17   : > { %s674_s12 = scalar_lea.sflag [#allocation3], %s185_s3  ;;  %p485_p0 = pneg %p484_p13 }
  0x18   : > { %s418_s24 = sshll.u32 %s190_s23, 6  ;;  %s486_s23 = sshll.u32 %s562_s20, 4  ;;  %s487_s23 = int_to_ptr.vmem [resolvable:$false] %s486_s23 }
  0x19   : > { %s640_s27 = scalar_lea.vmem %s720_s0, %s418_s24  ;;  %s645_s30 = scalar_lea.vmem %s721_s1, %s418_s24 }
  0x1a   : > { %v209_v0 = vld [vmem:[%s640_s27] sm:$0xff]  ;;  %v401_v2 = vld [vmem:[%s640_s27 + $0x10] sm:$0xff]  ;;  %v210_v8 = vld [vmem:[%s640_s27 + $0x8] sm:$0xff]  ;;  %s488_s24 = scalar_lea.vmem %s487_s23, 512  ;;  %p489_p1 = scmp.lt.s32.totalorder %s666_s6, %s487_s23 }
  0x1b   : > { %v211_v1 = vld [vmem:[%s645_s30] sm:$0xff]  ;;  %v213_v3 = vmul.f32 %v209_v0, %v209_v0  ;;  %v403_v5 = vld [vmem:[%s645_s30 + $0x10] sm:$0xff]  ;;  %v225_v6 = vmul.f32 %v401_v2, %v401_v2  ;;  %v212_v11 = vld [vmem:[%s645_s30 + $0x8] sm:$0xff]  ;;  %v214_v12 = vmul.f32 %v210_v8, %v210_v8  ;;  %p490_p2 = scmp.lt.s32.totalorder %s488_s24, %s482_s18 }
  0x1c   : > { %v215_v4 = vmul.f32 %v211_v1, %v211_v1  ;;  %v405_v7 = vld [vmem:[%s640_s27 + $0x20] sm:$0xff]  ;;  %v229_v10 = vmul.f32 %v403_v5, %v403_v5  ;;  %v402_v13 = vld [vmem:[%s640_s27 + $0x18] sm:$0xff]  ;;  %v216_v16 = vmul.f32 %v212_v11, %v212_v11  ;;  %v406_v20 = vld [vmem:[%s640_s27 + $0x28] sm:$0xff] }
  0x1d   : > { %v404_v14 = vld [vmem:[%s645_s30 + $0x18] sm:$0xff]  ;;  %v407_v15 = vld [vmem:[%s645_s30 + $0x20] sm:$0xff]  ;;  %v226_v17 = vmul.f32 %v402_v13, %v402_v13  ;;  %v239_v19 = vmul.f32 %v405_v7, %v405_v7  ;;  %v409_v21 = vld [vmem:[%s640_s27 + $0x30] sm:$0xff]  ;;  %v240_v29 = vmul.f32 %v406_v20, %v406_v20  ;;  %p491_p3 = por %p490_p2, %p489_p1 }
  0x1e   : > { %v217_v9 = vadd.f32 %v215_v4, %v213_v3  ;;  %v218_v22 = vadd.f32 %v216_v16, %v214_v12  ;;  %v230_v23 = vmul.f32 %v404_v14, %v404_v14  ;;  %v243_v25 = vmul.f32 %v407_v15, %v407_v15  ;;  %v408_v26 = vld [vmem:[%s645_s30 + $0x28] sm:$0xff]  ;;  %v411_v27 = vld [vmem:[%s645_s30 + $0x30] sm:$0xff]  ;;  %v410_v32 = vld [vmem:[%s640_s27 + $0x38] sm:$0xff] }
  0x1f   : > { %v253_v31 = vmul.f32 %v409_v21, %v409_v21  ;;  %v244_v34 = vmul.f32 %v408_v26, %v408_v26  ;;  %v257_v36 = vmul.f32 %v411_v27, %v411_v27  ;;  %v412_v37 = vld [vmem:[%s645_s30 + $0x38] sm:$0xff]  ;;  %v254_v39 = vmul.f32 %v410_v32, %v410_v32  ;;  %p492_p5 = pnand %p491_p3, %p485_p0 }
  0x20   : > { %v227_v18 = vadd.f32 %v225_v6, %v217_v9  ;;  %v228_v28 = vadd.f32 %v226_v17, %v218_v22  ;;  %v258_v42 = vmul.f32 %v412_v37, %v412_v37 }
  0x22   : > { %v231_v24 = vadd.f32 %v229_v10, %v227_v18  ;;  %v232_v33 = vadd.f32 %v230_v23, %v228_v28 }
  0x24   : > { %v241_v30 = vadd.f32 %v239_v19, %v231_v24  ;;  %v242_v38 = vadd.f32 %v240_v29, %v232_v33 }
  0x26   : > { %v245_v35 = vadd.f32 %v243_v25, %v241_v30  ;;  %v246_v41 = vadd.f32 %v244_v34, %v242_v38 }
  0x28   : > { %v255_v40 = vadd.f32 %v253_v31, %v245_v35  ;;  %v256_v44 = vadd.f32 %v254_v39, %v246_v41 }
  0x2a   : > { %v259_v43 = vadd.f32 %v257_v36, %v255_v40  ;;  %v260_v45 = vadd.f32 %v258_v42, %v256_v44 }
  0x2c   : > { %478 = vrsqrt.f32 %v259_v43  ;;  %vm263_vm0 = vcmp.eq.f32.partialorder %v259_v43, inf  ;;  %v266_v47 = vand.u32 2147483648, %v259_v43  ;;  %vm265_vm1 = vcmp.eq.f32.partialorder %v259_v43, 0.0 }
  0x2d   : > { %480 = vrsqrt.f32 %v260_v45  ;;  %vm270_vm3 = vcmp.eq.f32.partialorder %v260_v45, inf  ;;  %v273_v51 = vand.u32 2147483648, %v260_v45  ;;  %vm272_vm4 = vcmp.eq.f32.partialorder %v260_v45, 0.0 }
  0x36   : > { %v479_v46 = vpop.eup %478 }
  0x37   : > { %v262_v48 = vmul.f32 %v479_v46, %v259_v43  ;;  %v481_v49 = vpop.eup %480 }
  0x38   : > { %v269_v53 = vmul.f32 %v481_v49, %v260_v45 }
  0x39   : > { %v264_v50 = vsel %vm263_vm0, %v259_v43, %v262_v48 }
  0x3a   : > { %v267_v52 = vsel %vm265_vm1, %v266_v47, %v264_v50  ;;  %v271_v54 = vsel %vm270_vm3, %v260_v45, %v269_v53 }
  0x3b   : > { %276 = vst.msk [vmem:[%s187_s5] sm:$0xff] %vm275_vm2, %v267_v52  ;;  %v274_v55 = vsel %vm272_vm4, %v273_v51, %v271_v54 }
  0x3c   : > { %277 = vst.msk [vmem:[%s187_s5 + $0x8] sm:$0xff] %vm275_vm2, %v274_v55 }
  0x3d   : > { %495 = shalt.err (!%p492_p5)
}
  0x3e   : > { %s496_s25 = scalar_lea.hbm %s671_s16, 256  ;;  %s500_s28 = scalar_lea.hbm %s722_s2, 512 }
  0x3f   : > { %p497_p6 = scmp.ne.s32.totalorder %s671_s16, %s496_s25  ;;  %p501_p10 = scmp.lt.u32.totalorder %s671_s16, %s722_s2 }
  0x40   : > { %p502_p11 = scmp.lt.u32.totalorder %s500_s28, %s496_s25  ;;  %p504_p13 = scmp.lt.u32.totalorder %s496_s25, %s671_s16 }
  0x41   : > { %p498_p7 = pnand %p497_p6, %p620_p4 }
  0x42   : > { %p503_p12 = por %p502_p11, %p501_p10 }
  0x43   : > { %p499_p9 = pneg %p498_p7 }
  0x44   : > { %p505_p0 = por %p504_p13, %p503_p12 }
  0x46   : > { %p506_p1 = pnand %p505_p0, %p499_p9 }
  0x48   : > { %509 = shalt.err (!%p506_p1)
}
  0x49   : > { %s563_s3 = smov 128   ;;  %s564_s4 = smov 8  }
  0x4a   : > { %421 = dma.vmem_to_hbm [thread:$0]  (%p620_p4), %s666_s6, 256, %s671_s16, %s674_s12, %s563_s3, %s563_s3, %s564_s4  }
  0x4b PF: > { %p427_p2 = scmp.ge.s32.totalorder %s560_s14, 2  ;;  %s309_s5 = sand.u32 1, %s540_s9  }
  0x4c   : > { %s310_s7 = scalar_lea.sflag [#allocation3], %s309_s5 }
  0x4d   : > { %p424_p3 = pnand %p427_p2, %p627_p8 }
  0x4f   : > { %535 = dma.done.wait (!%p424_p3), %s310_s7, 256  }
  0x50   : > { %537 = vsyncadd (!%p424_p3), %s310_s7, 4294967040  ;;  %s15_s14 = sadd.s32 1, %s560_s14   ;;  %s725_s9 = smov %s544_s10 }
  0x51   : > { %p12_p5 = scmp.ge.s32.totalorder %s15_s14, 4   ;;  %s726_s10 = smov %s548_s11 }
  0x52   : > { %s727_s11 = smov %s633_s22  ;;  %s728_s12 = smov %s556_s13 }
  0x53   : > { %s729_s13 = smov %s731_s17  ;;  %14 = sbr.rel (!%p12_p5) target bundleno = 4 (0x4), region = 72 }
  0x5a   :  { %315 = vsyncpa [#allocation3], 1 }
  0x5b   :  { %317 = vsyncpa [#allocation3 + $0x1], 1 }

</bundles_post_ra>
